<compile_context>
chip_gen: v5e
topology: v5e:2x2
jax: 0.10.0
libtpu: 0.0.40
codegen_flags: <defaults>
</compile_context>

<pallas_src>
import functools

import jax
import jax.numpy as jnp
import numpy as np
from jax import lax
from jax.experimental import pallas as pl
from jax.experimental.pallas import tpu as pltpu


def _gather_splice_mult_kernel(ids_ref, spl_ref, mult_ref, w_hbm, ti_hbm,
                               zm_ref, sums_ref, gbuf, sem,
                               *, block_rows, n_valid):
    """DMA-gather embedding rows (token table or TI table, chosen per row), apply the
    per-token emphasis multipliers, accumulate global partial sums for the rescale.

    ids_ref  : (BS_pad,) int32  SMEM   token ids
    spl_ref  : (BS_pad,) int32  SMEM   >=0 -> TI row index, -1 -> token embedding
    mult_ref : (BS_pad,) f32    SMEM   emphasis multipliers
    w_hbm    : (V, H)           HBM    token embedding table
    ti_hbm   : (T, H)           HBM    stacked textual-inversion vectors
    zm_ref   : (R, H)    f32    VMEM   output block: z * multiplier
    sums_ref : (2, H)    f32    VMEM   grid-resident: row0 = sum(z), row1 = sum(z*mult)
    gbuf     : (2, R, H)        VMEM   double-buffered gather landing zone
    sem      : (2, R)           DMA semaphores (one per gathered row, per slot)
    """
    i = pl.program_id(0)
    nb = pl.num_programs(0)
    R = block_rows

    def issue_block(block, slot):
        base = block * R
        for r in range(R):                       # static unroll (R is small)
            tok = ids_ref[base + r]
            ti_idx = spl_ref[base + r]

            @pl.when(ti_idx < 0)                 # normal token embedding row
            def _():
                pltpu.make_async_copy(w_hbm.at[tok], gbuf.at[slot, r],
                                      sem.at[slot, r]).start()

            @pl.when(ti_idx >= 0)                # textual-inversion row (splice)
            def _():
                pltpu.make_async_copy(ti_hbm.at[ti_idx], gbuf.at[slot, r],
                                      sem.at[slot, r]).start()

    # Prime the pipeline and zero the resident sums accumulator.
    @pl.when(i == 0)
    def _():
        issue_block(0, 0)
        sums_ref[...] = jnp.zeros_like(sums_ref)

    slot = i % 2

    # Prefetch the next row-block into the other slot while this one computes.
    @pl.when(i + 1 < nb)
    def _():
        issue_block(i + 1, 1 - slot)

    # Wait for this block's row gathers (both sources copy the same (H,) byte count).
    for r in range(R):
        pltpu.make_async_copy(w_hbm.at[0], gbuf.at[slot, r], sem.at[slot, r]).wait()

    z = gbuf[slot].astype(jnp.float32)           # (R, H), TI splice already done by DMA

    # Per-row multipliers, built from SMEM scalars (R is small & static).
    base = i * R
    row_iota = lax.broadcasted_iota(jnp.int32, (R, 1), 0)
    mcol = jnp.zeros((R, 1), jnp.float32)
    for r in range(R):
        mcol = jnp.where(row_iota == r, mult_ref[base + r], mcol)

    zm = z * mcol                                # (R, H)
    zm_ref[...] = zm.astype(zm_ref.dtype)

    # Partial sums for the mean-restoration rescale; mask out padded rows.
    valid = (base + row_iota) < n_valid          # (R, 1)
    colsum_z = jnp.sum(jnp.where(valid, z, 0.0), axis=0, keepdims=True)    # (1, H)
    colsum_zm = jnp.sum(jnp.where(valid, zm, 0.0), axis=0, keepdims=True)  # (1, H)
    sums_ref[0:1, :] = sums_ref[0:1, :] + colsum_z
    sums_ref[1:2, :] = sums_ref[1:2, :] + colsum_zm


def _apply_scale_kernel(scale_ref, zm_ref, out_ref):
    """Second sweep: apply the global mean-restoration scale (scalar lives in SMEM)."""
    out_ref[...] = zm_ref[...] * scale_ref[0]


@functools.partial(jax.jit, static_argnames=("block_rows",))
def clip_ti_emphasis(input_ids, splice_idx, batch_multipliers, weight, ti_table,
                     *, block_rows=8):
    """input_ids, splice_idx, batch_multipliers: (B, S); weight: (V, H); ti_table: (T, H)."""
    B, S = input_ids.shape
    V, H = weight.shape
    T = ti_table.shape[0]
    BS = B * S
    R = block_rows
    BS_pad = ((BS + R - 1) // R) * R
    NB = BS_pad // R

    ids = input_ids.reshape(BS).astype(jnp.int32)
    spl = splice_idx.reshape(BS).astype(jnp.int32)
    mul = batch_multipliers.reshape(BS).astype(jnp.float32)
    if BS_pad != BS:
        pad = BS_pad - BS
        ids = jnp.concatenate([ids, jnp.zeros((pad,), jnp.int32)])
        spl = jnp.concatenate([spl, jnp.full((pad,), -1, jnp.int32)])
        mul = jnp.concatenate([mul, jnp.zeros((pad,), jnp.float32)])

    # Gather traffic scales with the table dtype (bf16 tables halve per-row DMA bytes
    # on v5e/v6e); compute stays f32.
    ti = ti_table.astype(weight.dtype)

    kernel1 = functools.partial(_gather_splice_mult_kernel,
                                block_rows=R, n_valid=BS)

    zm, sums = pl.pallas_call(
        kernel1,
        out_shape=(jax.ShapeDtypeStruct((BS_pad, H), jnp.float32),
                   jax.ShapeDtypeStruct((2, H), jnp.float32)),
        grid=(NB,),
        in_specs=[
            pl.BlockSpec(memory_space=pltpu.MemorySpace.SMEM),   # token ids
            pl.BlockSpec(memory_space=pltpu.MemorySpace.SMEM),   # splice indices
            pl.BlockSpec(memory_space=pltpu.MemorySpace.SMEM),   # multipliers
            pl.BlockSpec(memory_space=pl.ANY),                   # embedding table (HBM)
            pl.BlockSpec(memory_space=pl.ANY),                   # TI table (HBM)
        ],
        out_specs=(
            pl.BlockSpec((R, H), lambda i: (i, 0)),              # z * mult
            pl.BlockSpec((2, H), lambda i: (0, 0)),              # resident partial sums
        ),
        scratch_shapes=[
            pltpu.VMEM((2, R, H), weight.dtype),                 # double-buffered gather
            pltpu.SemaphoreType.DMA((2, R)),
        ],
        compiler_params=pltpu.CompilerParams(
            dimension_semantics=("arbitrary",),                  # sequential sum carry
            vmem_limit_bytes=16 * 1024 * 1024),
    )(ids, spl, mul, weight, ti)

    # mean(z) / mean(z*mult) == sum(z) / sum(z*mult) (identical element counts).
    scale = (jnp.sum(sums[0]) / jnp.sum(sums[1])).reshape(1).astype(jnp.float32)

    out = pl.pallas_call(
        _apply_scale_kernel,
        out_shape=jax.ShapeDtypeStruct((BS_pad, H), jnp.float32),
        grid=(NB,),
        in_specs=[
            pl.BlockSpec(memory_space=pltpu.MemorySpace.SMEM),   # scalar scale
            pl.BlockSpec((R, H), lambda i: (i, 0)),
        ],
        out_specs=pl.BlockSpec((R, H), lambda i: (i, 0)),
        compiler_params=pltpu.CompilerParams(
            dimension_semantics=("parallel",),
            vmem_limit_bytes=16 * 1024 * 1024),
    )(scale, zm)

    return out[:BS].reshape(B, S, H)


def _reference(input_ids, splice_idx, batch_multipliers, weight, ti_table):
    """Plain-JAX reference mirroring the PyTorch module's forward."""
    emb = weight[input_ids]                                    # (B, S, H) embedding lookup
    ti_rows = ti_table[jnp.maximum(splice_idx, 0)]             # (B, S, H)
    z = jnp.where((splice_idx >= 0)[..., None], ti_rows, emb)  # TI splice
    orig_mean = z.mean()
    zm = z * batch_multipliers[..., None]
    return zm * (orig_mean / zm.mean())


def _build_splice_idx(B, S, batch_fixes, ti_lengths):
    """Glue: convert webui-style `fixes` = [[(offset, emb_id), ...], ...] into a per-token
    index into the stacked TI table (-1 means 'keep the normal token embedding')."""
    splice = -np.ones((B, S), dtype=np.int32)
    ti_offsets = np.concatenate([[0], np.cumsum(ti_lengths)])[:-1]
    for b, fixes in enumerate(batch_fixes):
        for offset, emb_id in fixes:
            emb_len = min(S - offset - 1, ti_lengths[emb_id])
            for k in range(emb_len):
                splice[b, offset + 1 + k] = ti_offsets[emb_id] + k
    return jnp.asarray(splice)


if __name__ == "__main__":
    # Small, module-consistent shapes: batch=2, seq=8, hidden=128 (lane-dense), vocab=64.
    B, S, H, V = 2, 8, 128, 64

    key = jax.random.PRNGKey(0)
    k_w, k_ti, k_ids, k_mult = jax.random.split(key, 4)

    # Deterministic synthetic parameters (no checkpoint load); small positive bias keeps
    # the global mean well away from zero so the rescale ratio is numerically stable.
    weight = jax.random.normal(k_w, (V, H), dtype=jnp.float32) * 0.02 + 0.03

    # Two textual-inversion embeddings: 3 vectors and 2 vectors, stacked and padded -> (8, H).
    ti_lengths = [3, 2]
    T = 8
    ti_table = jax.random.normal(k_ti, (T, H), dtype=jnp.float32) * 0.05 + 0.03

    input_ids = jax.random.randint(k_ids, (B, S), 0, V, dtype=jnp.int32)

    # fixes: batch 0 gets embedding 0 at offset 2, batch 1 gets embedding 1 at offset 5.
    batch_fixes = [[(2, 0)], [(5, 1)]]
    splice_idx = _build_splice_idx(B, S, batch_fixes, ti_lengths)

    # Per-token emphasis multipliers in [0.8, 1.4].
    batch_multipliers = 0.8 + 0.6 * jax.random.uniform(k_mult, (B, S), dtype=jnp.float32)

    out = clip_ti_emphasis(input_ids, splice_idx, batch_multipliers, weight, ti_table,
                           block_rows=8)
    out = jax.block_until_ready(out)

    ref = _reference(input_ids, splice_idx, batch_multipliers, weight, ti_table)
    np.testing.assert_allclose(np.asarray(out), np.asarray(ref), rtol=2e-5, atol=2e-6)

    print("KERNEL_OK")
</pallas_src>

<mosaic_0001>
module attributes {stable_mosaic.version = 11 : i64} {
  func.func @_apply_scale_kernel(%arg0: i32, %arg1: memref<1xf32, #tpu.memory_space<smem>>, %arg2: memref<8x128xf32, #tpu.memory_space<vmem>>, %arg3: memref<8x128xf32, #tpu.memory_space<vmem>>) attributes {dimension_semantics = [#tpu.dimension_semantics<parallel>], iteration_bounds = array<i64: 2>, scalar_prefetch = 0 : i64, scratch_operands = 0 : i64, tpu.core_type = #tpu.core_type<tc>, window_params = [{transform_indices = @transform_0, window_bounds = array<i64: 1>}, {transform_indices = @transform_1, window_bounds = array<i64: 8, 128>}, {transform_indices = @transform_2, window_bounds = array<i64: 8, 128>}]} {
    %c0 = arith.constant 0 : index
    %c0_0 = arith.constant 0 : index
    %0 = vector.load %arg2[%c0, %c0_0] : memref<8x128xf32, #tpu.memory_space<vmem>>, vector<8x128xf32>
    %c0_1 = arith.constant 0 : index
    %1 = memref.load %arg1[%c0_1] : memref<1xf32, #tpu.memory_space<smem>>
    %2 = vector.broadcast %1 : f32 to vector<8x128xf32>
    %3 = arith.mulf %0, %2 : vector<8x128xf32>
    %c0_2 = arith.constant 0 : index
    %c0_3 = arith.constant 0 : index
    %4 = vector.load %arg3[%c0_2, %c0_3] : memref<8x128xf32, #tpu.memory_space<vmem>>, vector<8x128xf32>
    tpu.vector_store %arg3[%c0_2, %c0_3], %3 {strides = array<i32>} : memref<8x128xf32, #tpu.memory_space<vmem>>, vector<8x128xf32>,
    return
  }
  func.func @transform_0(%arg0: i32) -> i32 {
    %c0_i32 = arith.constant 0 : i32
    %c0_i32_0 = arith.constant 0 : i32
    return %c0_i32 : i32
  }
  func.func @transform_1(%arg0: i32) -> (i32, i32) {
    %c0_i32 = arith.constant 0 : i32
    %c0_i32_0 = arith.constant 0 : i32
    return %arg0, %c0_i32 : i32, i32
  }
  func.func @transform_2(%arg0: i32) -> (i32, i32) {
    %c0_i32 = arith.constant 0 : i32
    %c0_i32_0 = arith.constant 0 : i32
    return %arg0, %c0_i32 : i32, i32
  }
}

module attributes {stable_mosaic.version = 11 : i64} {
  func.func @_gather_splice_mult_kernel(%arg0: i32, %arg1: memref<16xi32, #tpu.memory_space<smem>>, %arg2: memref<16xi32, #tpu.memory_space<smem>>, %arg3: memref<16xf32, #tpu.memory_space<smem>>, %arg4: memref<64x128xf32, #tpu.memory_space<any>>, %arg5: memref<8x128xf32, #tpu.memory_space<any>>, %arg6: memref<8x128xf32, #tpu.memory_space<vmem>>, %arg7: memref<2x128xf32, #tpu.memory_space<vmem>>, %arg8: memref<2x8x128xf32, #tpu.memory_space<vmem>>, %arg9: memref<2x8x!tpu.dma_semaphore, #tpu.memory_space<semaphore_mem>>) attributes {dimension_semantics = [#tpu.dimension_semantics<arbitrary>], iteration_bounds = array<i64: 2>, scalar_prefetch = 0 : i64, scratch_operands = 2 : i64, tpu.core_type = #tpu.core_type<tc>, window_params = [{transform_indices = @transform_0, window_bounds = array<i64: 16>}, {transform_indices = @transform_1, window_bounds = array<i64: 16>}, {transform_indices = @transform_2, window_bounds = array<i64: 16>}, {}, {}, {transform_indices = @transform_5, window_bounds = array<i64: 8, 128>}, {pipeline_mode = #tpu.pipeline_mode<synchronous>, transform_indices = @transform_6, window_bounds = array<i64: 2, 128>}]} {
    %c0_i32 = arith.constant 0 : i32
    %0 = arith.cmpi eq, %arg0, %c0_i32 : i32
    %1 = arith.extui %0 : i1 to i32
    %c0_i32_0 = arith.constant 0 : i32
    %2 = arith.cmpi ne, %1, %c0_i32_0 : i32
    scf.if %2 {
      %c0_73 = arith.constant 0 : index
      %152 = memref.load %arg1[%c0_73] : memref<16xi32, #tpu.memory_space<smem>>
      %c0_74 = arith.constant 0 : index
      %153 = memref.load %arg2[%c0_74] : memref<16xi32, #tpu.memory_space<smem>>
      %c0_i32_75 = arith.constant 0 : i32
      %154 = arith.cmpi slt, %153, %c0_i32_75 : i32
      %155 = arith.extui %154 : i1 to i32
      %c0_i32_76 = arith.constant 0 : i32
      %156 = arith.cmpi ne, %155, %c0_i32_76 : i32
      scf.if %156 {
        %c0_i32_118 = arith.constant 0 : i32
        %c0_i32_119 = arith.constant 0 : i32
        %c0_i32_120 = arith.constant 0 : i32
        %c0_i32_121 = arith.constant 0 : i32
        %c0_i32_122 = arith.constant 0 : i32
        %218 = tpu.memref_slice %arg4[%152, %c0_i32_122] : memref<64x128xf32, #tpu.memory_space<any>> -> memref<1x128xf32, #tpu.memory_space<any>>
        %219 = tpu.memref_squeeze %218 : memref<1x128xf32, #tpu.memory_space<any>> -> memref<128xf32, #tpu.memory_space<any>>
        %c0_i32_123 = arith.constant 0 : i32
        %220 = tpu.memref_slice %arg8[%c0_i32_118, %c0_i32_119, %c0_i32_123] : memref<2x8x128xf32, #tpu.memory_space<vmem>> -> memref<1x1x128xf32, #tpu.memory_space<vmem>>
        %221 = tpu.memref_squeeze %220 : memref<1x1x128xf32, #tpu.memory_space<vmem>> -> memref<128xf32, #tpu.memory_space<vmem>>
        %222 = tpu.memref_slice %arg9[%c0_i32_120, %c0_i32_121] : memref<2x8x!tpu.dma_semaphore, #tpu.memory_space<semaphore_mem>> -> memref<1x1x!tpu.dma_semaphore, #tpu.memory_space<semaphore_mem>>
        %223 = tpu.memref_squeeze %222 : memref<1x1x!tpu.dma_semaphore, #tpu.memory_space<semaphore_mem>> -> memref<!tpu.dma_semaphore, #tpu.memory_space<semaphore_mem>>
        tpu.enqueue_dma source(%219 : memref<128xf32, #tpu.memory_space<any>>) target(%221 : memref<128xf32, #tpu.memory_space<vmem>>) target_semaphore(%223 : memref<!tpu.dma_semaphore, #tpu.memory_space<semaphore_mem>>)
      } else {
      }
      %c0_i32_77 = arith.constant 0 : i32
      %157 = arith.cmpi sge, %153, %c0_i32_77 : i32
      %158 = arith.extui %157 : i1 to i32
      %c0_i32_78 = arith.constant 0 : i32
      %159 = arith.cmpi ne, %158, %c0_i32_78 : i32
      scf.if %159 {
        %c0_i32_118 = arith.constant 0 : i32
        %c0_i32_119 = arith.constant 0 : i32
        %c0_i32_120 = arith.constant 0 : i32
        %c0_i32_121 = arith.constant 0 : i32
        %c0_i32_122 = arith.constant 0 : i32
        %218 = tpu.memref_slice %arg5[%153, %c0_i32_122] : memref<8x128xf32, #tpu.memory_space<any>> -> memref<1x128xf32, #tpu.memory_space<any>>
        %219 = tpu.memref_squeeze %218 : memref<1x128xf32, #tpu.memory_space<any>> -> memref<128xf32, #tpu.memory_space<any>>
        %c0_i32_123 = arith.constant 0 : i32
        %220 = tpu.memref_slice %arg8[%c0_i32_118, %c0_i32_119, %c0_i32_123] : memref<2x8x128xf32, #tpu.memory_space<vmem>> -> memref<1x1x128xf32, #tpu.memory_space<vmem>>
        %221 = tpu.memref_squeeze %220 : memref<1x1x128xf32, #tpu.memory_space<vmem>> -> memref<128xf32, #tpu.memory_space<vmem>>
        %222 = tpu.memref_slice %arg9[%c0_i32_120, %c0_i32_121] : memref<2x8x!tpu.dma_semaphore, #tpu.memory_space<semaphore_mem>> -> memref<1x1x!tpu.dma_semaphore, #tpu.memory_space<semaphore_mem>>
        %223 = tpu.memref_squeeze %222 : memref<1x1x!tpu.dma_semaphore, #tpu.memory_space<semaphore_mem>> -> memref<!tpu.dma_semaphore, #tpu.memory_space<semaphore_mem>>
        tpu.enqueue_dma source(%219 : memref<128xf32, #tpu.memory_space<any>>) target(%221 : memref<128xf32, #tpu.memory_space<vmem>>) target_semaphore(%223 : memref<!tpu.dma_semaphore, #tpu.memory_space<semaphore_mem>>)
      } else {
      }
      %c1_79 = arith.constant 1 : index
      %160 = memref.load %arg1[%c1_79] : memref<16xi32, #tpu.memory_space<smem>>
      %c1_80 = arith.constant 1 : index
      %161 = memref.load %arg2[%c1_80] : memref<16xi32, #tpu.memory_space<smem>>
      %c0_i32_81 = arith.constant 0 : i32
      %162 = arith.cmpi slt, %161, %c0_i32_81 : i32
      %163 = arith.extui %162 : i1 to i32
      %c0_i32_82 = arith.constant 0 : i32
      %164 = arith.cmpi ne, %163, %c0_i32_82 : i32
      scf.if %164 {
        %c0_i32_118 = arith.constant 0 : i32
        %c1_i32_119 = arith.constant 1 : i32
        %c0_i32_120 = arith.constant 0 : i32
        %c1_i32_121 = arith.constant 1 : i32
        %c0_i32_122 = arith.constant 0 : i32
        %218 = tpu.memref_slice %arg4[%160, %c0_i32_122] : memref<64x128xf32, #tpu.memory_space<any>> -> memref<1x128xf32, #tpu.memory_space<any>>
        %219 = tpu.memref_squeeze %218 : memref<1x128xf32, #tpu.memory_space<any>> -> memref<128xf32, #tpu.memory_space<any>>
        %c0_i32_123 = arith.constant 0 : i32
        %220 = tpu.memref_slice %arg8[%c0_i32_118, %c1_i32_119, %c0_i32_123] : memref<2x8x128xf32, #tpu.memory_space<vmem>> -> memref<1x1x128xf32, #tpu.memory_space<vmem>>
        %221 = tpu.memref_squeeze %220 : memref<1x1x128xf32, #tpu.memory_space<vmem>> -> memref<128xf32, #tpu.memory_space<vmem>>
        %222 = tpu.memref_slice %arg9[%c0_i32_120, %c1_i32_121] : memref<2x8x!tpu.dma_semaphore, #tpu.memory_space<semaphore_mem>> -> memref<1x1x!tpu.dma_semaphore, #tpu.memory_space<semaphore_mem>>
        %223 = tpu.memref_squeeze %222 : memref<1x1x!tpu.dma_semaphore, #tpu.memory_space<semaphore_mem>> -> memref<!tpu.dma_semaphore, #tpu.memory_space<semaphore_mem>>
        tpu.enqueue_dma source(%219 : memref<128xf32, #tpu.memory_space<any>>) target(%221 : memref<128xf32, #tpu.memory_space<vmem>>) target_semaphore(%223 : memref<!tpu.dma_semaphore, #tpu.memory_space<semaphore_mem>>)
      } else {
      }
      %c0_i32_83 = arith.constant 0 : i32
      %165 = arith.cmpi sge, %161, %c0_i32_83 : i32
      %166 = arith.extui %165 : i1 to i32
      %c0_i32_84 = arith.constant 0 : i32
      %167 = arith.cmpi ne, %166, %c0_i32_84 : i32
      scf.if %167 {
        %c0_i32_118 = arith.constant 0 : i32
        %c1_i32_119 = arith.constant 1 : i32
        %c0_i32_120 = arith.constant 0 : i32
        %c1_i32_121 = arith.constant 1 : i32
        %c0_i32_122 = arith.constant 0 : i32
        %218 = tpu.memref_slice %arg5[%161, %c0_i32_122] : memref<8x128xf32, #tpu.memory_space<any>> -> memref<1x128xf32, #tpu.memory_space<any>>
        %219 = tpu.memref_squeeze %218 : memref<1x128xf32, #tpu.memory_space<any>> -> memref<128xf32, #tpu.memory_space<any>>
        %c0_i32_123 = arith.constant 0 : i32
        %220 = tpu.memref_slice %arg8[%c0_i32_118, %c1_i32_119, %c0_i32_123] : memref<2x8x128xf32, #tpu.memory_space<vmem>> -> memref<1x1x128xf32, #tpu.memory_space<vmem>>
        %221 = tpu.memref_squeeze %220 : memref<1x1x128xf32, #tpu.memory_space<vmem>> -> memref<128xf32, #tpu.memory_space<vmem>>
        %222 = tpu.memref_slice %arg9[%c0_i32_120, %c1_i32_121] : memref<2x8x!tpu.dma_semaphore, #tpu.memory_space<semaphore_mem>> -> memref<1x1x!tpu.dma_semaphore, #tpu.memory_space<semaphore_mem>>
        %223 = tpu.memref_squeeze %222 : memref<1x1x!tpu.dma_semaphore, #tpu.memory_space<semaphore_mem>> -> memref<!tpu.dma_semaphore, #tpu.memory_space<semaphore_mem>>
        tpu.enqueue_dma source(%219 : memref<128xf32, #tpu.memory_space<any>>) target(%221 : memref<128xf32, #tpu.memory_space<vmem>>) target_semaphore(%223 : memref<!tpu.dma_semaphore, #tpu.memory_space<semaphore_mem>>)
      } else {
      }
      %c2 = arith.constant 2 : index
      %168 = memref.load %arg1[%c2] : memref<16xi32, #tpu.memory_space<smem>>
      %c2_85 = arith.constant 2 : index
      %169 = memref.load %arg2[%c2_85] : memref<16xi32, #tpu.memory_space<smem>>
      %c0_i32_86 = arith.constant 0 : i32
      %170 = arith.cmpi slt, %169, %c0_i32_86 : i32
      %171 = arith.extui %170 : i1 to i32
      %c0_i32_87 = arith.constant 0 : i32
      %172 = arith.cmpi ne, %171, %c0_i32_87 : i32
      scf.if %172 {
        %c0_i32_118 = arith.constant 0 : i32
        %c2_i32_119 = arith.constant 2 : i32
        %c0_i32_120 = arith.constant 0 : i32
        %c2_i32_121 = arith.constant 2 : i32
        %c0_i32_122 = arith.constant 0 : i32
        %218 = tpu.memref_slice %arg4[%168, %c0_i32_122] : memref<64x128xf32, #tpu.memory_space<any>> -> memref<1x128xf32, #tpu.memory_space<any>>
        %219 = tpu.memref_squeeze %218 : memref<1x128xf32, #tpu.memory_space<any>> -> memref<128xf32, #tpu.memory_space<any>>
        %c0_i32_123 = arith.constant 0 : i32
        %220 = tpu.memref_slice %arg8[%c0_i32_118, %c2_i32_119, %c0_i32_123] : memref<2x8x128xf32, #tpu.memory_space<vmem>> -> memref<1x1x128xf32, #tpu.memory_space<vmem>>
        %221 = tpu.memref_squeeze %220 : memref<1x1x128xf32, #tpu.memory_space<vmem>> -> memref<128xf32, #tpu.memory_space<vmem>>
        %222 = tpu.memref_slice %arg9[%c0_i32_120, %c2_i32_121] : memref<2x8x!tpu.dma_semaphore, #tpu.memory_space<semaphore_mem>> -> memref<1x1x!tpu.dma_semaphore, #tpu.memory_space<semaphore_mem>>
        %223 = tpu.memref_squeeze %222 : memref<1x1x!tpu.dma_semaphore, #tpu.memory_space<semaphore_mem>> -> memref<!tpu.dma_semaphore, #tpu.memory_space<semaphore_mem>>
        tpu.enqueue_dma source(%219 : memref<128xf32, #tpu.memory_space<any>>) target(%221 : memref<128xf32, #tpu.memory_space<vmem>>) target_semaphore(%223 : memref<!tpu.dma_semaphore, #tpu.memory_space<semaphore_mem>>)
      } else {
      }
      %c0_i32_88 = arith.constant 0 : i32
      %173 = arith.cmpi sge, %169, %c0_i32_88 : i32
      %174 = arith.extui %173 : i1 to i32
      %c0_i32_89 = arith.constant 0 : i32
      %175 = arith.cmpi ne, %174, %c0_i32_89 : i32
      scf.if %175 {
        %c0_i32_118 = arith.constant 0 : i32
        %c2_i32_119 = arith.constant 2 : i32
        %c0_i32_120 = arith.constant 0 : i32
        %c2_i32_121 = arith.constant 2 : i32
        %c0_i32_122 = arith.constant 0 : i32
        %218 = tpu.memref_slice %arg5[%169, %c0_i32_122] : memref<8x128xf32, #tpu.memory_space<any>> -> memref<1x128xf32, #tpu.memory_space<any>>
        %219 = tpu.memref_squeeze %218 : memref<1x128xf32, #tpu.memory_space<any>> -> memref<128xf32, #tpu.memory_space<any>>
        %c0_i32_123 = arith.constant 0 : i32
        %220 = tpu.memref_slice %arg8[%c0_i32_118, %c2_i32_119, %c0_i32_123] : memref<2x8x128xf32, #tpu.memory_space<vmem>> -> memref<1x1x128xf32, #tpu.memory_space<vmem>>
        %221 = tpu.memref_squeeze %220 : memref<1x1x128xf32, #tpu.memory_space<vmem>> -> memref<128xf32, #tpu.memory_space<vmem>>
        %222 = tpu.memref_slice %arg9[%c0_i32_120, %c2_i32_121] : memref<2x8x!tpu.dma_semaphore, #tpu.memory_space<semaphore_mem>> -> memref<1x1x!tpu.dma_semaphore, #tpu.memory_space<semaphore_mem>>
        %223 = tpu.memref_squeeze %222 : memref<1x1x!tpu.dma_semaphore, #tpu.memory_space<semaphore_mem>> -> memref<!tpu.dma_semaphore, #tpu.memory_space<semaphore_mem>>
        tpu.enqueue_dma source(%219 : memref<128xf32, #tpu.memory_space<any>>) target(%221 : memref<128xf32, #tpu.memory_space<vmem>>) target_semaphore(%223 : memref<!tpu.dma_semaphore, #tpu.memory_space<semaphore_mem>>)
      } else {
      }
      %c3 = arith.constant 3 : index
      %176 = memref.load %arg1[%c3] : memref<16xi32, #tpu.memory_space<smem>>
      %c3_90 = arith.constant 3 : index
      %177 = memref.load %arg2[%c3_90] : memref<16xi32, #tpu.memory_space<smem>>
      %c0_i32_91 = arith.constant 0 : i32
      %178 = arith.cmpi slt, %177, %c0_i32_91 : i32
      %179 = arith.extui %178 : i1 to i32
      %c0_i32_92 = arith.constant 0 : i32
      %180 = arith.cmpi ne, %179, %c0_i32_92 : i32
      scf.if %180 {
        %c0_i32_118 = arith.constant 0 : i32
        %c3_i32_119 = arith.constant 3 : i32
        %c0_i32_120 = arith.constant 0 : i32
        %c3_i32_121 = arith.constant 3 : i32
        %c0_i32_122 = arith.constant 0 : i32
        %218 = tpu.memref_slice %arg4[%176, %c0_i32_122] : memref<64x128xf32, #tpu.memory_space<any>> -> memref<1x128xf32, #tpu.memory_space<any>>
        %219 = tpu.memref_squeeze %218 : memref<1x128xf32, #tpu.memory_space<any>> -> memref<128xf32, #tpu.memory_space<any>>
        %c0_i32_123 = arith.constant 0 : i32
        %220 = tpu.memref_slice %arg8[%c0_i32_118, %c3_i32_119, %c0_i32_123] : memref<2x8x128xf32, #tpu.memory_space<vmem>> -> memref<1x1x128xf32, #tpu.memory_space<vmem>>
        %221 = tpu.memref_squeeze %220 : memref<1x1x128xf32, #tpu.memory_space<vmem>> -> memref<128xf32, #tpu.memory_space<vmem>>
        %222 = tpu.memref_slice %arg9[%c0_i32_120, %c3_i32_121] : memref<2x8x!tpu.dma_semaphore, #tpu.memory_space<semaphore_mem>> -> memref<1x1x!tpu.dma_semaphore, #tpu.memory_space<semaphore_mem>>
        %223 = tpu.memref_squeeze %222 : memref<1x1x!tpu.dma_semaphore, #tpu.memory_space<semaphore_mem>> -> memref<!tpu.dma_semaphore, #tpu.memory_space<semaphore_mem>>
        tpu.enqueue_dma source(%219 : memref<128xf32, #tpu.memory_space<any>>) target(%221 : memref<128xf32, #tpu.memory_space<vmem>>) target_semaphore(%223 : memref<!tpu.dma_semaphore, #tpu.memory_space<semaphore_mem>>)
      } else {
      }
      %c0_i32_93 = arith.constant 0 : i32
      %181 = arith.cmpi sge, %177, %c0_i32_93 : i32
      %182 = arith.extui %181 : i1 to i32
      %c0_i32_94 = arith.constant 0 : i32
      %183 = arith.cmpi ne, %182, %c0_i32_94 : i32
      scf.if %183 {
        %c0_i32_118 = arith.constant 0 : i32
        %c3_i32_119 = arith.constant 3 : i32
        %c0_i32_120 = arith.constant 0 : i32
        %c3_i32_121 = arith.constant 3 : i32
        %c0_i32_122 = arith.constant 0 : i32
        %218 = tpu.memref_slice %arg5[%177, %c0_i32_122] : memref<8x128xf32, #tpu.memory_space<any>> -> memref<1x128xf32, #tpu.memory_space<any>>
        %219 = tpu.memref_squeeze %218 : memref<1x128xf32, #tpu.memory_space<any>> -> memref<128xf32, #tpu.memory_space<any>>
        %c0_i32_123 = arith.constant 0 : i32
        %220 = tpu.memref_slice %arg8[%c0_i32_118, %c3_i32_119, %c0_i32_123] : memref<2x8x128xf32, #tpu.memory_space<vmem>> -> memref<1x1x128xf32, #tpu.memory_space<vmem>>
        %221 = tpu.memref_squeeze %220 : memref<1x1x128xf32, #tpu.memory_space<vmem>> -> memref<128xf32, #tpu.memory_space<vmem>>
        %222 = tpu.memref_slice %arg9[%c0_i32_120, %c3_i32_121] : memref<2x8x!tpu.dma_semaphore, #tpu.memory_space<semaphore_mem>> -> memref<1x1x!tpu.dma_semaphore, #tpu.memory_space<semaphore_mem>>
        %223 = tpu.memref_squeeze %222 : memref<1x1x!tpu.dma_semaphore, #tpu.memory_space<semaphore_mem>> -> memref<!tpu.dma_semaphore, #tpu.memory_space<semaphore_mem>>
        tpu.enqueue_dma source(%219 : memref<128xf32, #tpu.memory_space<any>>) target(%221 : memref<128xf32, #tpu.memory_space<vmem>>) target_semaphore(%223 : memref<!tpu.dma_semaphore, #tpu.memory_space<semaphore_mem>>)
      } else {
      }
      %c4 = arith.constant 4 : index
      %184 = memref.load %arg1[%c4] : memref<16xi32, #tpu.memory_space<smem>>
      %c4_95 = arith.constant 4 : index
      %185 = memref.load %arg2[%c4_95] : memref<16xi32, #tpu.memory_space<smem>>
      %c0_i32_96 = arith.constant 0 : i32
      %186 = arith.cmpi slt, %185, %c0_i32_96 : i32
      %187 = arith.extui %186 : i1 to i32
      %c0_i32_97 = arith.constant 0 : i32
      %188 = arith.cmpi ne, %187, %c0_i32_97 : i32
      scf.if %188 {
        %c0_i32_118 = arith.constant 0 : i32
        %c4_i32_119 = arith.constant 4 : i32
        %c0_i32_120 = arith.constant 0 : i32
        %c4_i32_121 = arith.constant 4 : i32
        %c0_i32_122 = arith.constant 0 : i32
        %218 = tpu.memref_slice %arg4[%184, %c0_i32_122] : memref<64x128xf32, #tpu.memory_space<any>> -> memref<1x128xf32, #tpu.memory_space<any>>
        %219 = tpu.memref_squeeze %218 : memref<1x128xf32, #tpu.memory_space<any>> -> memref<128xf32, #tpu.memory_space<any>>
        %c0_i32_123 = arith.constant 0 : i32
        %220 = tpu.memref_slice %arg8[%c0_i32_118, %c4_i32_119, %c0_i32_123] : memref<2x8x128xf32, #tpu.memory_space<vmem>> -> memref<1x1x128xf32, #tpu.memory_space<vmem>>
        %221 = tpu.memref_squeeze %220 : memref<1x1x128xf32, #tpu.memory_space<vmem>> -> memref<128xf32, #tpu.memory_space<vmem>>
        %222 = tpu.memref_slice %arg9[%c0_i32_120, %c4_i32_121] : memref<2x8x!tpu.dma_semaphore, #tpu.memory_space<semaphore_mem>> -> memref<1x1x!tpu.dma_semaphore, #tpu.memory_space<semaphore_mem>>
        %223 = tpu.memref_squeeze %222 : memref<1x1x!tpu.dma_semaphore, #tpu.memory_space<semaphore_mem>> -> memref<!tpu.dma_semaphore, #tpu.memory_space<semaphore_mem>>
        tpu.enqueue_dma source(%219 : memref<128xf32, #tpu.memory_space<any>>) target(%221 : memref<128xf32, #tpu.memory_space<vmem>>) target_semaphore(%223 : memref<!tpu.dma_semaphore, #tpu.memory_space<semaphore_mem>>)
      } else {
      }
      %c0_i32_98 = arith.constant 0 : i32
      %189 = arith.cmpi sge, %185, %c0_i32_98 : i32
      %190 = arith.extui %189 : i1 to i32
      %c0_i32_99 = arith.constant 0 : i32
      %191 = arith.cmpi ne, %190, %c0_i32_99 : i32
      scf.if %191 {
        %c0_i32_118 = arith.constant 0 : i32
        %c4_i32_119 = arith.constant 4 : i32
        %c0_i32_120 = arith.constant 0 : i32
        %c4_i32_121 = arith.constant 4 : i32
        %c0_i32_122 = arith.constant 0 : i32
        %218 = tpu.memref_slice %arg5[%185, %c0_i32_122] : memref<8x128xf32, #tpu.memory_space<any>> -> memref<1x128xf32, #tpu.memory_space<any>>
        %219 = tpu.memref_squeeze %218 : memref<1x128xf32, #tpu.memory_space<any>> -> memref<128xf32, #tpu.memory_space<any>>
        %c0_i32_123 = arith.constant 0 : i32
        %220 = tpu.memref_slice %arg8[%c0_i32_118, %c4_i32_119, %c0_i32_123] : memref<2x8x128xf32, #tpu.memory_space<vmem>> -> memref<1x1x128xf32, #tpu.memory_space<vmem>>
        %221 = tpu.memref_squeeze %220 : memref<1x1x128xf32, #tpu.memory_space<vmem>> -> memref<128xf32, #tpu.memory_space<vmem>>
        %222 = tpu.memref_slice %arg9[%c0_i32_120, %c4_i32_121] : memref<2x8x!tpu.dma_semaphore, #tpu.memory_space<semaphore_mem>> -> memref<1x1x!tpu.dma_semaphore, #tpu.memory_space<semaphore_mem>>
        %223 = tpu.memref_squeeze %222 : memref<1x1x!tpu.dma_semaphore, #tpu.memory_space<semaphore_mem>> -> memref<!tpu.dma_semaphore, #tpu.memory_space<semaphore_mem>>
        tpu.enqueue_dma source(%219 : memref<128xf32, #tpu.memory_space<any>>) target(%221 : memref<128xf32, #tpu.memory_space<vmem>>) target_semaphore(%223 : memref<!tpu.dma_semaphore, #tpu.memory_space<semaphore_mem>>)
      } else {
      }
      %c5 = arith.constant 5 : index
      %192 = memref.load %arg1[%c5] : memref<16xi32, #tpu.memory_space<smem>>
      %c5_100 = arith.constant 5 : index
      %193 = memref.load %arg2[%c5_100] : memref<16xi32, #tpu.memory_space<smem>>
      %c0_i32_101 = arith.constant 0 : i32
      %194 = arith.cmpi slt, %193, %c0_i32_101 : i32
      %195 = arith.extui %194 : i1 to i32
      %c0_i32_102 = arith.constant 0 : i32
      %196 = arith.cmpi ne, %195, %c0_i32_102 : i32
      scf.if %196 {
        %c0_i32_118 = arith.constant 0 : i32
        %c5_i32_119 = arith.constant 5 : i32
        %c0_i32_120 = arith.constant 0 : i32
        %c5_i32_121 = arith.constant 5 : i32
        %c0_i32_122 = arith.constant 0 : i32
        %218 = tpu.memref_slice %arg4[%192, %c0_i32_122] : memref<64x128xf32, #tpu.memory_space<any>> -> memref<1x128xf32, #tpu.memory_space<any>>
        %219 = tpu.memref_squeeze %218 : memref<1x128xf32, #tpu.memory_space<any>> -> memref<128xf32, #tpu.memory_space<any>>
        %c0_i32_123 = arith.constant 0 : i32
        %220 = tpu.memref_slice %arg8[%c0_i32_118, %c5_i32_119, %c0_i32_123] : memref<2x8x128xf32, #tpu.memory_space<vmem>> -> memref<1x1x128xf32, #tpu.memory_space<vmem>>
        %221 = tpu.memref_squeeze %220 : memref<1x1x128xf32, #tpu.memory_space<vmem>> -> memref<128xf32, #tpu.memory_space<vmem>>
        %222 = tpu.memref_slice %arg9[%c0_i32_120, %c5_i32_121] : memref<2x8x!tpu.dma_semaphore, #tpu.memory_space<semaphore_mem>> -> memref<1x1x!tpu.dma_semaphore, #tpu.memory_space<semaphore_mem>>
        %223 = tpu.memref_squeeze %222 : memref<1x1x!tpu.dma_semaphore, #tpu.memory_space<semaphore_mem>> -> memref<!tpu.dma_semaphore, #tpu.memory_space<semaphore_mem>>
        tpu.enqueue_dma source(%219 : memref<128xf32, #tpu.memory_space<any>>) target(%221 : memref<128xf32, #tpu.memory_space<vmem>>) target_semaphore(%223 : memref<!tpu.dma_semaphore, #tpu.memory_space<semaphore_mem>>)
      } else {
      }
      %c0_i32_103 = arith.constant 0 : i32
      %197 = arith.cmpi sge, %193, %c0_i32_103 : i32
      %198 = arith.extui %197 : i1 to i32
      %c0_i32_104 = arith.constant 0 : i32
      %199 = arith.cmpi ne, %198, %c0_i32_104 : i32
      scf.if %199 {
        %c0_i32_118 = arith.constant 0 : i32
        %c5_i32_119 = arith.constant 5 : i32
        %c0_i32_120 = arith.constant 0 : i32
        %c5_i32_121 = arith.constant 5 : i32
        %c0_i32_122 = arith.constant 0 : i32
        %218 = tpu.memref_slice %arg5[%193, %c0_i32_122] : memref<8x128xf32, #tpu.memory_space<any>> -> memref<1x128xf32, #tpu.memory_space<any>>
        %219 = tpu.memref_squeeze %218 : memref<1x128xf32, #tpu.memory_space<any>> -> memref<128xf32, #tpu.memory_space<any>>
        %c0_i32_123 = arith.constant 0 : i32
        %220 = tpu.memref_slice %arg8[%c0_i32_118, %c5_i32_119, %c0_i32_123] : memref<2x8x128xf32, #tpu.memory_space<vmem>> -> memref<1x1x128xf32, #tpu.memory_space<vmem>>
        %221 = tpu.memref_squeeze %220 : memref<1x1x128xf32, #tpu.memory_space<vmem>> -> memref<128xf32, #tpu.memory_space<vmem>>
        %222 = tpu.memref_slice %arg9[%c0_i32_120, %c5_i32_121] : memref<2x8x!tpu.dma_semaphore, #tpu.memory_space<semaphore_mem>> -> memref<1x1x!tpu.dma_semaphore, #tpu.memory_space<semaphore_mem>>
        %223 = tpu.memref_squeeze %222 : memref<1x1x!tpu.dma_semaphore, #tpu.memory_space<semaphore_mem>> -> memref<!tpu.dma_semaphore, #tpu.memory_space<semaphore_mem>>
        tpu.enqueue_dma source(%219 : memref<128xf32, #tpu.memory_space<any>>) target(%221 : memref<128xf32, #tpu.memory_space<vmem>>) target_semaphore(%223 : memref<!tpu.dma_semaphore, #tpu.memory_space<semaphore_mem>>)
      } else {
      }
      %c6 = arith.constant 6 : index
      %200 = memref.load %arg1[%c6] : memref<16xi32, #tpu.memory_space<smem>>
      %c6_105 = arith.constant 6 : index
      %201 = memref.load %arg2[%c6_105] : memref<16xi32, #tpu.memory_space<smem>>
      %c0_i32_106 = arith.constant 0 : i32
      %202 = arith.cmpi slt, %201, %c0_i32_106 : i32
      %203 = arith.extui %202 : i1 to i32
      %c0_i32_107 = arith.constant 0 : i32
      %204 = arith.cmpi ne, %203, %c0_i32_107 : i32
      scf.if %204 {
        %c0_i32_118 = arith.constant 0 : i32
        %c6_i32_119 = arith.constant 6 : i32
        %c0_i32_120 = arith.constant 0 : i32
        %c6_i32_121 = arith.constant 6 : i32
        %c0_i32_122 = arith.constant 0 : i32
        %218 = tpu.memref_slice %arg4[%200, %c0_i32_122] : memref<64x128xf32, #tpu.memory_space<any>> -> memref<1x128xf32, #tpu.memory_space<any>>
        %219 = tpu.memref_squeeze %218 : memref<1x128xf32, #tpu.memory_space<any>> -> memref<128xf32, #tpu.memory_space<any>>
        %c0_i32_123 = arith.constant 0 : i32
        %220 = tpu.memref_slice %arg8[%c0_i32_118, %c6_i32_119, %c0_i32_123] : memref<2x8x128xf32, #tpu.memory_space<vmem>> -> memref<1x1x128xf32, #tpu.memory_space<vmem>>
        %221 = tpu.memref_squeeze %220 : memref<1x1x128xf32, #tpu.memory_space<vmem>> -> memref<128xf32, #tpu.memory_space<vmem>>
        %222 = tpu.memref_slice %arg9[%c0_i32_120, %c6_i32_121] : memref<2x8x!tpu.dma_semaphore, #tpu.memory_space<semaphore_mem>> -> memref<1x1x!tpu.dma_semaphore, #tpu.memory_space<semaphore_mem>>
        %223 = tpu.memref_squeeze %222 : memref<1x1x!tpu.dma_semaphore, #tpu.memory_space<semaphore_mem>> -> memref<!tpu.dma_semaphore, #tpu.memory_space<semaphore_mem>>
        tpu.enqueue_dma source(%219 : memref<128xf32, #tpu.memory_space<any>>) target(%221 : memref<128xf32, #tpu.memory_space<vmem>>) target_semaphore(%223 : memref<!tpu.dma_semaphore, #tpu.memory_space<semaphore_mem>>)
      } else {
      }
      %c0_i32_108 = arith.constant 0 : i32
      %205 = arith.cmpi sge, %201, %c0_i32_108 : i32
      %206 = arith.extui %205 : i1 to i32
      %c0_i32_109 = arith.constant 0 : i32
      %207 = arith.cmpi ne, %206, %c0_i32_109 : i32
      scf.if %207 {
        %c0_i32_118 = arith.constant 0 : i32
        %c6_i32_119 = arith.constant 6 : i32
        %c0_i32_120 = arith.constant 0 : i32
        %c6_i32_121 = arith.constant 6 : i32
        %c0_i32_122 = arith.constant 0 : i32
        %218 = tpu.memref_slice %arg5[%201, %c0_i32_122] : memref<8x128xf32, #tpu.memory_space<any>> -> memref<1x128xf32, #tpu.memory_space<any>>
        %219 = tpu.memref_squeeze %218 : memref<1x128xf32, #tpu.memory_space<any>> -> memref<128xf32, #tpu.memory_space<any>>
        %c0_i32_123 = arith.constant 0 : i32
        %220 = tpu.memref_slice %arg8[%c0_i32_118, %c6_i32_119, %c0_i32_123] : memref<2x8x128xf32, #tpu.memory_space<vmem>> -> memref<1x1x128xf32, #tpu.memory_space<vmem>>
        %221 = tpu.memref_squeeze %220 : memref<1x1x128xf32, #tpu.memory_space<vmem>> -> memref<128xf32, #tpu.memory_space<vmem>>
        %222 = tpu.memref_slice %arg9[%c0_i32_120, %c6_i32_121] : memref<2x8x!tpu.dma_semaphore, #tpu.memory_space<semaphore_mem>> -> memref<1x1x!tpu.dma_semaphore, #tpu.memory_space<semaphore_mem>>
        %223 = tpu.memref_squeeze %222 : memref<1x1x!tpu.dma_semaphore, #tpu.memory_space<semaphore_mem>> -> memref<!tpu.dma_semaphore, #tpu.memory_space<semaphore_mem>>
        tpu.enqueue_dma source(%219 : memref<128xf32, #tpu.memory_space<any>>) target(%221 : memref<128xf32, #tpu.memory_space<vmem>>) target_semaphore(%223 : memref<!tpu.dma_semaphore, #tpu.memory_space<semaphore_mem>>)
      } else {
      }
      %c7 = arith.constant 7 : index
      %208 = memref.load %arg1[%c7] : memref<16xi32, #tpu.memory_space<smem>>
      %c7_110 = arith.constant 7 : index
      %209 = memref.load %arg2[%c7_110] : memref<16xi32, #tpu.memory_space<smem>>
      %c0_i32_111 = arith.constant 0 : i32
      %210 = arith.cmpi slt, %209, %c0_i32_111 : i32
      %211 = arith.extui %210 : i1 to i32
      %c0_i32_112 = arith.constant 0 : i32
      %212 = arith.cmpi ne, %211, %c0_i32_112 : i32
      scf.if %212 {
        %c0_i32_118 = arith.constant 0 : i32
        %c7_i32_119 = arith.constant 7 : i32
        %c0_i32_120 = arith.constant 0 : i32
        %c7_i32_121 = arith.constant 7 : i32
        %c0_i32_122 = arith.constant 0 : i32
        %218 = tpu.memref_slice %arg4[%208, %c0_i32_122] : memref<64x128xf32, #tpu.memory_space<any>> -> memref<1x128xf32, #tpu.memory_space<any>>
        %219 = tpu.memref_squeeze %218 : memref<1x128xf32, #tpu.memory_space<any>> -> memref<128xf32, #tpu.memory_space<any>>
        %c0_i32_123 = arith.constant 0 : i32
        %220 = tpu.memref_slice %arg8[%c0_i32_118, %c7_i32_119, %c0_i32_123] : memref<2x8x128xf32, #tpu.memory_space<vmem>> -> memref<1x1x128xf32, #tpu.memory_space<vmem>>
        %221 = tpu.memref_squeeze %220 : memref<1x1x128xf32, #tpu.memory_space<vmem>> -> memref<128xf32, #tpu.memory_space<vmem>>
        %222 = tpu.memref_slice %arg9[%c0_i32_120, %c7_i32_121] : memref<2x8x!tpu.dma_semaphore, #tpu.memory_space<semaphore_mem>> -> memref<1x1x!tpu.dma_semaphore, #tpu.memory_space<semaphore_mem>>
        %223 = tpu.memref_squeeze %222 : memref<1x1x!tpu.dma_semaphore, #tpu.memory_space<semaphore_mem>> -> memref<!tpu.dma_semaphore, #tpu.memory_space<semaphore_mem>>
        tpu.enqueue_dma source(%219 : memref<128xf32, #tpu.memory_space<any>>) target(%221 : memref<128xf32, #tpu.memory_space<vmem>>) target_semaphore(%223 : memref<!tpu.dma_semaphore, #tpu.memory_space<semaphore_mem>>)
      } else {
      }
      %c0_i32_113 = arith.constant 0 : i32
      %213 = arith.cmpi sge, %209, %c0_i32_113 : i32
      %214 = arith.extui %213 : i1 to i32
      %c0_i32_114 = arith.constant 0 : i32
      %215 = arith.cmpi ne, %214, %c0_i32_114 : i32
      scf.if %215 {
        %c0_i32_118 = arith.constant 0 : i32
        %c7_i32_119 = arith.constant 7 : i32
        %c0_i32_120 = arith.constant 0 : i32
        %c7_i32_121 = arith.constant 7 : i32
        %c0_i32_122 = arith.constant 0 : i32
        %218 = tpu.memref_slice %arg5[%209, %c0_i32_122] : memref<8x128xf32, #tpu.memory_space<any>> -> memref<1x128xf32, #tpu.memory_space<any>>
        %219 = tpu.memref_squeeze %218 : memref<1x128xf32, #tpu.memory_space<any>> -> memref<128xf32, #tpu.memory_space<any>>
        %c0_i32_123 = arith.constant 0 : i32
        %220 = tpu.memref_slice %arg8[%c0_i32_118, %c7_i32_119, %c0_i32_123] : memref<2x8x128xf32, #tpu.memory_space<vmem>> -> memref<1x1x128xf32, #tpu.memory_space<vmem>>
        %221 = tpu.memref_squeeze %220 : memref<1x1x128xf32, #tpu.memory_space<vmem>> -> memref<128xf32, #tpu.memory_space<vmem>>
        %222 = tpu.memref_slice %arg9[%c0_i32_120, %c7_i32_121] : memref<2x8x!tpu.dma_semaphore, #tpu.memory_space<semaphore_mem>> -> memref<1x1x!tpu.dma_semaphore, #tpu.memory_space<semaphore_mem>>
        %223 = tpu.memref_squeeze %222 : memref<1x1x!tpu.dma_semaphore, #tpu.memory_space<semaphore_mem>> -> memref<!tpu.dma_semaphore, #tpu.memory_space<semaphore_mem>>
        tpu.enqueue_dma source(%219 : memref<128xf32, #tpu.memory_space<any>>) target(%221 : memref<128xf32, #tpu.memory_space<vmem>>) target_semaphore(%223 : memref<!tpu.dma_semaphore, #tpu.memory_space<semaphore_mem>>)
      } else {
      }
      %cst_115 = arith.constant 0.000000e+00 : f32
      %216 = vector.broadcast %cst_115 : f32 to vector<2x128xf32>
      %c0_116 = arith.constant 0 : index
      %c0_117 = arith.constant 0 : index
      %217 = vector.load %arg7[%c0_116, %c0_117] : memref<2x128xf32, #tpu.memory_space<vmem>>, vector<2x128xf32>
      tpu.vector_store %arg7[%c0_116, %c0_117], %216 {strides = array<i32>} : memref<2x128xf32, #tpu.memory_space<vmem>>, vector<2x128xf32>,
    } else {
    }
    %c2_i32 = arith.constant 2 : i32
    %c0_i32_1 = arith.constant 0 : i32
    %3 = arith.cmpi eq, %c2_i32, %c0_i32_1 : i32
    %c1_i32 = arith.constant 1 : i32
    %4 = arith.select %3, %c1_i32, %c2_i32 : i32
    %5 = arith.remsi %arg0, %4 : i32
    %c0_i32_2 = arith.constant 0 : i32
    %6 = arith.cmpi ne, %5, %c0_i32_2 : i32
    %c0_i32_3 = arith.constant 0 : i32
    %7 = arith.cmpi slt, %5, %c0_i32_3 : i32
    %c0_i32_4 = arith.constant 0 : i32
    %8 = arith.cmpi slt, %4, %c0_i32_4 : i32
    %9 = arith.xori %7, %8 : i1
    %10 = arith.andi %9, %6 : i1
    %11 = arith.addi %5, %4 : i32
    %12 = arith.select %10, %11, %5 : i32
    %c1_i32_5 = arith.constant 1 : i32
    %13 = arith.addi %arg0, %c1_i32_5 : i32
    %c2_i32_6 = arith.constant 2 : i32
    %14 = arith.cmpi slt, %13, %c2_i32_6 : i32
    %15 = arith.extui %14 : i1 to i32
    %c0_i32_7 = arith.constant 0 : i32
    %16 = arith.cmpi ne, %15, %c0_i32_7 : i32
    scf.if %16 {
      %c1_i32_73 = arith.constant 1 : i32
      %152 = arith.addi %arg0, %c1_i32_73 : i32
      %c1_i32_74 = arith.constant 1 : i32
      %153 = arith.subi %c1_i32_74, %12 : i32
      %c8_i32_75 = arith.constant 8 : i32
      %154 = arith.muli %152, %c8_i32_75 : i32
      %c0_i32_76 = arith.constant 0 : i32
      %155 = arith.addi %154, %c0_i32_76 : i32
      %156 = arith.index_cast %155 : i32 to index
      %157 = memref.load %arg1[%156] : memref<16xi32, #tpu.memory_space<smem>>
      %c0_i32_77 = arith.constant 0 : i32
      %158 = arith.addi %154, %c0_i32_77 : i32
      %159 = arith.index_cast %158 : i32 to index
      %160 = memref.load %arg2[%159] : memref<16xi32, #tpu.memory_space<smem>>
      %c0_i32_78 = arith.constant 0 : i32
      %161 = arith.cmpi slt, %160, %c0_i32_78 : i32
      %162 = arith.extui %161 : i1 to i32
      %c0_i32_79 = arith.constant 0 : i32
      %163 = arith.cmpi ne, %162, %c0_i32_79 : i32
      scf.if %163 {
        %c0_i32_124 = arith.constant 0 : i32
        %c0_i32_125 = arith.constant 0 : i32
        %c0_i32_126 = arith.constant 0 : i32
        %251 = tpu.memref_slice %arg4[%157, %c0_i32_126] : memref<64x128xf32, #tpu.memory_space<any>> -> memref<1x128xf32, #tpu.memory_space<any>>
        %252 = tpu.memref_squeeze %251 : memref<1x128xf32, #tpu.memory_space<any>> -> memref<128xf32, #tpu.memory_space<any>>
        %c0_i32_127 = arith.constant 0 : i32
        %253 = tpu.memref_slice %arg8[%153, %c0_i32_124, %c0_i32_127] : memref<2x8x128xf32, #tpu.memory_space<vmem>> -> memref<1x1x128xf32, #tpu.memory_space<vmem>>
        %254 = tpu.memref_squeeze %253 : memref<1x1x128xf32, #tpu.memory_space<vmem>> -> memref<128xf32, #tpu.memory_space<vmem>>
        %255 = tpu.memref_slice %arg9[%153, %c0_i32_125] : memref<2x8x!tpu.dma_semaphore, #tpu.memory_space<semaphore_mem>> -> memref<1x1x!tpu.dma_semaphore, #tpu.memory_space<semaphore_mem>>
        %256 = tpu.memref_squeeze %255 : memref<1x1x!tpu.dma_semaphore, #tpu.memory_space<semaphore_mem>> -> memref<!tpu.dma_semaphore, #tpu.memory_space<semaphore_mem>>
        tpu.enqueue_dma source(%252 : memref<128xf32, #tpu.memory_space<any>>) target(%254 : memref<128xf32, #tpu.memory_space<vmem>>) target_semaphore(%256 : memref<!tpu.dma_semaphore, #tpu.memory_space<semaphore_mem>>)
      } else {
      }
      %c0_i32_80 = arith.constant 0 : i32
      %164 = arith.cmpi sge, %160, %c0_i32_80 : i32
      %165 = arith.extui %164 : i1 to i32
      %c0_i32_81 = arith.constant 0 : i32
      %166 = arith.cmpi ne, %165, %c0_i32_81 : i32
      scf.if %166 {
        %c0_i32_124 = arith.constant 0 : i32
        %c0_i32_125 = arith.constant 0 : i32
        %c0_i32_126 = arith.constant 0 : i32
        %251 = tpu.memref_slice %arg5[%160, %c0_i32_126] : memref<8x128xf32, #tpu.memory_space<any>> -> memref<1x128xf32, #tpu.memory_space<any>>
        %252 = tpu.memref_squeeze %251 : memref<1x128xf32, #tpu.memory_space<any>> -> memref<128xf32, #tpu.memory_space<any>>
        %c0_i32_127 = arith.constant 0 : i32
        %253 = tpu.memref_slice %arg8[%153, %c0_i32_124, %c0_i32_127] : memref<2x8x128xf32, #tpu.memory_space<vmem>> -> memref<1x1x128xf32, #tpu.memory_space<vmem>>
        %254 = tpu.memref_squeeze %253 : memref<1x1x128xf32, #tpu.memory_space<vmem>> -> memref<128xf32, #tpu.memory_space<vmem>>
        %255 = tpu.memref_slice %arg9[%153, %c0_i32_125] : memref<2x8x!tpu.dma_semaphore, #tpu.memory_space<semaphore_mem>> -> memref<1x1x!tpu.dma_semaphore, #tpu.memory_space<semaphore_mem>>
        %256 = tpu.memref_squeeze %255 : memref<1x1x!tpu.dma_semaphore, #tpu.memory_space<semaphore_mem>> -> memref<!tpu.dma_semaphore, #tpu.memory_space<semaphore_mem>>
        tpu.enqueue_dma source(%252 : memref<128xf32, #tpu.memory_space<any>>) target(%254 : memref<128xf32, #tpu.memory_space<vmem>>) target_semaphore(%256 : memref<!tpu.dma_semaphore, #tpu.memory_space<semaphore_mem>>)
      } else {
      }
      %c1_i32_82 = arith.constant 1 : i32
      %167 = arith.addi %154, %c1_i32_82 : i32
      %168 = arith.index_cast %167 : i32 to index
      %169 = memref.load %arg1[%168] : memref<16xi32, #tpu.memory_space<smem>>
      %c1_i32_83 = arith.constant 1 : i32
      %170 = arith.addi %154, %c1_i32_83 : i32
      %171 = arith.index_cast %170 : i32 to index
      %172 = memref.load %arg2[%171] : memref<16xi32, #tpu.memory_space<smem>>
      %c0_i32_84 = arith.constant 0 : i32
      %173 = arith.cmpi slt, %172, %c0_i32_84 : i32
      %174 = arith.extui %173 : i1 to i32
      %c0_i32_85 = arith.constant 0 : i32
      %175 = arith.cmpi ne, %174, %c0_i32_85 : i32
      scf.if %175 {
        %c1_i32_124 = arith.constant 1 : i32
        %c1_i32_125 = arith.constant 1 : i32
        %c0_i32_126 = arith.constant 0 : i32
        %251 = tpu.memref_slice %arg4[%169, %c0_i32_126] : memref<64x128xf32, #tpu.memory_space<any>> -> memref<1x128xf32, #tpu.memory_space<any>>
        %252 = tpu.memref_squeeze %251 : memref<1x128xf32, #tpu.memory_space<any>> -> memref<128xf32, #tpu.memory_space<any>>
        %c0_i32_127 = arith.constant 0 : i32
        %253 = tpu.memref_slice %arg8[%153, %c1_i32_124, %c0_i32_127] : memref<2x8x128xf32, #tpu.memory_space<vmem>> -> memref<1x1x128xf32, #tpu.memory_space<vmem>>
        %254 = tpu.memref_squeeze %253 : memref<1x1x128xf32, #tpu.memory_space<vmem>> -> memref<128xf32, #tpu.memory_space<vmem>>
        %255 = tpu.memref_slice %arg9[%153, %c1_i32_125] : memref<2x8x!tpu.dma_semaphore, #tpu.memory_space<semaphore_mem>> -> memref<1x1x!tpu.dma_semaphore, #tpu.memory_space<semaphore_mem>>
        %256 = tpu.memref_squeeze %255 : memref<1x1x!tpu.dma_semaphore, #tpu.memory_space<semaphore_mem>> -> memref<!tpu.dma_semaphore, #tpu.memory_space<semaphore_mem>>
        tpu.enqueue_dma source(%252 : memref<128xf32, #tpu.memory_space<any>>) target(%254 : memref<128xf32, #tpu.memory_space<vmem>>) target_semaphore(%256 : memref<!tpu.dma_semaphore, #tpu.memory_space<semaphore_mem>>)
      } else {
      }
      %c0_i32_86 = arith.constant 0 : i32
      %176 = arith.cmpi sge, %172, %c0_i32_86 : i32
      %177 = arith.extui %176 : i1 to i32
      %c0_i32_87 = arith.constant 0 : i32
      %178 = arith.cmpi ne, %177, %c0_i32_87 : i32
      scf.if %178 {
        %c1_i32_124 = arith.constant 1 : i32
        %c1_i32_125 = arith.constant 1 : i32
        %c0_i32_126 = arith.constant 0 : i32
        %251 = tpu.memref_slice %arg5[%172, %c0_i32_126] : memref<8x128xf32, #tpu.memory_space<any>> -> memref<1x128xf32, #tpu.memory_space<any>>
        %252 = tpu.memref_squeeze %251 : memref<1x128xf32, #tpu.memory_space<any>> -> memref<128xf32, #tpu.memory_space<any>>
        %c0_i32_127 = arith.constant 0 : i32
        %253 = tpu.memref_slice %arg8[%153, %c1_i32_124, %c0_i32_127] : memref<2x8x128xf32, #tpu.memory_space<vmem>> -> memref<1x1x128xf32, #tpu.memory_space<vmem>>
        %254 = tpu.memref_squeeze %253 : memref<1x1x128xf32, #tpu.memory_space<vmem>> -> memref<128xf32, #tpu.memory_space<vmem>>
        %255 = tpu.memref_slice %arg9[%153, %c1_i32_125] : memref<2x8x!tpu.dma_semaphore, #tpu.memory_space<semaphore_mem>> -> memref<1x1x!tpu.dma_semaphore, #tpu.memory_space<semaphore_mem>>
        %256 = tpu.memref_squeeze %255 : memref<1x1x!tpu.dma_semaphore, #tpu.memory_space<semaphore_mem>> -> memref<!tpu.dma_semaphore, #tpu.memory_space<semaphore_mem>>
        tpu.enqueue_dma source(%252 : memref<128xf32, #tpu.memory_space<any>>) target(%254 : memref<128xf32, #tpu.memory_space<vmem>>) target_semaphore(%256 : memref<!tpu.dma_semaphore, #tpu.memory_space<semaphore_mem>>)
      } else {
      }
      %c2_i32_88 = arith.constant 2 : i32
      %179 = arith.addi %154, %c2_i32_88 : i32
      %180 = arith.index_cast %179 : i32 to index
      %181 = memref.load %arg1[%180] : memref<16xi32, #tpu.memory_space<smem>>
      %c2_i32_89 = arith.constant 2 : i32
      %182 = arith.addi %154, %c2_i32_89 : i32
      %183 = arith.index_cast %182 : i32 to index
      %184 = memref.load %arg2[%183] : memref<16xi32, #tpu.memory_space<smem>>
      %c0_i32_90 = arith.constant 0 : i32
      %185 = arith.cmpi slt, %184, %c0_i32_90 : i32
      %186 = arith.extui %185 : i1 to i32
      %c0_i32_91 = arith.constant 0 : i32
      %187 = arith.cmpi ne, %186, %c0_i32_91 : i32
      scf.if %187 {
        %c2_i32_124 = arith.constant 2 : i32
        %c2_i32_125 = arith.constant 2 : i32
        %c0_i32_126 = arith.constant 0 : i32
        %251 = tpu.memref_slice %arg4[%181, %c0_i32_126] : memref<64x128xf32, #tpu.memory_space<any>> -> memref<1x128xf32, #tpu.memory_space<any>>
        %252 = tpu.memref_squeeze %251 : memref<1x128xf32, #tpu.memory_space<any>> -> memref<128xf32, #tpu.memory_space<any>>
        %c0_i32_127 = arith.constant 0 : i32
        %253 = tpu.memref_slice %arg8[%153, %c2_i32_124, %c0_i32_127] : memref<2x8x128xf32, #tpu.memory_space<vmem>> -> memref<1x1x128xf32, #tpu.memory_space<vmem>>
        %254 = tpu.memref_squeeze %253 : memref<1x1x128xf32, #tpu.memory_space<vmem>> -> memref<128xf32, #tpu.memory_space<vmem>>
        %255 = tpu.memref_slice %arg9[%153, %c2_i32_125] : memref<2x8x!tpu.dma_semaphore, #tpu.memory_space<semaphore_mem>> -> memref<1x1x!tpu.dma_semaphore, #tpu.memory_space<semaphore_mem>>
        %256 = tpu.memref_squeeze %255 : memref<1x1x!tpu.dma_semaphore, #tpu.memory_space<semaphore_mem>> -> memref<!tpu.dma_semaphore, #tpu.memory_space<semaphore_mem>>
        tpu.enqueue_dma source(%252 : memref<128xf32, #tpu.memory_space<any>>) target(%254 : memref<128xf32, #tpu.memory_space<vmem>>) target_semaphore(%256 : memref<!tpu.dma_semaphore, #tpu.memory_space<semaphore_mem>>)
      } else {
      }
      %c0_i32_92 = arith.constant 0 : i32
      %188 = arith.cmpi sge, %184, %c0_i32_92 : i32
      %189 = arith.extui %188 : i1 to i32
      %c0_i32_93 = arith.constant 0 : i32
      %190 = arith.cmpi ne, %189, %c0_i32_93 : i32
      scf.if %190 {
        %c2_i32_124 = arith.constant 2 : i32
        %c2_i32_125 = arith.constant 2 : i32
        %c0_i32_126 = arith.constant 0 : i32
        %251 = tpu.memref_slice %arg5[%184, %c0_i32_126] : memref<8x128xf32, #tpu.memory_space<any>> -> memref<1x128xf32, #tpu.memory_space<any>>
        %252 = tpu.memref_squeeze %251 : memref<1x128xf32, #tpu.memory_space<any>> -> memref<128xf32, #tpu.memory_space<any>>
        %c0_i32_127 = arith.constant 0 : i32
        %253 = tpu.memref_slice %arg8[%153, %c2_i32_124, %c0_i32_127] : memref<2x8x128xf32, #tpu.memory_space<vmem>> -> memref<1x1x128xf32, #tpu.memory_space<vmem>>
        %254 = tpu.memref_squeeze %253 : memref<1x1x128xf32, #tpu.memory_space<vmem>> -> memref<128xf32, #tpu.memory_space<vmem>>
        %255 = tpu.memref_slice %arg9[%153, %c2_i32_125] : memref<2x8x!tpu.dma_semaphore, #tpu.memory_space<semaphore_mem>> -> memref<1x1x!tpu.dma_semaphore, #tpu.memory_space<semaphore_mem>>
        %256 = tpu.memref_squeeze %255 : memref<1x1x!tpu.dma_semaphore, #tpu.memory_space<semaphore_mem>> -> memref<!tpu.dma_semaphore, #tpu.memory_space<semaphore_mem>>
        tpu.enqueue_dma source(%252 : memref<128xf32, #tpu.memory_space<any>>) target(%254 : memref<128xf32, #tpu.memory_space<vmem>>) target_semaphore(%256 : memref<!tpu.dma_semaphore, #tpu.memory_space<semaphore_mem>>)
      } else {
      }
      %c3_i32_94 = arith.constant 3 : i32
      %191 = arith.addi %154, %c3_i32_94 : i32
      %192 = arith.index_cast %191 : i32 to index
      %193 = memref.load %arg1[%192] : memref<16xi32, #tpu.memory_space<smem>>
      %c3_i32_95 = arith.constant 3 : i32
      %194 = arith.addi %154, %c3_i32_95 : i32
      %195 = arith.index_cast %194 : i32 to index
      %196 = memref.load %arg2[%195] : memref<16xi32, #tpu.memory_space<smem>>
      %c0_i32_96 = arith.constant 0 : i32
      %197 = arith.cmpi slt, %196, %c0_i32_96 : i32
      %198 = arith.extui %197 : i1 to i32
      %c0_i32_97 = arith.constant 0 : i32
      %199 = arith.cmpi ne, %198, %c0_i32_97 : i32
      scf.if %199 {
        %c3_i32_124 = arith.constant 3 : i32
        %c3_i32_125 = arith.constant 3 : i32
        %c0_i32_126 = arith.constant 0 : i32
        %251 = tpu.memref_slice %arg4[%193, %c0_i32_126] : memref<64x128xf32, #tpu.memory_space<any>> -> memref<1x128xf32, #tpu.memory_space<any>>
        %252 = tpu.memref_squeeze %251 : memref<1x128xf32, #tpu.memory_space<any>> -> memref<128xf32, #tpu.memory_space<any>>
        %c0_i32_127 = arith.constant 0 : i32
        %253 = tpu.memref_slice %arg8[%153, %c3_i32_124, %c0_i32_127] : memref<2x8x128xf32, #tpu.memory_space<vmem>> -> memref<1x1x128xf32, #tpu.memory_space<vmem>>
        %254 = tpu.memref_squeeze %253 : memref<1x1x128xf32, #tpu.memory_space<vmem>> -> memref<128xf32, #tpu.memory_space<vmem>>
        %255 = tpu.memref_slice %arg9[%153, %c3_i32_125] : memref<2x8x!tpu.dma_semaphore, #tpu.memory_space<semaphore_mem>> -> memref<1x1x!tpu.dma_semaphore, #tpu.memory_space<semaphore_mem>>
        %256 = tpu.memref_squeeze %255 : memref<1x1x!tpu.dma_semaphore, #tpu.memory_space<semaphore_mem>> -> memref<!tpu.dma_semaphore, #tpu.memory_space<semaphore_mem>>
        tpu.enqueue_dma source(%252 : memref<128xf32, #tpu.memory_space<any>>) target(%254 : memref<128xf32, #tpu.memory_space<vmem>>) target_semaphore(%256 : memref<!tpu.dma_semaphore, #tpu.memory_space<semaphore_mem>>)
      } else {
      }
      %c0_i32_98 = arith.constant 0 : i32
      %200 = arith.cmpi sge, %196, %c0_i32_98 : i32
      %201 = arith.extui %200 : i1 to i32
      %c0_i32_99 = arith.constant 0 : i32
      %202 = arith.cmpi ne, %201, %c0_i32_99 : i32
      scf.if %202 {
        %c3_i32_124 = arith.constant 3 : i32
        %c3_i32_125 = arith.constant 3 : i32
        %c0_i32_126 = arith.constant 0 : i32
        %251 = tpu.memref_slice %arg5[%196, %c0_i32_126] : memref<8x128xf32, #tpu.memory_space<any>> -> memref<1x128xf32, #tpu.memory_space<any>>
        %252 = tpu.memref_squeeze %251 : memref<1x128xf32, #tpu.memory_space<any>> -> memref<128xf32, #tpu.memory_space<any>>
        %c0_i32_127 = arith.constant 0 : i32
        %253 = tpu.memref_slice %arg8[%153, %c3_i32_124, %c0_i32_127] : memref<2x8x128xf32, #tpu.memory_space<vmem>> -> memref<1x1x128xf32, #tpu.memory_space<vmem>>
        %254 = tpu.memref_squeeze %253 : memref<1x1x128xf32, #tpu.memory_space<vmem>> -> memref<128xf32, #tpu.memory_space<vmem>>
        %255 = tpu.memref_slice %arg9[%153, %c3_i32_125] : memref<2x8x!tpu.dma_semaphore, #tpu.memory_space<semaphore_mem>> -> memref<1x1x!tpu.dma_semaphore, #tpu.memory_space<semaphore_mem>>
        %256 = tpu.memref_squeeze %255 : memref<1x1x!tpu.dma_semaphore, #tpu.memory_space<semaphore_mem>> -> memref<!tpu.dma_semaphore, #tpu.memory_space<semaphore_mem>>
        tpu.enqueue_dma source(%252 : memref<128xf32, #tpu.memory_space<any>>) target(%254 : memref<128xf32, #tpu.memory_space<vmem>>) target_semaphore(%256 : memref<!tpu.dma_semaphore, #tpu.memory_space<semaphore_mem>>)
      } else {
      }
      %c4_i32_100 = arith.constant 4 : i32
      %203 = arith.addi %154, %c4_i32_100 : i32
      %204 = arith.index_cast %203 : i32 to index
      %205 = memref.load %arg1[%204] : memref<16xi32, #tpu.memory_space<smem>>
      %c4_i32_101 = arith.constant 4 : i32
      %206 = arith.addi %154, %c4_i32_101 : i32
      %207 = arith.index_cast %206 : i32 to index
      %208 = memref.load %arg2[%207] : memref<16xi32, #tpu.memory_space<smem>>
      %c0_i32_102 = arith.constant 0 : i32
      %209 = arith.cmpi slt, %208, %c0_i32_102 : i32
      %210 = arith.extui %209 : i1 to i32
      %c0_i32_103 = arith.constant 0 : i32
      %211 = arith.cmpi ne, %210, %c0_i32_103 : i32
      scf.if %211 {
        %c4_i32_124 = arith.constant 4 : i32
        %c4_i32_125 = arith.constant 4 : i32
        %c0_i32_126 = arith.constant 0 : i32
        %251 = tpu.memref_slice %arg4[%205, %c0_i32_126] : memref<64x128xf32, #tpu.memory_space<any>> -> memref<1x128xf32, #tpu.memory_space<any>>
        %252 = tpu.memref_squeeze %251 : memref<1x128xf32, #tpu.memory_space<any>> -> memref<128xf32, #tpu.memory_space<any>>
        %c0_i32_127 = arith.constant 0 : i32
        %253 = tpu.memref_slice %arg8[%153, %c4_i32_124, %c0_i32_127] : memref<2x8x128xf32, #tpu.memory_space<vmem>> -> memref<1x1x128xf32, #tpu.memory_space<vmem>>
        %254 = tpu.memref_squeeze %253 : memref<1x1x128xf32, #tpu.memory_space<vmem>> -> memref<128xf32, #tpu.memory_space<vmem>>
        %255 = tpu.memref_slice %arg9[%153, %c4_i32_125] : memref<2x8x!tpu.dma_semaphore, #tpu.memory_space<semaphore_mem>> -> memref<1x1x!tpu.dma_semaphore, #tpu.memory_space<semaphore_mem>>
        %256 = tpu.memref_squeeze %255 : memref<1x1x!tpu.dma_semaphore, #tpu.memory_space<semaphore_mem>> -> memref<!tpu.dma_semaphore, #tpu.memory_space<semaphore_mem>>
        tpu.enqueue_dma source(%252 : memref<128xf32, #tpu.memory_space<any>>) target(%254 : memref<128xf32, #tpu.memory_space<vmem>>) target_semaphore(%256 : memref<!tpu.dma_semaphore, #tpu.memory_space<semaphore_mem>>)
      } else {
      }
      %c0_i32_104 = arith.constant 0 : i32
      %212 = arith.cmpi sge, %208, %c0_i32_104 : i32
      %213 = arith.extui %212 : i1 to i32
      %c0_i32_105 = arith.constant 0 : i32
      %214 = arith.cmpi ne, %213, %c0_i32_105 : i32
      scf.if %214 {
        %c4_i32_124 = arith.constant 4 : i32
        %c4_i32_125 = arith.constant 4 : i32
        %c0_i32_126 = arith.constant 0 : i32
        %251 = tpu.memref_slice %arg5[%208, %c0_i32_126] : memref<8x128xf32, #tpu.memory_space<any>> -> memref<1x128xf32, #tpu.memory_space<any>>
        %252 = tpu.memref_squeeze %251 : memref<1x128xf32, #tpu.memory_space<any>> -> memref<128xf32, #tpu.memory_space<any>>
        %c0_i32_127 = arith.constant 0 : i32
        %253 = tpu.memref_slice %arg8[%153, %c4_i32_124, %c0_i32_127] : memref<2x8x128xf32, #tpu.memory_space<vmem>> -> memref<1x1x128xf32, #tpu.memory_space<vmem>>
        %254 = tpu.memref_squeeze %253 : memref<1x1x128xf32, #tpu.memory_space<vmem>> -> memref<128xf32, #tpu.memory_space<vmem>>
        %255 = tpu.memref_slice %arg9[%153, %c4_i32_125] : memref<2x8x!tpu.dma_semaphore, #tpu.memory_space<semaphore_mem>> -> memref<1x1x!tpu.dma_semaphore, #tpu.memory_space<semaphore_mem>>
        %256 = tpu.memref_squeeze %255 : memref<1x1x!tpu.dma_semaphore, #tpu.memory_space<semaphore_mem>> -> memref<!tpu.dma_semaphore, #tpu.memory_space<semaphore_mem>>
        tpu.enqueue_dma source(%252 : memref<128xf32, #tpu.memory_space<any>>) target(%254 : memref<128xf32, #tpu.memory_space<vmem>>) target_semaphore(%256 : memref<!tpu.dma_semaphore, #tpu.memory_space<semaphore_mem>>)
      } else {
      }
      %c5_i32_106 = arith.constant 5 : i32
      %215 = arith.addi %154, %c5_i32_106 : i32
      %216 = arith.index_cast %215 : i32 to index
      %217 = memref.load %arg1[%216] : memref<16xi32, #tpu.memory_space<smem>>
      %c5_i32_107 = arith.constant 5 : i32
      %218 = arith.addi %154, %c5_i32_107 : i32
      %219 = arith.index_cast %218 : i32 to index
      %220 = memref.load %arg2[%219] : memref<16xi32, #tpu.memory_space<smem>>
      %c0_i32_108 = arith.constant 0 : i32
      %221 = arith.cmpi slt, %220, %c0_i32_108 : i32
      %222 = arith.extui %221 : i1 to i32
      %c0_i32_109 = arith.constant 0 : i32
      %223 = arith.cmpi ne, %222, %c0_i32_109 : i32
      scf.if %223 {
        %c5_i32_124 = arith.constant 5 : i32
        %c5_i32_125 = arith.constant 5 : i32
        %c0_i32_126 = arith.constant 0 : i32
        %251 = tpu.memref_slice %arg4[%217, %c0_i32_126] : memref<64x128xf32, #tpu.memory_space<any>> -> memref<1x128xf32, #tpu.memory_space<any>>
        %252 = tpu.memref_squeeze %251 : memref<1x128xf32, #tpu.memory_space<any>> -> memref<128xf32, #tpu.memory_space<any>>
        %c0_i32_127 = arith.constant 0 : i32
        %253 = tpu.memref_slice %arg8[%153, %c5_i32_124, %c0_i32_127] : memref<2x8x128xf32, #tpu.memory_space<vmem>> -> memref<1x1x128xf32, #tpu.memory_space<vmem>>
        %254 = tpu.memref_squeeze %253 : memref<1x1x128xf32, #tpu.memory_space<vmem>> -> memref<128xf32, #tpu.memory_space<vmem>>
        %255 = tpu.memref_slice %arg9[%153, %c5_i32_125] : memref<2x8x!tpu.dma_semaphore, #tpu.memory_space<semaphore_mem>> -> memref<1x1x!tpu.dma_semaphore, #tpu.memory_space<semaphore_mem>>
        %256 = tpu.memref_squeeze %255 : memref<1x1x!tpu.dma_semaphore, #tpu.memory_space<semaphore_mem>> -> memref<!tpu.dma_semaphore, #tpu.memory_space<semaphore_mem>>
        tpu.enqueue_dma source(%252 : memref<128xf32, #tpu.memory_space<any>>) target(%254 : memref<128xf32, #tpu.memory_space<vmem>>) target_semaphore(%256 : memref<!tpu.dma_semaphore, #tpu.memory_space<semaphore_mem>>)
      } else {
      }
      %c0_i32_110 = arith.constant 0 : i32
      %224 = arith.cmpi sge, %220, %c0_i32_110 : i32
      %225 = arith.extui %224 : i1 to i32
      %c0_i32_111 = arith.constant 0 : i32
      %226 = arith.cmpi ne, %225, %c0_i32_111 : i32
      scf.if %226 {
        %c5_i32_124 = arith.constant 5 : i32
        %c5_i32_125 = arith.constant 5 : i32
        %c0_i32_126 = arith.constant 0 : i32
        %251 = tpu.memref_slice %arg5[%220, %c0_i32_126] : memref<8x128xf32, #tpu.memory_space<any>> -> memref<1x128xf32, #tpu.memory_space<any>>
        %252 = tpu.memref_squeeze %251 : memref<1x128xf32, #tpu.memory_space<any>> -> memref<128xf32, #tpu.memory_space<any>>
        %c0_i32_127 = arith.constant 0 : i32
        %253 = tpu.memref_slice %arg8[%153, %c5_i32_124, %c0_i32_127] : memref<2x8x128xf32, #tpu.memory_space<vmem>> -> memref<1x1x128xf32, #tpu.memory_space<vmem>>
        %254 = tpu.memref_squeeze %253 : memref<1x1x128xf32, #tpu.memory_space<vmem>> -> memref<128xf32, #tpu.memory_space<vmem>>
        %255 = tpu.memref_slice %arg9[%153, %c5_i32_125] : memref<2x8x!tpu.dma_semaphore, #tpu.memory_space<semaphore_mem>> -> memref<1x1x!tpu.dma_semaphore, #tpu.memory_space<semaphore_mem>>
        %256 = tpu.memref_squeeze %255 : memref<1x1x!tpu.dma_semaphore, #tpu.memory_space<semaphore_mem>> -> memref<!tpu.dma_semaphore, #tpu.memory_space<semaphore_mem>>
        tpu.enqueue_dma source(%252 : memref<128xf32, #tpu.memory_space<any>>) target(%254 : memref<128xf32, #tpu.memory_space<vmem>>) target_semaphore(%256 : memref<!tpu.dma_semaphore, #tpu.memory_space<semaphore_mem>>)
      } else {
      }
      %c6_i32_112 = arith.constant 6 : i32
      %227 = arith.addi %154, %c6_i32_112 : i32
      %228 = arith.index_cast %227 : i32 to index
      %229 = memref.load %arg1[%228] : memref<16xi32, #tpu.memory_space<smem>>
      %c6_i32_113 = arith.constant 6 : i32
      %230 = arith.addi %154, %c6_i32_113 : i32
      %231 = arith.index_cast %230 : i32 to index
      %232 = memref.load %arg2[%231] : memref<16xi32, #tpu.memory_space<smem>>
      %c0_i32_114 = arith.constant 0 : i32
      %233 = arith.cmpi slt, %232, %c0_i32_114 : i32
      %234 = arith.extui %233 : i1 to i32
      %c0_i32_115 = arith.constant 0 : i32
      %235 = arith.cmpi ne, %234, %c0_i32_115 : i32
      scf.if %235 {
        %c6_i32_124 = arith.constant 6 : i32
        %c6_i32_125 = arith.constant 6 : i32
        %c0_i32_126 = arith.constant 0 : i32
        %251 = tpu.memref_slice %arg4[%229, %c0_i32_126] : memref<64x128xf32, #tpu.memory_space<any>> -> memref<1x128xf32, #tpu.memory_space<any>>
        %252 = tpu.memref_squeeze %251 : memref<1x128xf32, #tpu.memory_space<any>> -> memref<128xf32, #tpu.memory_space<any>>
        %c0_i32_127 = arith.constant 0 : i32
        %253 = tpu.memref_slice %arg8[%153, %c6_i32_124, %c0_i32_127] : memref<2x8x128xf32, #tpu.memory_space<vmem>> -> memref<1x1x128xf32, #tpu.memory_space<vmem>>
        %254 = tpu.memref_squeeze %253 : memref<1x1x128xf32, #tpu.memory_space<vmem>> -> memref<128xf32, #tpu.memory_space<vmem>>
        %255 = tpu.memref_slice %arg9[%153, %c6_i32_125] : memref<2x8x!tpu.dma_semaphore, #tpu.memory_space<semaphore_mem>> -> memref<1x1x!tpu.dma_semaphore, #tpu.memory_space<semaphore_mem>>
        %256 = tpu.memref_squeeze %255 : memref<1x1x!tpu.dma_semaphore, #tpu.memory_space<semaphore_mem>> -> memref<!tpu.dma_semaphore, #tpu.memory_space<semaphore_mem>>
        tpu.enqueue_dma source(%252 : memref<128xf32, #tpu.memory_space<any>>) target(%254 : memref<128xf32, #tpu.memory_space<vmem>>) target_semaphore(%256 : memref<!tpu.dma_semaphore, #tpu.memory_space<semaphore_mem>>)
      } else {
      }
      %c0_i32_116 = arith.constant 0 : i32
      %236 = arith.cmpi sge, %232, %c0_i32_116 : i32
      %237 = arith.extui %236 : i1 to i32
      %c0_i32_117 = arith.constant 0 : i32
      %238 = arith.cmpi ne, %237, %c0_i32_117 : i32
      scf.if %238 {
        %c6_i32_124 = arith.constant 6 : i32
        %c6_i32_125 = arith.constant 6 : i32
        %c0_i32_126 = arith.constant 0 : i32
        %251 = tpu.memref_slice %arg5[%232, %c0_i32_126] : memref<8x128xf32, #tpu.memory_space<any>> -> memref<1x128xf32, #tpu.memory_space<any>>
        %252 = tpu.memref_squeeze %251 : memref<1x128xf32, #tpu.memory_space<any>> -> memref<128xf32, #tpu.memory_space<any>>
        %c0_i32_127 = arith.constant 0 : i32
        %253 = tpu.memref_slice %arg8[%153, %c6_i32_124, %c0_i32_127] : memref<2x8x128xf32, #tpu.memory_space<vmem>> -> memref<1x1x128xf32, #tpu.memory_space<vmem>>
        %254 = tpu.memref_squeeze %253 : memref<1x1x128xf32, #tpu.memory_space<vmem>> -> memref<128xf32, #tpu.memory_space<vmem>>
        %255 = tpu.memref_slice %arg9[%153, %c6_i32_125] : memref<2x8x!tpu.dma_semaphore, #tpu.memory_space<semaphore_mem>> -> memref<1x1x!tpu.dma_semaphore, #tpu.memory_space<semaphore_mem>>
        %256 = tpu.memref_squeeze %255 : memref<1x1x!tpu.dma_semaphore, #tpu.memory_space<semaphore_mem>> -> memref<!tpu.dma_semaphore, #tpu.memory_space<semaphore_mem>>
        tpu.enqueue_dma source(%252 : memref<128xf32, #tpu.memory_space<any>>) target(%254 : memref<128xf32, #tpu.memory_space<vmem>>) target_semaphore(%256 : memref<!tpu.dma_semaphore, #tpu.memory_space<semaphore_mem>>)
      } else {
      }
      %c7_i32_118 = arith.constant 7 : i32
      %239 = arith.addi %154, %c7_i32_118 : i32
      %240 = arith.index_cast %239 : i32 to index
      %241 = memref.load %arg1[%240] : memref<16xi32, #tpu.memory_space<smem>>
      %c7_i32_119 = arith.constant 7 : i32
      %242 = arith.addi %154, %c7_i32_119 : i32
      %243 = arith.index_cast %242 : i32 to index
      %244 = memref.load %arg2[%243] : memref<16xi32, #tpu.memory_space<smem>>
      %c0_i32_120 = arith.constant 0 : i32
      %245 = arith.cmpi slt, %244, %c0_i32_120 : i32
      %246 = arith.extui %245 : i1 to i32
      %c0_i32_121 = arith.constant 0 : i32
      %247 = arith.cmpi ne, %246, %c0_i32_121 : i32
      scf.if %247 {
        %c7_i32_124 = arith.constant 7 : i32
        %c7_i32_125 = arith.constant 7 : i32
        %c0_i32_126 = arith.constant 0 : i32
        %251 = tpu.memref_slice %arg4[%241, %c0_i32_126] : memref<64x128xf32, #tpu.memory_space<any>> -> memref<1x128xf32, #tpu.memory_space<any>>
        %252 = tpu.memref_squeeze %251 : memref<1x128xf32, #tpu.memory_space<any>> -> memref<128xf32, #tpu.memory_space<any>>
        %c0_i32_127 = arith.constant 0 : i32
        %253 = tpu.memref_slice %arg8[%153, %c7_i32_124, %c0_i32_127] : memref<2x8x128xf32, #tpu.memory_space<vmem>> -> memref<1x1x128xf32, #tpu.memory_space<vmem>>
        %254 = tpu.memref_squeeze %253 : memref<1x1x128xf32, #tpu.memory_space<vmem>> -> memref<128xf32, #tpu.memory_space<vmem>>
        %255 = tpu.memref_slice %arg9[%153, %c7_i32_125] : memref<2x8x!tpu.dma_semaphore, #tpu.memory_space<semaphore_mem>> -> memref<1x1x!tpu.dma_semaphore, #tpu.memory_space<semaphore_mem>>
        %256 = tpu.memref_squeeze %255 : memref<1x1x!tpu.dma_semaphore, #tpu.memory_space<semaphore_mem>> -> memref<!tpu.dma_semaphore, #tpu.memory_space<semaphore_mem>>
        tpu.enqueue_dma source(%252 : memref<128xf32, #tpu.memory_space<any>>) target(%254 : memref<128xf32, #tpu.memory_space<vmem>>) target_semaphore(%256 : memref<!tpu.dma_semaphore, #tpu.memory_space<semaphore_mem>>)
      } else {
      }
      %c0_i32_122 = arith.constant 0 : i32
      %248 = arith.cmpi sge, %244, %c0_i32_122 : i32
      %249 = arith.extui %248 : i1 to i32
      %c0_i32_123 = arith.constant 0 : i32
      %250 = arith.cmpi ne, %249, %c0_i32_123 : i32
      scf.if %250 {
        %c7_i32_124 = arith.constant 7 : i32
        %c7_i32_125 = arith.constant 7 : i32
        %c0_i32_126 = arith.constant 0 : i32
        %251 = tpu.memref_slice %arg5[%244, %c0_i32_126] : memref<8x128xf32, #tpu.memory_space<any>> -> memref<1x128xf32, #tpu.memory_space<any>>
        %252 = tpu.memref_squeeze %251 : memref<1x128xf32, #tpu.memory_space<any>> -> memref<128xf32, #tpu.memory_space<any>>
        %c0_i32_127 = arith.constant 0 : i32
        %253 = tpu.memref_slice %arg8[%153, %c7_i32_124, %c0_i32_127] : memref<2x8x128xf32, #tpu.memory_space<vmem>> -> memref<1x1x128xf32, #tpu.memory_space<vmem>>
        %254 = tpu.memref_squeeze %253 : memref<1x1x128xf32, #tpu.memory_space<vmem>> -> memref<128xf32, #tpu.memory_space<vmem>>
        %255 = tpu.memref_slice %arg9[%153, %c7_i32_125] : memref<2x8x!tpu.dma_semaphore, #tpu.memory_space<semaphore_mem>> -> memref<1x1x!tpu.dma_semaphore, #tpu.memory_space<semaphore_mem>>
        %256 = tpu.memref_squeeze %255 : memref<1x1x!tpu.dma_semaphore, #tpu.memory_space<semaphore_mem>> -> memref<!tpu.dma_semaphore, #tpu.memory_space<semaphore_mem>>
        tpu.enqueue_dma source(%252 : memref<128xf32, #tpu.memory_space<any>>) target(%254 : memref<128xf32, #tpu.memory_space<vmem>>) target_semaphore(%256 : memref<!tpu.dma_semaphore, #tpu.memory_space<semaphore_mem>>)
      } else {
      }
    } else {
    }
    %c0_i32_8 = arith.constant 0 : i32
    %c0_i32_9 = arith.constant 0 : i32
    %c0_i32_10 = arith.constant 0 : i32
    %c0_i32_11 = arith.constant 0 : i32
    %17 = tpu.memref_slice %arg4[%c0_i32_8, %c0_i32_11] : memref<64x128xf32, #tpu.memory_space<any>> -> memref<1x128xf32, #tpu.memory_space<any>>
    %18 = tpu.memref_squeeze %17 : memref<1x128xf32, #tpu.memory_space<any>> -> memref<128xf32, #tpu.memory_space<any>>
    %c0_i32_12 = arith.constant 0 : i32
    %19 = tpu.memref_slice %arg8[%12, %c0_i32_9, %c0_i32_12] : memref<2x8x128xf32, #tpu.memory_space<vmem>> -> memref<1x1x128xf32, #tpu.memory_space<vmem>>
    %20 = tpu.memref_squeeze %19 : memref<1x1x128xf32, #tpu.memory_space<vmem>> -> memref<128xf32, #tpu.memory_space<vmem>>
    %21 = tpu.memref_slice %arg9[%12, %c0_i32_10] : memref<2x8x!tpu.dma_semaphore, #tpu.memory_space<semaphore_mem>> -> memref<1x1x!tpu.dma_semaphore, #tpu.memory_space<semaphore_mem>>
    %22 = tpu.memref_squeeze %21 : memref<1x1x!tpu.dma_semaphore, #tpu.memory_space<semaphore_mem>> -> memref<!tpu.dma_semaphore, #tpu.memory_space<semaphore_mem>>
    tpu.wait_dma2 semaphore(%22 : memref<!tpu.dma_semaphore, #tpu.memory_space<semaphore_mem>>) src(%18 : memref<128xf32, #tpu.memory_space<any>>) dst(%20 : memref<128xf32, #tpu.memory_space<vmem>>)
    %c0_i32_13 = arith.constant 0 : i32
    %c1_i32_14 = arith.constant 1 : i32
    %c1_i32_15 = arith.constant 1 : i32
    %c0_i32_16 = arith.constant 0 : i32
    %23 = tpu.memref_slice %arg4[%c0_i32_13, %c0_i32_16] : memref<64x128xf32, #tpu.memory_space<any>> -> memref<1x128xf32, #tpu.memory_space<any>>
    %24 = tpu.memref_squeeze %23 : memref<1x128xf32, #tpu.memory_space<any>> -> memref<128xf32, #tpu.memory_space<any>>
    %c0_i32_17 = arith.constant 0 : i32
    %25 = tpu.memref_slice %arg8[%12, %c1_i32_14, %c0_i32_17] : memref<2x8x128xf32, #tpu.memory_space<vmem>> -> memref<1x1x128xf32, #tpu.memory_space<vmem>>
    %26 = tpu.memref_squeeze %25 : memref<1x1x128xf32, #tpu.memory_space<vmem>> -> memref<128xf32, #tpu.memory_space<vmem>>
    %27 = tpu.memref_slice %arg9[%12, %c1_i32_15] : memref<2x8x!tpu.dma_semaphore, #tpu.memory_space<semaphore_mem>> -> memref<1x1x!tpu.dma_semaphore, #tpu.memory_space<semaphore_mem>>
    %28 = tpu.memref_squeeze %27 : memref<1x1x!tpu.dma_semaphore, #tpu.memory_space<semaphore_mem>> -> memref<!tpu.dma_semaphore, #tpu.memory_space<semaphore_mem>>
    tpu.wait_dma2 semaphore(%28 : memref<!tpu.dma_semaphore, #tpu.memory_space<semaphore_mem>>) src(%24 : memref<128xf32, #tpu.memory_space<any>>) dst(%26 : memref<128xf32, #tpu.memory_space<vmem>>)
    %c0_i32_18 = arith.constant 0 : i32
    %c2_i32_19 = arith.constant 2 : i32
    %c2_i32_20 = arith.constant 2 : i32
    %c0_i32_21 = arith.constant 0 : i32
    %29 = tpu.memref_slice %arg4[%c0_i32_18, %c0_i32_21] : memref<64x128xf32, #tpu.memory_space<any>> -> memref<1x128xf32, #tpu.memory_space<any>>
    %30 = tpu.memref_squeeze %29 : memref<1x128xf32, #tpu.memory_space<any>> -> memref<128xf32, #tpu.memory_space<any>>
    %c0_i32_22 = arith.constant 0 : i32
    %31 = tpu.memref_slice %arg8[%12, %c2_i32_19, %c0_i32_22] : memref<2x8x128xf32, #tpu.memory_space<vmem>> -> memref<1x1x128xf32, #tpu.memory_space<vmem>>
    %32 = tpu.memref_squeeze %31 : memref<1x1x128xf32, #tpu.memory_space<vmem>> -> memref<128xf32, #tpu.memory_space<vmem>>
    %33 = tpu.memref_slice %arg9[%12, %c2_i32_20] : memref<2x8x!tpu.dma_semaphore, #tpu.memory_space<semaphore_mem>> -> memref<1x1x!tpu.dma_semaphore, #tpu.memory_space<semaphore_mem>>
    %34 = tpu.memref_squeeze %33 : memref<1x1x!tpu.dma_semaphore, #tpu.memory_space<semaphore_mem>> -> memref<!tpu.dma_semaphore, #tpu.memory_space<semaphore_mem>>
    tpu.wait_dma2 semaphore(%34 : memref<!tpu.dma_semaphore, #tpu.memory_space<semaphore_mem>>) src(%30 : memref<128xf32, #tpu.memory_space<any>>) dst(%32 : memref<128xf32, #tpu.memory_space<vmem>>)
    %c0_i32_23 = arith.constant 0 : i32
    %c3_i32 = arith.constant 3 : i32
    %c3_i32_24 = arith.constant 3 : i32
    %c0_i32_25 = arith.constant 0 : i32
    %35 = tpu.memref_slice %arg4[%c0_i32_23, %c0_i32_25] : memref<64x128xf32, #tpu.memory_space<any>> -> memref<1x128xf32, #tpu.memory_space<any>>
    %36 = tpu.memref_squeeze %35 : memref<1x128xf32, #tpu.memory_space<any>> -> memref<128xf32, #tpu.memory_space<any>>
    %c0_i32_26 = arith.constant 0 : i32
    %37 = tpu.memref_slice %arg8[%12, %c3_i32, %c0_i32_26] : memref<2x8x128xf32, #tpu.memory_space<vmem>> -> memref<1x1x128xf32, #tpu.memory_space<vmem>>
    %38 = tpu.memref_squeeze %37 : memref<1x1x128xf32, #tpu.memory_space<vmem>> -> memref<128xf32, #tpu.memory_space<vmem>>
    %39 = tpu.memref_slice %arg9[%12, %c3_i32_24] : memref<2x8x!tpu.dma_semaphore, #tpu.memory_space<semaphore_mem>> -> memref<1x1x!tpu.dma_semaphore, #tpu.memory_space<semaphore_mem>>
    %40 = tpu.memref_squeeze %39 : memref<1x1x!tpu.dma_semaphore, #tpu.memory_space<semaphore_mem>> -> memref<!tpu.dma_semaphore, #tpu.memory_space<semaphore_mem>>
    tpu.wait_dma2 semaphore(%40 : memref<!tpu.dma_semaphore, #tpu.memory_space<semaphore_mem>>) src(%36 : memref<128xf32, #tpu.memory_space<any>>) dst(%38 : memref<128xf32, #tpu.memory_space<vmem>>)
    %c0_i32_27 = arith.constant 0 : i32
    %c4_i32 = arith.constant 4 : i32
    %c4_i32_28 = arith.constant 4 : i32
    %c0_i32_29 = arith.constant 0 : i32
    %41 = tpu.memref_slice %arg4[%c0_i32_27, %c0_i32_29] : memref<64x128xf32, #tpu.memory_space<any>> -> memref<1x128xf32, #tpu.memory_space<any>>
    %42 = tpu.memref_squeeze %41 : memref<1x128xf32, #tpu.memory_space<any>> -> memref<128xf32, #tpu.memory_space<any>>
    %c0_i32_30 = arith.constant 0 : i32
    %43 = tpu.memref_slice %arg8[%12, %c4_i32, %c0_i32_30] : memref<2x8x128xf32, #tpu.memory_space<vmem>> -> memref<1x1x128xf32, #tpu.memory_space<vmem>>
    %44 = tpu.memref_squeeze %43 : memref<1x1x128xf32, #tpu.memory_space<vmem>> -> memref<128xf32, #tpu.memory_space<vmem>>
    %45 = tpu.memref_slice %arg9[%12, %c4_i32_28] : memref<2x8x!tpu.dma_semaphore, #tpu.memory_space<semaphore_mem>> -> memref<1x1x!tpu.dma_semaphore, #tpu.memory_space<semaphore_mem>>
    %46 = tpu.memref_squeeze %45 : memref<1x1x!tpu.dma_semaphore, #tpu.memory_space<semaphore_mem>> -> memref<!tpu.dma_semaphore, #tpu.memory_space<semaphore_mem>>
    tpu.wait_dma2 semaphore(%46 : memref<!tpu.dma_semaphore, #tpu.memory_space<semaphore_mem>>) src(%42 : memref<128xf32, #tpu.memory_space<any>>) dst(%44 : memref<128xf32, #tpu.memory_space<vmem>>)
    %c0_i32_31 = arith.constant 0 : i32
    %c5_i32 = arith.constant 5 : i32
    %c5_i32_32 = arith.constant 5 : i32
    %c0_i32_33 = arith.constant 0 : i32
    %47 = tpu.memref_slice %arg4[%c0_i32_31, %c0_i32_33] : memref<64x128xf32, #tpu.memory_space<any>> -> memref<1x128xf32, #tpu.memory_space<any>>
    %48 = tpu.memref_squeeze %47 : memref<1x128xf32, #tpu.memory_space<any>> -> memref<128xf32, #tpu.memory_space<any>>
    %c0_i32_34 = arith.constant 0 : i32
    %49 = tpu.memref_slice %arg8[%12, %c5_i32, %c0_i32_34] : memref<2x8x128xf32, #tpu.memory_space<vmem>> -> memref<1x1x128xf32, #tpu.memory_space<vmem>>
    %50 = tpu.memref_squeeze %49 : memref<1x1x128xf32, #tpu.memory_space<vmem>> -> memref<128xf32, #tpu.memory_space<vmem>>
    %51 = tpu.memref_slice %arg9[%12, %c5_i32_32] : memref<2x8x!tpu.dma_semaphore, #tpu.memory_space<semaphore_mem>> -> memref<1x1x!tpu.dma_semaphore, #tpu.memory_space<semaphore_mem>>
    %52 = tpu.memref_squeeze %51 : memref<1x1x!tpu.dma_semaphore, #tpu.memory_space<semaphore_mem>> -> memref<!tpu.dma_semaphore, #tpu.memory_space<semaphore_mem>>
    tpu.wait_dma2 semaphore(%52 : memref<!tpu.dma_semaphore, #tpu.memory_space<semaphore_mem>>) src(%48 : memref<128xf32, #tpu.memory_space<any>>) dst(%50 : memref<128xf32, #tpu.memory_space<vmem>>)
    %c0_i32_35 = arith.constant 0 : i32
    %c6_i32 = arith.constant 6 : i32
    %c6_i32_36 = arith.constant 6 : i32
    %c0_i32_37 = arith.constant 0 : i32
    %53 = tpu.memref_slice %arg4[%c0_i32_35, %c0_i32_37] : memref<64x128xf32, #tpu.memory_space<any>> -> memref<1x128xf32, #tpu.memory_space<any>>
    %54 = tpu.memref_squeeze %53 : memref<1x128xf32, #tpu.memory_space<any>> -> memref<128xf32, #tpu.memory_space<any>>
    %c0_i32_38 = arith.constant 0 : i32
    %55 = tpu.memref_slice %arg8[%12, %c6_i32, %c0_i32_38] : memref<2x8x128xf32, #tpu.memory_space<vmem>> -> memref<1x1x128xf32, #tpu.memory_space<vmem>>
    %56 = tpu.memref_squeeze %55 : memref<1x1x128xf32, #tpu.memory_space<vmem>> -> memref<128xf32, #tpu.memory_space<vmem>>
    %57 = tpu.memref_slice %arg9[%12, %c6_i32_36] : memref<2x8x!tpu.dma_semaphore, #tpu.memory_space<semaphore_mem>> -> memref<1x1x!tpu.dma_semaphore, #tpu.memory_space<semaphore_mem>>
    %58 = tpu.memref_squeeze %57 : memref<1x1x!tpu.dma_semaphore, #tpu.memory_space<semaphore_mem>> -> memref<!tpu.dma_semaphore, #tpu.memory_space<semaphore_mem>>
    tpu.wait_dma2 semaphore(%58 : memref<!tpu.dma_semaphore, #tpu.memory_space<semaphore_mem>>) src(%54 : memref<128xf32, #tpu.memory_space<any>>) dst(%56 : memref<128xf32, #tpu.memory_space<vmem>>)
    %c0_i32_39 = arith.constant 0 : i32
    %c7_i32 = arith.constant 7 : i32
    %c7_i32_40 = arith.constant 7 : i32
    %c0_i32_41 = arith.constant 0 : i32
    %59 = tpu.memref_slice %arg4[%c0_i32_39, %c0_i32_41] : memref<64x128xf32, #tpu.memory_space<any>> -> memref<1x128xf32, #tpu.memory_space<any>>
    %60 = tpu.memref_squeeze %59 : memref<1x128xf32, #tpu.memory_space<any>> -> memref<128xf32, #tpu.memory_space<any>>
    %c0_i32_42 = arith.constant 0 : i32
    %61 = tpu.memref_slice %arg8[%12, %c7_i32, %c0_i32_42] : memref<2x8x128xf32, #tpu.memory_space<vmem>> -> memref<1x1x128xf32, #tpu.memory_space<vmem>>
    %62 = tpu.memref_squeeze %61 : memref<1x1x128xf32, #tpu.memory_space<vmem>> -> memref<128xf32, #tpu.memory_space<vmem>>
    %63 = tpu.memref_slice %arg9[%12, %c7_i32_40] : memref<2x8x!tpu.dma_semaphore, #tpu.memory_space<semaphore_mem>> -> memref<1x1x!tpu.dma_semaphore, #tpu.memory_space<semaphore_mem>>
    %64 = tpu.memref_squeeze %63 : memref<1x1x!tpu.dma_semaphore, #tpu.memory_space<semaphore_mem>> -> memref<!tpu.dma_semaphore, #tpu.memory_space<semaphore_mem>>
    tpu.wait_dma2 semaphore(%64 : memref<!tpu.dma_semaphore, #tpu.memory_space<semaphore_mem>>) src(%60 : memref<128xf32, #tpu.memory_space<any>>) dst(%62 : memref<128xf32, #tpu.memory_space<vmem>>)
    %65 = arith.index_cast %12 : i32 to index
    %c0 = arith.constant 0 : index
    %c0_43 = arith.constant 0 : index
    %66 = vector.load %arg8[%65, %c0, %c0_43] : memref<2x8x128xf32, #tpu.memory_space<vmem>>, vector<1x8x128xf32>
    %67 = vector.shape_cast %66 : vector<1x8x128xf32> to vector<8x128xf32>
    %c8_i32 = arith.constant 8 : i32
    %68 = arith.muli %arg0, %c8_i32 : i32
    %69 = tpu.iota {dimensions = array<i32: 0>} : vector<8x1xi32>
    %cst = arith.constant 0.000000e+00 : f32
    %70 = vector.broadcast %cst : f32 to vector<8x1xf32>
    %c0_i32_44 = arith.constant 0 : i32
    %71 = vector.broadcast %c0_i32_44 : i32 to vector<8x1xi32>
    %72 = arith.cmpi eq, %69, %71 : vector<8x1xi32>
    %c0_i32_45 = arith.constant 0 : i32
    %73 = arith.addi %68, %c0_i32_45 : i32
    %74 = arith.index_cast %73 : i32 to index
    %75 = memref.load %arg3[%74] : memref<16xf32, #tpu.memory_space<smem>>
    %76 = vector.broadcast %75 : f32 to vector<8x1xf32>
    %77 = arith.select %72, %76, %70 : vector<8x1xi1>, vector<8x1xf32>
    %c1_i32_46 = arith.constant 1 : i32
    %78 = vector.broadcast %c1_i32_46 : i32 to vector<8x1xi32>
    %79 = arith.cmpi eq, %69, %78 : vector<8x1xi32>
    %c1_i32_47 = arith.constant 1 : i32
    %80 = arith.addi %68, %c1_i32_47 : i32
    %81 = arith.index_cast %80 : i32 to index
    %82 = memref.load %arg3[%81] : memref<16xf32, #tpu.memory_space<smem>>
    %83 = vector.broadcast %82 : f32 to vector<8x1xf32>
    %84 = arith.select %79, %83, %77 : vector<8x1xi1>, vector<8x1xf32>
    %c2_i32_48 = arith.constant 2 : i32
    %85 = vector.broadcast %c2_i32_48 : i32 to vector<8x1xi32>
    %86 = arith.cmpi eq, %69, %85 : vector<8x1xi32>
    %c2_i32_49 = arith.constant 2 : i32
    %87 = arith.addi %68, %c2_i32_49 : i32
    %88 = arith.index_cast %87 : i32 to index
    %89 = memref.load %arg3[%88] : memref<16xf32, #tpu.memory_space<smem>>
    %90 = vector.broadcast %89 : f32 to vector<8x1xf32>
    %91 = arith.select %86, %90, %84 : vector<8x1xi1>, vector<8x1xf32>
    %c3_i32_50 = arith.constant 3 : i32
    %92 = vector.broadcast %c3_i32_50 : i32 to vector<8x1xi32>
    %93 = arith.cmpi eq, %69, %92 : vector<8x1xi32>
    %c3_i32_51 = arith.constant 3 : i32
    %94 = arith.addi %68, %c3_i32_51 : i32
    %95 = arith.index_cast %94 : i32 to index
    %96 = memref.load %arg3[%95] : memref<16xf32, #tpu.memory_space<smem>>
    %97 = vector.broadcast %96 : f32 to vector<8x1xf32>
    %98 = arith.select %93, %97, %91 : vector<8x1xi1>, vector<8x1xf32>
    %c4_i32_52 = arith.constant 4 : i32
    %99 = vector.broadcast %c4_i32_52 : i32 to vector<8x1xi32>
    %100 = arith.cmpi eq, %69, %99 : vector<8x1xi32>
    %c4_i32_53 = arith.constant 4 : i32
    %101 = arith.addi %68, %c4_i32_53 : i32
    %102 = arith.index_cast %101 : i32 to index
    %103 = memref.load %arg3[%102] : memref<16xf32, #tpu.memory_space<smem>>
    %104 = vector.broadcast %103 : f32 to vector<8x1xf32>
    %105 = arith.select %100, %104, %98 : vector<8x1xi1>, vector<8x1xf32>
    %c5_i32_54 = arith.constant 5 : i32
    %106 = vector.broadcast %c5_i32_54 : i32 to vector<8x1xi32>
    %107 = arith.cmpi eq, %69, %106 : vector<8x1xi32>
    %c5_i32_55 = arith.constant 5 : i32
    %108 = arith.addi %68, %c5_i32_55 : i32
    %109 = arith.index_cast %108 : i32 to index
    %110 = memref.load %arg3[%109] : memref<16xf32, #tpu.memory_space<smem>>
    %111 = vector.broadcast %110 : f32 to vector<8x1xf32>
    %112 = arith.select %107, %111, %105 : vector<8x1xi1>, vector<8x1xf32>
    %c6_i32_56 = arith.constant 6 : i32
    %113 = vector.broadcast %c6_i32_56 : i32 to vector<8x1xi32>
    %114 = arith.cmpi eq, %69, %113 : vector<8x1xi32>
    %c6_i32_57 = arith.constant 6 : i32
    %115 = arith.addi %68, %c6_i32_57 : i32
    %116 = arith.index_cast %115 : i32 to index
    %117 = memref.load %arg3[%116] : memref<16xf32, #tpu.memory_space<smem>>
    %118 = vector.broadcast %117 : f32 to vector<8x1xf32>
    %119 = arith.select %114, %118, %112 : vector<8x1xi1>, vector<8x1xf32>
    %c7_i32_58 = arith.constant 7 : i32
    %120 = vector.broadcast %c7_i32_58 : i32 to vector<8x1xi32>
    %121 = arith.cmpi eq, %69, %120 : vector<8x1xi32>
    %c7_i32_59 = arith.constant 7 : i32
    %122 = arith.addi %68, %c7_i32_59 : i32
    %123 = arith.index_cast %122 : i32 to index
    %124 = memref.load %arg3[%123] : memref<16xf32, #tpu.memory_space<smem>>
    %125 = vector.broadcast %124 : f32 to vector<8x1xf32>
    %126 = arith.select %121, %125, %119 : vector<8x1xi1>, vector<8x1xf32>
    %127 = vector.broadcast %126 : vector<8x1xf32> to vector<8x128xf32>
    %128 = arith.mulf %67, %127 : vector<8x128xf32>
    %c0_60 = arith.constant 0 : index
    %c0_61 = arith.constant 0 : index
    %129 = vector.load %arg6[%c0_60, %c0_61] : memref<8x128xf32, #tpu.memory_space<vmem>>, vector<8x128xf32>
    tpu.vector_store %arg6[%c0_60, %c0_61], %128 {strides = array<i32>} : memref<8x128xf32, #tpu.memory_space<vmem>>, vector<8x128xf32>,
    %130 = vector.broadcast %68 : i32 to vector<8x1xi32>
    %131 = arith.addi %130, %69 : vector<8x1xi32>
    %c16_i32 = arith.constant 16 : i32
    %132 = vector.broadcast %c16_i32 : i32 to vector<8x1xi32>
    %133 = arith.cmpi slt, %131, %132 : vector<8x1xi32>
    %cst_62 = arith.constant 0.000000e+00 : f32
    %134 = vector.shape_cast %133 : vector<8x1xi1> to vector<8x1xi1>
    %135 = vector.broadcast %134 : vector<8x1xi1> to vector<8x128xi1>
    %136 = vector.broadcast %cst_62 : f32 to vector<8x128xf32>
    %137 = arith.select %135, %67, %136 : vector<8x128xi1>, vector<8x128xf32>
    %cst_63 = arith.constant dense<0.000000e+00> : vector<128xf32>
    %138 = vector.multi_reduction <add>, %137, %cst_63 [0] : vector<8x128xf32> to vector<128xf32>
    %139 = vector.shape_cast %138 : vector<128xf32> to vector<1x128xf32>
    %cst_64 = arith.constant 0.000000e+00 : f32
    %140 = vector.shape_cast %133 : vector<8x1xi1> to vector<8x1xi1>
    %141 = vector.broadcast %140 : vector<8x1xi1> to vector<8x128xi1>
    %142 = vector.broadcast %cst_64 : f32 to vector<8x128xf32>
    %143 = arith.select %141, %128, %142 : vector<8x128xi1>, vector<8x128xf32>
    %cst_65 = arith.constant dense<0.000000e+00> : vector<128xf32>
    %144 = vector.multi_reduction <add>, %143, %cst_65 [0] : vector<8x128xf32> to vector<128xf32>
    %145 = vector.shape_cast %144 : vector<128xf32> to vector<1x128xf32>
    %c0_66 = arith.constant 0 : index
    %c0_67 = arith.constant 0 : index
    %146 = vector.load %arg7[%c0_66, %c0_67] : memref<2x128xf32, #tpu.memory_space<vmem>>, vector<1x128xf32>
    %147 = arith.addf %146, %139 : vector<1x128xf32>
    %c0_68 = arith.constant 0 : index
    %c0_69 = arith.constant 0 : index
    %148 = vector.load %arg7[%c0_68, %c0_69] : memref<2x128xf32, #tpu.memory_space<vmem>>, vector<1x128xf32>
    tpu.vector_store %arg7[%c0_68, %c0_69], %147 {strides = array<i32>} : memref<2x128xf32, #tpu.memory_space<vmem>>, vector<1x128xf32>,
    %c1 = arith.constant 1 : index
    %c0_70 = arith.constant 0 : index
    %149 = vector.load %arg7[%c1, %c0_70] : memref<2x128xf32, #tpu.memory_space<vmem>>, vector<1x128xf32>
    %150 = arith.addf %149, %145 : vector<1x128xf32>
    %c1_71 = arith.constant 1 : index
    %c0_72 = arith.constant 0 : index
    %151 = vector.load %arg7[%c1_71, %c0_72] : memref<2x128xf32, #tpu.memory_space<vmem>>, vector<1x128xf32>
    tpu.vector_store %arg7[%c1_71, %c0_72], %150 {strides = array<i32>} : memref<2x128xf32, #tpu.memory_space<vmem>>, vector<1x128xf32>,
    return
  }
  func.func @transform_0(%arg0: i32) -> i32 {
    %c0_i32 = arith.constant 0 : i32
    %c0_i32_0 = arith.constant 0 : i32
    return %c0_i32 : i32
  }
  func.func @transform_1(%arg0: i32) -> i32 {
    %c0_i32 = arith.constant 0 : i32
    %c0_i32_0 = arith.constant 0 : i32
    return %c0_i32 : i32
  }
  func.func @transform_2(%arg0: i32) -> i32 {
    %c0_i32 = arith.constant 0 : i32
    %c0_i32_0 = arith.constant 0 : i32
    return %c0_i32 : i32
  }
  func.func @transform_5(%arg0: i32) -> (i32, i32) {
    %c0_i32 = arith.constant 0 : i32
    %c0_i32_0 = arith.constant 0 : i32
    return %arg0, %c0_i32 : i32, i32
  }
  func.func @transform_6(%arg0: i32) -> (i32, i32) {
    %c0_i32 = arith.constant 0 : i32
    %c0_i32_0 = arith.constant 0 : i32
    %c0_i32_1 = arith.constant 0 : i32
    return %c0_i32, %c0_i32_0 : i32, i32
  }
}

</mosaic_0001>

<bundles_post_ra>
// kernel: clip_ti_emphasis.3
= control target key start
LH: loop header
LB: loop body
LE: loop exit
PB: predicated region body
PF: predicated region fallthrough
CT: control target
= control target key end

     0   :  { %s430_s0 = inlined_call_operand.<no memory space> [shape: f32[1], index: 0, kind: input, shape index: {}]   ;;  %s431_s1 = inlined_call_operand.vmem [shape: f32[16,128], index: 1, kind: input, shape index: {}]   ;;  %s432_s2 = inlined_call_operand.hbm [shape: f32[16,128], index: 2, kind: output, shape index: {}]  }
   0x1   :  { %7 = sst [smem:[#allocation2]] %s430_s0 }
   0x2   :  { %8 = vsyncpa [#allocation4], 0 }
   0x3   :  { %10 = vsyncpa [#allocation4 + $0x1], 0  ;;  %s351_s11 = smov 0   ;;  %s353_s12 = smov 0  }
   0x4   :  { %s355_s13 = smov 0   ;;  %s357_s14 = smov 0  }
   0x5 LB: > { %s219_s0 = sadd.s32 4294967295, %s331_s14   ;;  %s220_s15 = sadd.s32 4294967294, %s331_s14   ;;  %s331_s14 = sphi %s357_s14, %s438_s14   ;;  %s327_s13 = sphi %s355_s13, %s437_s13   ;;  %s323_s12 = sphi %s353_s12, %s436_s12   ;;  %s319_s11 = sphi %s351_s11, %s435_s11  }
   0x6   : > { %s374_s16 = sadd.s32 1, %s331_s14   ;;  %s70_s17 = sadd.s32 1, %s327_s13 }
   0x7   : > { %s67_s18 = ssub.s32 %s331_s14, %s374_s16  ;;  %p80_p0 = scmp.ne.s32.totalorder %s327_s13, %s323_s12 }
   0x8   : > { %p68_p1 = scmp.eq.s32.totalorder %s67_s18, 0  ;;  %p81_p2 = scmp.eq.s32.totalorder %s219_s0, 1 }
   0x9   : > { %p86_p3 = scmp.ne.s32.totalorder %s323_s12, %s319_s11  ;;  %p87_p4 = scmp.eq.s32.totalorder %s220_s15, 1 }
   0xa   : > { %s384_s19 = scalar_select %p68_p1, %s327_s13, %s70_s17  }
   0xb   : > { %p386_p5 = por %p81_p2, %p80_p0  ;;  %p390_p6 = por %p87_p4, %p86_p3 }
   0xc   : > { %p223_p7 = scmp.ge.s32.totalorder %s331_s14, 1  ;;  %p115_p8 = scmp.lt.s32.totalorder %s331_s14, 3 }
   0xe   : > { %p116_p9 = pnand %p223_p7, %p115_p8 }
   0xf   : > { %s133_s22 = sand.u32 (!%p116_p9), 1, %s323_s12   ;;  %p136_p10 = scmp.lt.s32.totalorder (!%p116_p9), %s219_s0, 1 }
  0x10   : > { %119 = sbr.rel (%p116_p9) target bundleno = 33 (0x21), region = 28  ;;  %s224_s23 = sshll.u32 (!%p116_p9), %s133_s22, 3 }
  0x11   : > { %s141_s24 = sld [smem:[#allocation2]] (!%p116_p9)  ;;  %s227_s26 = sshll.u32 (!%p116_p9), %s219_s0, 3 }
  0x12   : > { %s135_s28 = scalar_lea.vmem (!%p116_p9), [#allocation3], %s224_s23  ;;  %s156_s7 = scalar_lea.hbm (!%p116_p9), %s432_s2, %s227_s26 }
  0x13   : > { %s158_s29 = sshll.u32 (!%p116_p9), %s135_s28, 4  ;;  %s160_s8 = sshll.u32 (!%p116_p9), %s156_s7, 4  ;;  %s159_s29 = int_to_ptr.vmem [resolvable:$true] %s158_s29  ;;  %s161_s8 = int_to_ptr.hbm [resolvable:$true] %s160_s8 }
  0x14   : > { %s146_s9 = scalar_lea.sflag (!%p116_p9), [#allocation4], %s133_s22  ;;  %s283_s10 = sshra.s32 (!%p116_p9), %s161_s8, 4  ;;  %s284_s10 = int_to_ptr.hbm [resolvable:$true] %s283_s10 }
  0x15   : > { %s137_s25 = scalar_select %p136_p10, %s219_s0, 1 }
  0x16   : > { %s285_s0 = scalar_lea.hbm %s284_s10, 8  ;;  %s289_s18 = scalar_lea.hbm %s432_s2, 16 }
  0x17   : > { %s225_s27 = sshll.u32 %s137_s25, 3  ;;  %v142_v1 = vstv %s141_s24  ;;  %p286_p11 = scmp.ne.s32.totalorder %s284_s10, %s285_s0 }
  0x18   : > { %s139_s4 = scalar_lea.vmem %s431_s1, %s225_s27  ;;  %p290_p0 = scmp.lt.s32.totalorder %s284_s10, %s432_s2 }
  0x19   : > { %v140_v0 = vld [vmem:[%s139_s4] sm:$0xff]  ;;  %p287_p12 = pnand %p286_p11, %p386_p5  ;;  %p291_p1 = scmp.lt.s32.totalorder %s289_s18, %s285_s0 }
  0x1a   : > { %v143_v2 = vmul.f32 %v142_v1, %v140_v0 }
  0x1b   : > { %p288_p13 = pneg %p287_p12  ;;  %p292_p2 = por %p291_p1, %p290_p0 }
  0x1c   : > { %144 = vst [vmem:[%s135_s28] sm:$0xff] %v143_v2 }
  0x1d   : > { %p293_p3 = pnand %p292_p2, %p288_p13 }
  0x1f   : > { %296 = shalt.err (!%p293_p3)
}
  0x20   : > { %230 = dma.vmem_to_hbm [thread:$0]  (%p386_p5), %s159_s29, 128, %s161_s8, %s146_s9  }
  0x21 PF: > { %p236_p4 = scmp.ge.s32.totalorder %s331_s14, 2  ;;  %s172_s22 = sand.u32 1, %s319_s11  }
  0x22   : > { %s173_s24 = scalar_lea.sflag [#allocation4], %s172_s22 }
  0x23   : > { %p233_p7 = pnand %p236_p4, %p390_p6 }
  0x25   : > { %p234_p8 = pneg %p233_p7 }
  0x27   : > { %314 = dma.done.wait (%p234_p8), %s173_s24, 128  }
  0x28   : > { %316 = vsyncadd (%p234_p8), %s173_s24, 4294967168  ;;  %p13_p9 = scmp.ge.s32.totalorder %s374_s16, 4   ;;  %s435_s11 = smov %s323_s12 }
  0x29   : > { %s436_s12 = smov %s327_s13  ;;  %s437_s13 = smov %s384_s19 }
  0x2a   : > { %s438_s14 = smov %s374_s16  ;;  %15 = sbr.rel (!%p13_p9) target bundleno = 5 (0x5), region = 63 }
  0x2f   :  { %179 = vsyncpa [#allocation4], 1 }
  0x30   :  { %181 = vsyncpa [#allocation4 + $0x1], 1 }

// kernel: clip_ti_emphasis.2
= control target key start
LH: loop header
LB: loop body
LE: loop exit
PB: predicated region body
PF: predicated region fallthrough
CT: control target
= control target key end

     0   :  { %s3575_s0 = inlined_call_operand.vmem [shape: s32[16], index: 0, kind: input, shape index: {}]   ;;  %s3576_s1 = inlined_call_operand.vmem [shape: s32[16], index: 1, kind: input, shape index: {}]   ;;  %s3577_s2 = inlined_call_operand.vmem [shape: f32[16], index: 2, kind: input, shape index: {}]   ;;  %s3578_s3 = inlined_call_operand.hbm [shape: f32[64,128], index: 3, kind: input, shape index: {}]   ;;  %s3579_s4 = inlined_call_operand.hbm [shape: f32[8,128], index: 4, kind: input, shape index: {}]   ;;  %s3580_s5 = inlined_call_operand.vmem [shape: f32[16,128], index: 5, kind: output, shape index: {0}]   ;;  %s3581_s6 = inlined_call_operand.vmem [shape: f32[2,128], index: 6, kind: output, shape index: {1}]  }
   0x1   :  { %3584 = sst [smem:[#allocation85_spill]] %s3575_s0 }
   0x2   :  { %3585 = sst [smem:[#allocation86_spill]] %s3576_s1 }
   0x3   :  { %3586 = sst [smem:[#allocation87_spill]] %s3577_s2 }
   0x4   :  { %3587 = sst [smem:[#allocation88_spill]] %s3580_s5 }
   0x5   :  { %12 = vsyncpa [#allocation5], 0 }
   0x6   :  { %13 = vsyncpa [#allocation7], 0  ;;  %s2672_s21 = smov 0  }
   0x7 LB: > { %s2678_s22 = sadd.s32 4294967295, %s2622_s21   ;;  %p1387_p0 = scmp.ge.s32.totalorder %s2622_s21, 1  ;;  %s2622_s21 = sphi %s2672_s21, %s19_s21  }
   0x8   : > { %p134_p1 = scmp.lt.s32.totalorder %s2622_s21, 3  ;;  %p1388_p2 = scmp.ne.s32.totalorder %s2678_s22, 0 }
   0x9   : > { %s3588_s1 = sld [smem:[#allocation86_spill]]  ;;  %p1593_p4 = scmp.eq.s32.totalorder %s2678_s22, 0 }
   0xa   : > { %p2686_p3 = pnand %p1387_p0, %p134_p1  ;;  %s3590_s0 = sld [smem:[#allocation85_spill]] }
   0xb   : > { %s3591_s2 = sld [smem:[#allocation87_spill]]  ;;  %s2624_s9 = smov [#allocation6]  }
   0xc   : > { %p1583_p5 = pneg %p2686_p3  ;;  %s2625_s10 = smov [#allocation4]  }
   0xd   : > { %s2626_s11 = smov [#allocation8]  }
   0xe   : > { %p1584_p6 = pnand %p1593_p4, %p1583_p5 }
   0xf   : > { %s156_s25 = sshll.u32 %s3588_s1, 4  ;;  %s157_s25 = int_to_ptr.vmem [resolvable:$true] %s156_s25 }
  0x10   : > { %s146_s29 = sshll.u32 %s3590_s0, 4  ;;  %179 = sbr.rel (%p2686_p3) target bundleno = 697 (0x2b9), region = 32  ;;  %s147_s29 = int_to_ptr.vmem [resolvable:$true] %s146_s29 }
  0x11   : > { %s166_s8 = sshll.u32 %s3591_s2, 4  ;;  %s167_s8 = int_to_ptr.vmem [resolvable:$true] %s166_s8 }
  0x12   : > { %1589 = dma.vmem_to_smem (!%p1584_p6), %s157_s25, 16, %s2624_s9, [#allocation7]  }
  0x13   : > { %1586 = dma.vmem_to_smem (!%p1584_p6), %s147_s29, 16, %s2625_s10, [#allocation5]  }
  0x14   : > { %1592 = dma.vmem_to_smem (!%p1584_p6), %s167_s8, 16, %s2626_s11, [#allocation7]  }
  0x15   : > { %2597 = dma.done.wait (%p1593_p4), [#allocation5], 16  }
  0x16   : > { %2599 = vsyncadd (%p1593_p4), [#allocation5], 4294967280 }
  0x17   : > { %2601 = dma.done.wait (%p1593_p4), [#allocation7], 32  }
  0x18   : > { %2603 = vsyncadd (%p1593_p4), [#allocation7], 4294967264 }
  0x19   : > { %196 = sfence }
  0x1a   : > { %p211_p7 = scmp.lt.s32.totalorder %s2678_s22, 1  ;;  %s3592_s5 = sld [smem:[#allocation88_spill]] }
  0x1b   : > { %s219_s17 = sld [smem:[#allocation4]] (!%p1388_p2)  ;;  %s2627_s19 = smov (!%p1388_p2), [#allocation2]  }
  0x1c   : > { %s212_s12 = scalar_select %p211_p7, %s2678_s22, 1 }
  0x1d   : > { %218 = sbr.rel (%p1388_p2) target bundleno = 258 (0x102), region = 48  ;;  %s2720_s18 = sld [smem:[#allocation6]] (!%p1388_p2) }
  0x1e   : > { %s1395_s13 = sshll.u32 %s212_s12, 3  ;;  %s2722_s20 = sshll.u32 (!%p1388_p2), %s2627_s19, 4  ;;  %s236_s20 = int_to_ptr.vmem [resolvable:$true] %s2722_s20 }
  0x1f   : > { %s2725_s23 = sld [smem:[#allocation4 + $0x1]] (!%p1388_p2)  ;;  %s2628_s25 = smov (!%p1388_p2), [#allocation2 + $0x1]  }
  0x20   : > { %s2716_s16 = scalar_lea.vmem %s3592_s5, %s1395_s13  ;;  %s2727_s24 = sld [smem:[#allocation6 + $0x1]] (!%p1388_p2) }
  0x21   : > { %s2729_s26 = sshll.u32 (!%p1388_p2), %s2628_s25, 4  ;;  %s2731_s27 = sld [smem:[#allocation4 + $0x2]] (!%p1388_p2)  ;;  %s276_s26 = int_to_ptr.vmem [resolvable:$true] %s2729_s26 }
  0x22   : > { %s2734_s28 = sld [smem:[#allocation6 + $0x2]]  ;;  %s225_s7 = scalar_lea.hbm %s3578_s3, %s219_s17 }
  0x23   : > { %p1599_p8 = scmp.lt.s32.totalorder %s2720_s18, 0  ;;  %s233_s8 = sshll.u32 %s225_s7, 4  ;;  %s234_s8 = int_to_ptr.hbm [resolvable:$true] %s233_s8 }
  0x24   : > { %p1397_p9 = scmp.ge.s32.totalorder %s2720_s18, 0  ;;  %s1696_s9 = sshra.s32 %s234_s8, 4  ;;  %s1697_s9 = int_to_ptr.hbm [resolvable:$true] %s1696_s9 }
  0x25   : > { %s1698_s10 = scalar_lea.hbm %s1697_s9, 1  ;;  %s2746_s13 = scalar_lea.hbm %s3578_s3, 64 }
  0x26   : > { %p1699_p10 = scmp.ne.s32.totalorder %s1697_s9, %s1698_s10  ;;  %p1703_p13 = scmp.lt.s32.totalorder %s1697_s9, %s3578_s3 }
  0x27   : > { %p1704_p0 = scmp.lt.s32.totalorder %s2746_s13, %s1698_s10 }
  0x28   : > { %p1700_p11 = pnand %p1699_p10, %p1599_p8 }
  0x29   : > { %p1705_p1 = por %p1704_p0, %p1703_p13 }
  0x2a   : > { %p1701_p12 = pneg %p1700_p11 }
  0x2c   : > { %p1706_p2 = pnand %p1705_p1, %p1701_p12 }
  0x2e   : > { %1709 = shalt.err (!%p1706_p2)  }
  0x2f   : > { %1520 = dma.hbm_to_vmem [thread:$0]  (%p1599_p8), %s234_s8, 16, %s236_s20, [#allocation3] }
  0x30   : > { %s243_s25 = scalar_lea.hbm %s3579_s4, %s2720_s18  ;;  %p1601_p3 = scmp.lt.s32.totalorder %s2727_s24, 0 }
  0x31   : > { %s251_s29 = sshll.u32 %s243_s25, 4  ;;  %s263_s9 = scalar_lea.hbm %s3578_s3, %s2725_s23  ;;  %s252_s29 = int_to_ptr.hbm [resolvable:$true] %s251_s29 }
  0x32   : > { %s273_s10 = sshll.u32 %s263_s9, 4  ;;  %s1724_s11 = sshra.s32 %s252_s29, 4  ;;  %s1725_s11 = int_to_ptr.hbm [resolvable:$true] %s1724_s11  ;;  %s274_s10 = int_to_ptr.hbm [resolvable:$true] %s273_s10 }
  0x33   : > { %s1726_s12 = scalar_lea.hbm %s1725_s11, 1  ;;  %s2770_s15 = scalar_lea.hbm %s3579_s4, 8 }
  0x34   : > { %p1727_p4 = scmp.ne.s32.totalorder %s1725_s11, %s1726_s12  ;;  %p1731_p7 = scmp.lt.s32.totalorder %s1725_s11, %s3579_s4 }
  0x35   : > { %p1732_p8 = scmp.lt.s32.totalorder %s2770_s15, %s1726_s12 }
  0x36   : > { %p1728_p5 = pnand %p1727_p4, %p1397_p9 }
  0x37   : > { %p1733_p10 = por %p1732_p8, %p1731_p7 }
  0x38   : > { %p1729_p6 = pneg %p1728_p5 }
  0x3a   : > { %p1734_p11 = pnand %p1733_p10, %p1729_p6 }
  0x3c   : > { %1737 = shalt.err (!%p1734_p11)  }
  0x3d   : > { %1522 = dma.hbm_to_vmem [thread:$0]  (%p1397_p9), %s252_s29, 16, %s236_s20, [#allocation3] }
  0x3e   : > { %p1401_p12 = scmp.ge.s32.totalorder %s2727_s24, 0  ;;  %s1752_s23 = sshra.s32 %s274_s10, 4  ;;  %s1753_s23 = int_to_ptr.hbm [resolvable:$true] %s1752_s23 }
  0x3f   : > { %s1754_s25 = scalar_lea.hbm %s1753_s23, 1  ;;  %p1759_p2 = scmp.lt.s32.totalorder %s1753_s23, %s3578_s3 }
  0x40   : > { %p1755_p13 = scmp.ne.s32.totalorder %s1753_s23, %s1754_s25  ;;  %p1760_p4 = scmp.lt.s32.totalorder %s2746_s13, %s1754_s25 }
  0x42   : > { %p1756_p0 = pnand %p1755_p13, %p1601_p3  ;;  %p1761_p5 = por %p1760_p4, %p1759_p2 }
  0x44   : > { %p1757_p1 = pneg %p1756_p0 }
  0x46   : > { %p1762_p6 = pnand %p1761_p5, %p1757_p1 }
  0x48   : > { %1765 = shalt.err (!%p1762_p6)  }
  0x49   : > { %1524 = dma.hbm_to_vmem [thread:$0]  (%p1601_p3), %s274_s10, 16, %s276_s26, [#allocation3 + $0x1] }
  0x4a   : > { %s283_s29 = scalar_lea.hbm %s3579_s4, %s2727_s24  ;;  %p1603_p9 = scmp.lt.s32.totalorder %s2734_s28, 0 }
  0x4b   : > { %s293_s9 = sshll.u32 %s283_s29, 4  ;;  %s305_s8 = scalar_lea.hbm %s3578_s3, %s2731_s27  ;;  %s294_s9 = int_to_ptr.hbm [resolvable:$true] %s293_s9 }
  0x4c   : > { %s2800_s14 = sshll.u32 %s305_s8, 4  ;;  %s1780_s17 = sshra.s32 %s294_s9, 4  ;;  %s1781_s17 = int_to_ptr.hbm [resolvable:$true] %s1780_s17  ;;  %s316_s14 = int_to_ptr.hbm [resolvable:$true] %s2800_s14 }
  0x4d   : > { %s1782_s19 = scalar_lea.hbm %s1781_s17, 1  ;;  %p1787_p10 = scmp.lt.s32.totalorder %s1781_s17, %s3579_s4 }
  0x4e   : > { %p1783_p7 = scmp.ne.s32.totalorder %s1781_s17, %s1782_s19  ;;  %p1788_p11 = scmp.lt.s32.totalorder %s2770_s15, %s1782_s19 }
  0x50   : > { %p1784_p8 = pnand %p1783_p7, %p1401_p12  ;;  %p1789_p13 = por %p1788_p11, %p1787_p10 }
  0x52   : > { %p1785_p3 = pneg %p1784_p8 }
  0x54   : > { %p1790_p0 = pnand %p1789_p13, %p1785_p3 }
  0x56   : > { %1793 = shalt.err (!%p1790_p0)  }
  0x57   : > { %1526 = dma.hbm_to_vmem [thread:$0]  (%p1401_p12), %s294_s9, 16, %s276_s26, [#allocation3 + $0x1] }
  0x58   : > { %s2629_s27 = smov [#allocation2 + $0x2]   ;;  %p1405_p1 = scmp.ge.s32.totalorder %s2734_s28, 0 }
  0x59   : > { %s2813_s25 = sshll.u32 %s2629_s27, 4  ;;  %s1808_s30 = sshra.s32 %s316_s14, 4  ;;  %s318_s25 = int_to_ptr.vmem [resolvable:$true] %s2813_s25  ;;  %s1809_s30 = int_to_ptr.hbm [resolvable:$true] %s1808_s30 }
  0x5a   : > { %s1810_s7 = scalar_lea.hbm %s1809_s30, 1  ;;  %p1815_p6 = scmp.lt.s32.totalorder %s1809_s30, %s3578_s3 }
  0x5b   : > { %p1811_p2 = scmp.ne.s32.totalorder %s1809_s30, %s1810_s7  ;;  %p1816_p7 = scmp.lt.s32.totalorder %s2746_s13, %s1810_s7 }
  0x5d   : > { %p1812_p4 = pnand %p1811_p2, %p1603_p9  ;;  %p1817_p12 = por %p1816_p7, %p1815_p6 }
  0x5f   : > { %p1813_p5 = pneg %p1812_p4 }
  0x61   : > { %p1818_p8 = pnand %p1817_p12, %p1813_p5 }
  0x63   : > { %1821 = shalt.err (!%p1818_p8)  }
  0x64   : > { %1528 = dma.hbm_to_vmem [thread:$0]  (%p1603_p9), %s316_s14, 16, %s318_s25, [#allocation3 + $0x2] }
  0x65   : > { %s325_s29 = scalar_lea.hbm %s3579_s4, %s2734_s28  ;;  %s1407_s9 = sld [smem:[#allocation4 + $0x3]] }
  0x66   : > { %s335_s11 = sshll.u32 %s325_s29, 4  ;;  %s2831_s12 = sld [smem:[#allocation6 + $0x3]]  ;;  %s336_s11 = int_to_ptr.hbm [resolvable:$true] %s335_s11 }
  0x67   : > { %s1836_s8 = sshra.s32 %s336_s11, 4  ;;  %s1837_s8 = int_to_ptr.hbm [resolvable:$true] %s1836_s8 }
  0x68   : > { %s1838_s17 = scalar_lea.hbm %s1837_s8, 1  ;;  %p1843_p9 = scmp.lt.s32.totalorder %s1837_s8, %s3579_s4 }
  0x69   : > { %p1839_p3 = scmp.ne.s32.totalorder %s1837_s8, %s1838_s17  ;;  %p1844_p13 = scmp.lt.s32.totalorder %s2770_s15, %s1838_s17 }
  0x6b   : > { %p1840_p10 = pnand %p1839_p3, %p1405_p1  ;;  %p1845_p0 = por %p1844_p13, %p1843_p9 }
  0x6d   : > { %p1841_p11 = pneg %p1840_p10 }
  0x6f   : > { %p1846_p2 = pnand %p1845_p0, %p1841_p11 }
  0x71   : > { %1849 = shalt.err (!%p1846_p2)  }
  0x72   : > { %1530 = dma.hbm_to_vmem [thread:$0]  (%p1405_p1), %s336_s11, 16, %s318_s25, [#allocation3 + $0x2] }
  0x73   : > { %s2630_s14 = smov [#allocation2 + $0x3]   ;;  %s1411_s27 = sld [smem:[#allocation4 + $0x4]] }
  0x74   : > { %s2843_s23 = sshll.u32 %s2630_s14, 4  ;;  %s2846_s30 = sld [smem:[#allocation6 + $0x4]]  ;;  %s360_s23 = int_to_ptr.vmem [resolvable:$true] %s2843_s23 }
  0x75   : > { %s347_s18 = scalar_lea.hbm %s3578_s3, %s1407_s9  ;;  %p1605_p4 = scmp.lt.s32.totalorder %s2831_s12, 0 }
  0x76   : > { %s357_s28 = sshll.u32 %s347_s18, 4  ;;  %p1409_p5 = scmp.ge.s32.totalorder %s2831_s12, 0  ;;  %s358_s28 = int_to_ptr.hbm [resolvable:$true] %s357_s28 }
  0x77   : > { %s1864_s26 = sshra.s32 %s358_s28, 4  ;;  %s1865_s26 = int_to_ptr.hbm [resolvable:$true] %s1864_s26 }
  0x78   : > { %s1866_s25 = scalar_lea.hbm %s1865_s26, 1  ;;  %p1871_p12 = scmp.lt.s32.totalorder %s1865_s26, %s3578_s3 }
  0x79   : > { %p1867_p1 = scmp.ne.s32.totalorder %s1865_s26, %s1866_s25  ;;  %p1872_p8 = scmp.lt.s32.totalorder %s2746_s13, %s1866_s25 }
  0x7b   : > { %p1868_p6 = pnand %p1867_p1, %p1605_p4  ;;  %p1873_p3 = por %p1872_p8, %p1871_p12 }
  0x7d   : > { %p1869_p7 = pneg %p1868_p6 }
  0x7f   : > { %p1874_p10 = pnand %p1873_p3, %p1869_p7 }
  0x81   : > { %1877 = shalt.err (!%p1874_p10)  }
  0x82   : > { %1532 = dma.hbm_to_vmem [thread:$0]  (%p1605_p4), %s358_s28, 16, %s360_s23, [#allocation3 + $0x3] }
  0x83   : > { %s367_s8 = scalar_lea.hbm %s3579_s4, %s2831_s12  ;;  %s389_s10 = scalar_lea.hbm %s3578_s3, %s1411_s27 }
  0x84   : > { %s377_s14 = sshll.u32 %s367_s8, 4  ;;  %p1607_p11 = scmp.lt.s32.totalorder %s2846_s30, 0  ;;  %s378_s14 = int_to_ptr.hbm [resolvable:$true] %s377_s14 }
  0x85   : > { %s2871_s7 = sshll.u32 %s389_s10, 4  ;;  %s1892_s24 = sshra.s32 %s378_s14, 4  ;;  %s1893_s24 = int_to_ptr.hbm [resolvable:$true] %s1892_s24  ;;  %s400_s7 = int_to_ptr.hbm [resolvable:$true] %s2871_s7 }
  0x86   : > { %s1894_s18 = scalar_lea.hbm %s1893_s24, 1  ;;  %p1899_p2 = scmp.lt.s32.totalorder %s1893_s24, %s3579_s4 }
  0x87   : > { %p1895_p9 = scmp.ne.s32.totalorder %s1893_s24, %s1894_s18  ;;  %p1900_p4 = scmp.lt.s32.totalorder %s2770_s15, %s1894_s18 }
  0x89   : > { %p1896_p13 = pnand %p1895_p9, %p1409_p5  ;;  %p1901_p1 = por %p1900_p4, %p1899_p2 }
  0x8b   : > { %p1897_p0 = pneg %p1896_p13 }
  0x8d   : > { %p1902_p6 = pnand %p1901_p1, %p1897_p0 }
  0x8f   : > { %1905 = shalt.err (!%p1902_p6)  }
  0x90   : > { %1534 = dma.hbm_to_vmem [thread:$0]  (%p1409_p5), %s378_s14, 16, %s360_s23, [#allocation3 + $0x3]  ;;  %v2632_v0 = vmov 0.0  }
  0x91   : > { %s2631_s27 = smov [#allocation2 + $0x4]   ;;  %p1413_p7 = scmp.ge.s32.totalorder %s2846_s30, 0  ;;  %551 = vst [vmem:[%s3581_s6] sm:$0x3] %v2632_v0 }
  0x92   : > { %s2884_s25 = sshll.u32 %s2631_s27, 4  ;;  %s1920_s12 = sshra.s32 %s400_s7, 4  ;;  %s402_s25 = int_to_ptr.vmem [resolvable:$true] %s2884_s25  ;;  %s1921_s12 = int_to_ptr.hbm [resolvable:$true] %s1920_s12 }
  0x93   : > { %s1922_s9 = scalar_lea.hbm %s1921_s12, 1  ;;  %p1927_p5 = scmp.lt.s32.totalorder %s1921_s12, %s3578_s3 }
  0x94   : > { %p1923_p12 = scmp.ne.s32.totalorder %s1921_s12, %s1922_s9  ;;  %p1928_p10 = scmp.lt.s32.totalorder %s2746_s13, %s1922_s9 }
  0x96   : > { %p1924_p8 = pnand %p1923_p12, %p1607_p11  ;;  %p1929_p9 = por %p1928_p10, %p1927_p5 }
  0x98   : > { %p1925_p3 = pneg %p1924_p8 }
  0x9a   : > { %p1930_p13 = pnand %p1929_p9, %p1925_p3 }
  0x9c   : > { %1933 = shalt.err (!%p1930_p13)  }
  0x9d   : > { %1536 = dma.hbm_to_vmem [thread:$0]  (%p1607_p11), %s400_s7, 16, %s402_s25, [#allocation3 + $0x4] }
  0x9e   : > { %s409_s19 = scalar_lea.hbm %s3579_s4, %s2846_s30  ;;  %s1415_s10 = sld [smem:[#allocation4 + $0x5]] }
  0x9f   : > { %s419_s14 = sshll.u32 %s409_s19, 4  ;;  %s2905_s24 = sld [smem:[#allocation6 + $0x5]]  ;;  %s420_s14 = int_to_ptr.hbm [resolvable:$true] %s419_s14 }
  0xa0   : > { %s1948_s18 = sshra.s32 %s420_s14, 4  ;;  %s1949_s18 = int_to_ptr.hbm [resolvable:$true] %s1948_s18 }
  0xa1   : > { %s1950_s28 = scalar_lea.hbm %s1949_s18, 1  ;;  %p1955_p11 = scmp.lt.s32.totalorder %s1949_s18, %s3579_s4 }
  0xa2   : > { %p1951_p0 = scmp.ne.s32.totalorder %s1949_s18, %s1950_s28  ;;  %p1956_p1 = scmp.lt.s32.totalorder %s2770_s15, %s1950_s28 }
  0xa4   : > { %p1952_p2 = pnand %p1951_p0, %p1413_p7  ;;  %p1957_p6 = por %p1956_p1, %p1955_p11 }
  0xa6   : > { %p1953_p4 = pneg %p1952_p2 }
  0xa8   : > { %p1958_p12 = pnand %p1957_p6, %p1953_p4 }
  0xaa   : > { %1961 = shalt.err (!%p1958_p12)  }
  0xab   : > { %1538 = dma.hbm_to_vmem [thread:$0]  (%p1413_p7), %s420_s14, 16, %s402_s25, [#allocation3 + $0x4] }
  0xac   : > { %s2633_s7 = smov [#allocation2 + $0x5]   ;;  %s1419_s29 = sld [smem:[#allocation4 + $0x6]] }
  0xad   : > { %s2917_s20 = sshll.u32 %s2633_s7, 4  ;;  %s2920_s12 = sld [smem:[#allocation6 + $0x6]]  ;;  %s444_s20 = int_to_ptr.vmem [resolvable:$true] %s2917_s20 }
  0xae   : > { %s431_s11 = scalar_lea.hbm %s3578_s3, %s1415_s10  ;;  %p1609_p8 = scmp.lt.s32.totalorder %s2905_s24, 0 }
  0xaf   : > { %s441_s30 = sshll.u32 %s431_s11, 4  ;;  %p1417_p3 = scmp.ge.s32.totalorder %s2905_s24, 0  ;;  %s442_s30 = int_to_ptr.hbm [resolvable:$true] %s441_s30 }
  0xb0   : > { %s1976_s8 = sshra.s32 %s442_s30, 4  ;;  %s1977_s8 = int_to_ptr.hbm [resolvable:$true] %s1976_s8 }
  0xb1   : > { %s1978_s25 = scalar_lea.hbm %s1977_s8, 1  ;;  %p1983_p9 = scmp.lt.s32.totalorder %s1977_s8, %s3578_s3 }
  0xb2   : > { %p1979_p7 = scmp.ne.s32.totalorder %s1977_s8, %s1978_s25  ;;  %p1984_p13 = scmp.lt.s32.totalorder %s2746_s13, %s1978_s25 }
  0xb4   : > { %p1980_p5 = pnand %p1979_p7, %p1609_p8  ;;  %p1985_p0 = por %p1984_p13, %p1983_p9 }
  0xb6   : > { %p1981_p10 = pneg %p1980_p5 }
  0xb8   : > { %p1986_p2 = pnand %p1985_p0, %p1981_p10 }
  0xba   : > { %1989 = shalt.err (!%p1986_p2)  }
  0xbb   : > { %1540 = dma.hbm_to_vmem [thread:$0]  (%p1609_p8), %s442_s30, 16, %s444_s20, [#allocation3 + $0x5] }
  0xbc   : > { %s451_s18 = scalar_lea.hbm %s3579_s4, %s2905_s24  ;;  %s473_s27 = scalar_lea.hbm %s3578_s3, %s1419_s29 }
  0xbd   : > { %s461_s7 = sshll.u32 %s451_s18, 4  ;;  %p1611_p4 = scmp.lt.s32.totalorder %s2920_s12, 0  ;;  %s462_s7 = int_to_ptr.hbm [resolvable:$true] %s461_s7 }
  0xbe   : > { %s2945_s9 = sshll.u32 %s473_s27, 4  ;;  %s2004_s23 = sshra.s32 %s462_s7, 4  ;;  %s2005_s23 = int_to_ptr.hbm [resolvable:$true] %s2004_s23  ;;  %s484_s9 = int_to_ptr.hbm [resolvable:$true] %s2945_s9 }
  0xbf   : > { %s2006_s11 = scalar_lea.hbm %s2005_s23, 1  ;;  %p2011_p12 = scmp.lt.s32.totalorder %s2005_s23, %s3579_s4 }
  0xc0   : > { %p2007_p11 = scmp.ne.s32.totalorder %s2005_s23, %s2006_s11  ;;  %p2012_p8 = scmp.lt.s32.totalorder %s2770_s15, %s2006_s11 }
  0xc2   : > { %p2008_p1 = pnand %p2007_p11, %p1417_p3  ;;  %p2013_p7 = por %p2012_p8, %p2011_p12 }
  0xc4   : > { %p2009_p6 = pneg %p2008_p1 }
  0xc6   : > { %p2014_p5 = pnand %p2013_p7, %p2009_p6 }
  0xc8   : > { %2017 = shalt.err (!%p2014_p5)  }
  0xc9   : > { %1542 = dma.hbm_to_vmem [thread:$0]  (%p1417_p3), %s462_s7, 16, %s444_s20, [#allocation3 + $0x5] }
  0xca   : > { %s2634_s29 = smov [#allocation2 + $0x6]   ;;  %p1421_p10 = scmp.ge.s32.totalorder %s2920_s12, 0 }
  0xcb   : > { %s2958_s25 = sshll.u32 %s2634_s29, 4  ;;  %s2032_s17 = sshra.s32 %s484_s9, 4  ;;  %s486_s25 = int_to_ptr.vmem [resolvable:$true] %s2958_s25  ;;  %s2033_s17 = int_to_ptr.hbm [resolvable:$true] %s2032_s17 }
  0xcc   : > { %s2034_s19 = scalar_lea.hbm %s2033_s17, 1  ;;  %p2039_p2 = scmp.lt.s32.totalorder %s2033_s17, %s3578_s3 }
  0xcd   : > { %p2035_p9 = scmp.ne.s32.totalorder %s2033_s17, %s2034_s19  ;;  %p2040_p11 = scmp.lt.s32.totalorder %s2746_s13, %s2034_s19 }
  0xcf   : > { %p2036_p13 = pnand %p2035_p9, %p1611_p4  ;;  %p2041_p3 = por %p2040_p11, %p2039_p2 }
  0xd1   : > { %p2037_p0 = pneg %p2036_p13 }
  0xd3   : > { %p2042_p1 = pnand %p2041_p3, %p2037_p0 }
  0xd5   : > { %2045 = shalt.err (!%p2042_p1)  }
  0xd6   : > { %1544 = dma.hbm_to_vmem [thread:$0]  (%p1611_p4), %s484_s9, 16, %s486_s25, [#allocation3 + $0x6] }
  0xd7   : > { %s493_s18 = scalar_lea.hbm %s3579_s4, %s2920_s12  ;;  %s1423_s28 = sld [smem:[#allocation4 + $0x7]] }
  0xd8   : > { %s503_s26 = sshll.u32 %s493_s18, 4  ;;  %s2976_s27 = sld [smem:[#allocation6 + $0x7]]  ;;  %s504_s26 = int_to_ptr.hbm [resolvable:$true] %s503_s26 }
  0xd9   : > { %s2060_s7 = sshra.s32 %s504_s26, 4  ;;  %s2061_s7 = int_to_ptr.hbm [resolvable:$true] %s2060_s7 }
  0xda   : > { %s2062_s23 = scalar_lea.hbm %s2061_s7, 1  ;;  %p2067_p4 = scmp.lt.s32.totalorder %s2061_s7, %s3579_s4 }
  0xdb   : > { %p2063_p6 = scmp.ne.s32.totalorder %s2061_s7, %s2062_s23  ;;  %p2068_p7 = scmp.lt.s32.totalorder %s2770_s15, %s2062_s23 }
  0xdd   : > { %p2064_p12 = pnand %p2063_p6, %p1421_p10  ;;  %p2069_p5 = por %p2068_p7, %p2067_p4 }
  0xdf   : > { %p2065_p8 = pneg %p2064_p12 }
  0xe1   : > { %p2070_p9 = pnand %p2069_p5, %p2065_p8 }
  0xe3   : > { %2073 = shalt.err (!%p2070_p9)  }
  0xe4   : > { %1546 = dma.hbm_to_vmem [thread:$0]  (%p1421_p10), %s504_s26, 16, %s486_s25, [#allocation3 + $0x6] }
  0xe5   : > { %s2635_s9 = smov [#allocation2 + $0x7]   ;;  %s515_s19 = scalar_lea.hbm %s3578_s3, %s1423_s28 }
  0xe6   : > { %s2988_s8 = sshll.u32 %s2635_s9, 4  ;;  %p1613_p13 = scmp.lt.s32.totalorder %s2976_s27, 0  ;;  %s528_s8 = int_to_ptr.vmem [resolvable:$true] %s2988_s8 }
  0xe7   : > { %s525_s24 = sshll.u32 %s515_s19, 4  ;;  %p1425_p0 = scmp.ge.s32.totalorder %s2976_s27, 0  ;;  %s526_s24 = int_to_ptr.hbm [resolvable:$true] %s525_s24 }
  0xe8   : > { %s2088_s12 = sshra.s32 %s526_s24, 4  ;;  %s2089_s12 = int_to_ptr.hbm [resolvable:$true] %s2088_s12 }
  0xe9   : > { %s2090_s10 = scalar_lea.hbm %s2089_s12, 1  ;;  %p2095_p3 = scmp.lt.s32.totalorder %s2089_s12, %s3578_s3 }
  0xea   : > { %p2091_p2 = scmp.ne.s32.totalorder %s2089_s12, %s2090_s10  ;;  %p2096_p1 = scmp.lt.s32.totalorder %s2746_s13, %s2090_s10 }
  0xec   : > { %p2092_p10 = pnand %p2091_p2, %p1613_p13  ;;  %p2097_p6 = por %p2096_p1, %p2095_p3 }
  0xee   : > { %p2093_p11 = pneg %p2092_p10 }
  0xf0   : > { %p2098_p12 = pnand %p2097_p6, %p2093_p11 }
  0xf2   : > { %2101 = shalt.err (!%p2098_p12)  }
  0xf3   : > { %1548 = dma.hbm_to_vmem [thread:$0]  (%p1613_p13), %s526_s24, 16, %s528_s8, [#allocation3 + $0x7] }
  0xf4   : > { %s535_s28 = scalar_lea.hbm %s3579_s4, %s2976_s27 }
  0xf5   : > { %s545_s26 = sshll.u32 %s535_s28, 4  ;;  %s546_s26 = int_to_ptr.hbm [resolvable:$true] %s545_s26 }
  0xf6   : > { %s2116_s7 = sshra.s32 %s546_s26, 4  ;;  %s2117_s7 = int_to_ptr.hbm [resolvable:$true] %s2116_s7 }
  0xf7   : > { %s2118_s13 = scalar_lea.hbm %s2117_s7, 1  ;;  %p2123_p5 = scmp.lt.s32.totalorder %s2117_s7, %s3579_s4 }
  0xf8   : > { %p2119_p8 = scmp.ne.s32.totalorder %s2117_s7, %s2118_s13  ;;  %p2124_p9 = scmp.lt.s32.totalorder %s2770_s15, %s2118_s13 }
  0xfa   : > { %p2120_p4 = pnand %p2119_p8, %p1425_p0  ;;  %p2125_p2 = por %p2124_p9, %p2123_p5 }
  0xfc   : > { %p2121_p7 = pneg %p2120_p4 }
  0xfe   : > { %p2126_p13 = pnand %p2125_p2, %p2121_p7 }
 0x100   : > { %2129 = shalt.err (!%p2126_p13)  }
 0x101   : > { %1550 = dma.hbm_to_vmem [thread:$0]  (%p1425_p0), %s546_s26, 16, %s528_s8, [#allocation3 + $0x7] }
 0x102 PF: > { %p552_p10 = scmp.lt.s32.totalorder %s2678_s22, 0  ;;  %s553_s30 = ssub.s32 0, %s2678_s22 }
 0x103   : > { %s1427_s9 = smin.u32 %s2678_s22, %s553_s30  ;;  %s564_s29 = sadd.s32 1, %s2678_s22 }
 0x104   : > { %s555_s17 = sand.u32 1, %s1427_s9   ;;  %p1430_p3 = scmp.ge.s32.totalorder %s564_s29, 2 }
 0x105   : > { %s556_s19 = ssub.s32 0, %s555_s17  ;;  %s1505_s8 = sshll.u32 (!%p1430_p3), %s2678_s22, 3 }
 0x106   : > { %s3614_s19 = smov (!%p552_p10, %s556_s19), %s555_s17  ;;  %568 = sbr.rel (%p1430_p3) target bundleno = 646 (0x286), region = 180 }
 0x107   : > { %p1429_p11 = scmp.lt.s32.totalorder %s3614_s19, 0  ;;  %s562_s15 = sadd.s32 2, %s3614_s19 }
 0x108   : > { %s3028_s24 = sadd.s32 (!%p1430_p3), 8, %s1505_s8 }
 0x109   : > { %s3616_s15 = smov (!%p1429_p11, %s562_s15), %s3614_s19  ;;  %s571_s10 = sld [smem:[#allocation4 + %s3028_s24]] (!%p1430_p3) }
 0x10a   : > { %s569_s27 = ssub.s32 (!%p1430_p3), 1, %s3616_s15  ;;  %s3032_s25 = sld [smem:[#allocation6 + %s3028_s24]] (!%p1430_p3) }
 0x10b   : > { %s1433_s12 = sshll.u32 %s569_s27, 3  ;;  %s615_s18 = sadd.s32 1, %s3028_s24 }
 0x10c   : > { %s3034_s20 = scalar_lea.vmem [#allocation2], %s1433_s12  ;;  %s3040_s28 = sld [smem:[#allocation4 + %s615_s18]] }
 0x10d   : > { %s590_s14 = sshll.u32 %s3034_s20, 4  ;;  %s3042_s26 = sld [smem:[#allocation6 + %s615_s18]]  ;;  %s3038_s14 = int_to_ptr.vmem [resolvable:$true] %s590_s14 }
 0x10e   : > { %s1220_s7 = scalar_lea.vmem %s3034_s20, 1 [#allocation2]  ;;  %s3045_s13 = scalar_lea.sflag [#allocation3], %s1433_s12 }
 0x10f   : > { %s636_s11 = sshll.u32 %s1220_s7, 4  ;;  %s577_s29 = scalar_lea.hbm %s3578_s3, %s571_s10  ;;  %s3051_s11 = int_to_ptr.vmem [resolvable:$true] %s636_s11 }
 0x110   : > { %p1615_p0 = scmp.lt.s32.totalorder %s3032_s25, 0  ;;  %s3054_s17 = sshll.u32 %s577_s29, 4  ;;  %s589_s17 = int_to_ptr.hbm [resolvable:$true] %s3054_s17 }
 0x111   : > { %p1432_p1 = scmp.ge.s32.totalorder %s3032_s25, 0  ;;  %s2144_s19 = sshra.s32 %s589_s17, 4  ;;  %s2145_s19 = int_to_ptr.hbm [resolvable:$true] %s2144_s19 }
 0x112   : > { %s2146_s27 = scalar_lea.hbm %s2145_s19, 1  ;;  %s3063_s18 = scalar_lea.hbm %s3578_s3, 64 }
 0x113   : > { %p2147_p6 = scmp.ne.s32.totalorder %s2145_s19, %s2146_s27  ;;  %p2151_p4 = scmp.lt.s32.totalorder %s2145_s19, %s3578_s3 }
 0x114   : > { %p2152_p7 = scmp.lt.s32.totalorder %s3063_s18, %s2146_s27 }
 0x115   : > { %p2148_p12 = pnand %p2147_p6, %p1615_p0 }
 0x116   : > { %p2153_p5 = por %p2152_p7, %p2151_p4 }
 0x117   : > { %p2149_p8 = pneg %p2148_p12 }
 0x119   : > { %p2154_p9 = pnand %p2153_p5, %p2149_p8 }
 0x11b   : > { %2157 = shalt.err (!%p2154_p9)  }
 0x11c   : > { %s2158_s30 = sshra.s32 %s3038_s14, 4  ;;  %s2636_s8 = smov [#allocation2]   ;;  %s2159_s30 = int_to_ptr.vmem [resolvable:$true] %s2158_s30 }
 0x11d   : > { %s2160_s9 = scalar_lea.vmem %s2159_s30, 1  ;;  %s3078_s19 = scalar_lea.vmem %s2636_s8, 16 }
 0x11e   : > { %p3070_p2 = scmp.ne.s32.totalorder %s2159_s30, %s2160_s9  ;;  %p2165_p11 = scmp.lt.s32.totalorder %s2159_s30, [#allocation2] }
 0x11f   : > { %p2166_p3 = scmp.lt.s32.totalorder %s3078_s19, %s2160_s9 }
 0x120   : > { %p2162_p13 = pnand %p3070_p2, %p1615_p0 }
 0x121   : > { %p3081_p6 = por %p2166_p3, %p2165_p11 }
 0x122   : > { %p2163_p10 = pneg %p2162_p13 }
 0x124   : > { %p2168_p12 = pnand %p3081_p6, %p2163_p10 }
 0x126   : > { %2171 = shalt.err (!%p2168_p12)  }
 0x127   : > { %1552 = dma.hbm_to_vmem [thread:$0]  (%p1615_p0), %s589_s17, 16, %s3038_s14, %s3045_s13 }
 0x128   : > { %s598_s7 = scalar_lea.hbm %s3579_s4, %s3032_s25  ;;  %p1617_p8 = scmp.lt.s32.totalorder %s3042_s26, 0 }
 0x129   : > { %s609_s30 = sshll.u32 %s598_s7, 4  ;;  %s622_s23 = scalar_lea.hbm %s3578_s3, %s3040_s28  ;;  %s610_s30 = int_to_ptr.hbm [resolvable:$true] %s609_s30 }
 0x12a   : > { %s3100_s0 = sshll.u32 %s622_s23, 4  ;;  %s2172_s1 = sshra.s32 %s610_s30, 4  ;;  %s2173_s1 = int_to_ptr.hbm [resolvable:$true] %s2172_s1  ;;  %s635_s0 = int_to_ptr.hbm [resolvable:$true] %s3100_s0 }
 0x12b   : > { %s2174_s2 = scalar_lea.hbm %s2173_s1, 1  ;;  %s3107_s12 = scalar_lea.hbm %s3579_s4, 8 }
 0x12c   : > { %p2175_p4 = scmp.ne.s32.totalorder %s2173_s1, %s2174_s2  ;;  %p2179_p5 = scmp.lt.s32.totalorder %s2173_s1, %s3579_s4 }
 0x12d   : > { %p2180_p9 = scmp.lt.s32.totalorder %s3107_s12, %s2174_s2 }
 0x12e   : > { %p2176_p7 = pnand %p2175_p4, %p1432_p1 }
 0x12f   : > { %p2181_p13 = por %p2180_p9, %p2179_p5 }
 0x130   : > { %p2177_p0 = pneg %p2176_p7 }
 0x132   : > { %p2182_p10 = pnand %p2181_p13, %p2177_p0 }
 0x134   : > { %2185 = shalt.err (!%p2182_p10)  }
 0x135   : > { %p2190_p11 = pnand %p3070_p2, %p1432_p1 }
 0x137   : > { %p2191_p3 = pneg %p2190_p11 }
 0x139   : > { %p2196_p12 = pnand %p2191_p3, %p3081_p6 }
 0x13b   : > { %2199 = shalt.err (!%p2196_p12)  }
 0x13c   : > { %1554 = dma.hbm_to_vmem [thread:$0]  (%p1432_p1), %s610_s30, 16, %s3038_s14, %s3045_s13 }
 0x13d   : > { %p1436_p4 = scmp.ge.s32.totalorder %s3042_s26, 0  ;;  %s2200_s1 = sshra.s32 %s635_s0, 4  ;;  %s2201_s1 = int_to_ptr.hbm [resolvable:$true] %s2200_s1 }
 0x13e   : > { %s2202_s2 = scalar_lea.hbm %s2201_s1, 1  ;;  %p2207_p6 = scmp.lt.s32.totalorder %s2201_s1, %s3578_s3 }
 0x13f   : > { %p2203_p7 = scmp.ne.s32.totalorder %s2201_s1, %s2202_s2  ;;  %p2208_p5 = scmp.lt.s32.totalorder %s3063_s18, %s2202_s2 }
 0x141   : > { %p2204_p2 = pnand %p2203_p7, %p1617_p8  ;;  %p2209_p9 = por %p2208_p5, %p2207_p6 }
 0x143   : > { %p2205_p0 = pneg %p2204_p2 }
 0x145   : > { %p2210_p13 = pnand %p2209_p9, %p2205_p0 }
 0x147   : > { %2213 = shalt.err (!%p2210_p13)  }
 0x148   : > { %s2214_s25 = sshra.s32 %s3051_s11, 4  ;;  %s2215_s25 = int_to_ptr.vmem [resolvable:$true] %s2214_s25 }
 0x149   : > { %s2216_s14 = scalar_lea.vmem %s2215_s25, 1  ;;  %p2221_p3 = scmp.lt.s32.totalorder %s2215_s25, [#allocation2] }
 0x14a   : > { %p3132_p1 = scmp.ne.s32.totalorder %s2215_s25, %s2216_s14  ;;  %p2222_p12 = scmp.lt.s32.totalorder %s3078_s19, %s2216_s14 }
 0x14c   : > { %p2218_p10 = pnand %p3132_p1, %p1617_p8  ;;  %p3141_p7 = por %p2222_p12, %p2221_p3 }
 0x14e   : > { %p2219_p11 = pneg %p2218_p10 }
 0x150   : > { %p2224_p2 = pnand %p3141_p7, %p2219_p11 }
 0x152   : > { %2227 = shalt.err (!%p2224_p2)  }
 0x153   : > { %s3597_s27 = scalar_lea.sflag %s3045_s13, 1 [#allocation3]  ;;  %s644_s8 = scalar_lea.hbm %s3579_s4, %s3042_s26 }
 0x154   : > { %1556 = dma.hbm_to_vmem [thread:$0]  (%p1617_p8), %s635_s0, 16, %s3051_s11, %s3597_s27 }
 0x155   : > { %s662_s17 = sadd.s32 2, %s3028_s24  ;;  %s656_s10 = sshll.u32 %s644_s8, 4  ;;  %s657_s10 = int_to_ptr.hbm [resolvable:$true] %s656_s10 }
 0x156   : > { %s663_s7 = sld [smem:[#allocation4 + %s662_s17]]  ;;  %s2228_s2 = sshra.s32 %s657_s10, 4  ;;  %s2229_s2 = int_to_ptr.hbm [resolvable:$true] %s2228_s2 }
 0x157   : > { %s3157_s1 = sld [smem:[#allocation6 + %s662_s17]]  ;;  %s2230_s5 = scalar_lea.hbm %s2229_s2, 1 }
 0x158   : > { %p2231_p0 = scmp.ne.s32.totalorder %s2229_s2, %s2230_s5  ;;  %p2235_p8 = scmp.lt.s32.totalorder %s2229_s2, %s3579_s4 }
 0x159   : > { %p2236_p9 = scmp.lt.s32.totalorder %s3107_s12, %s2230_s5 }
 0x15a   : > { %p2232_p6 = pnand %p2231_p0, %p1436_p4 }
 0x15b   : > { %p2237_p13 = por %p2236_p9, %p2235_p8 }
 0x15c   : > { %p2233_p5 = pneg %p2232_p6 }
 0x15e   : > { %p2238_p10 = pnand %p2237_p13, %p2233_p5 }
 0x160   : > { %2241 = shalt.err (!%p2238_p10)  }
 0x161   : > { %p2246_p11 = pnand %p3132_p1, %p1436_p4 }
 0x163   : > { %p2247_p3 = pneg %p2246_p11 }
 0x165   : > { %p2252_p12 = pnand %p2247_p3, %p3141_p7 }
 0x167   : > { %2255 = shalt.err (!%p2252_p12)  }
 0x168   : > { %s3598_s0 = smov %s3597_s27  ;;  %s1234_s14 = scalar_lea.vmem %s3034_s20, 2 [#allocation2] }
 0x169   : > { %1558 = dma.hbm_to_vmem [thread:$0]  (%p1436_p4), %s657_s10, 16, %s3051_s11, %s3598_s0 }
 0x16a   : > { %s3582_s23 = scalar_lea.sflag %s3045_s13, 2 [#allocation3]  ;;  %s683_s27 = sshll.u32 %s1234_s14, 4  ;;  %s3179_s27 = int_to_ptr.vmem [resolvable:$true] %s683_s27 }
 0x16b   : > { %s709_s30 = sadd.s32 3, %s3028_s24  ;;  %s669_s8 = scalar_lea.hbm %s3578_s3, %s663_s7 }
 0x16c   : > { %s3181_s29 = sld [smem:[#allocation4 + %s709_s30]]  ;;  %p1619_p1 = scmp.lt.s32.totalorder %s3157_s1, 0 }
 0x16d   : > { %s3186_s17 = sld [smem:[#allocation6 + %s709_s30]]  ;;  %s681_s2 = sshll.u32 %s669_s8, 4  ;;  %s682_s2 = int_to_ptr.hbm [resolvable:$true] %s681_s2 }
 0x16e   : > { %p1442_p4 = scmp.ge.s32.totalorder %s3157_s1, 0  ;;  %s2256_s11 = sshra.s32 %s682_s2, 4  ;;  %s2257_s11 = int_to_ptr.hbm [resolvable:$true] %s2256_s11 }
 0x16f   : > { %s2258_s10 = scalar_lea.hbm %s2257_s11, 1  ;;  %p2263_p6 = scmp.lt.s32.totalorder %s2257_s11, %s3578_s3 }
 0x170   : > { %p2259_p7 = scmp.ne.s32.totalorder %s2257_s11, %s2258_s10  ;;  %p2264_p5 = scmp.lt.s32.totalorder %s3063_s18, %s2258_s10 }
 0x172   : > { %p2260_p2 = pnand %p2259_p7, %p1619_p1  ;;  %p2265_p8 = por %p2264_p5, %p2263_p6 }
 0x174   : > { %p2261_p0 = pneg %p2260_p2 }
 0x176   : > { %p2266_p9 = pnand %p2265_p8, %p2261_p0 }
 0x178   : > { %2269 = shalt.err (!%p2266_p9)  }
 0x179   : > { %s2270_s7 = sshra.s32 %s3179_s27, 4  ;;  %s2271_s7 = int_to_ptr.vmem [resolvable:$true] %s2270_s7 }
 0x17a   : > { %s2272_s25 = scalar_lea.vmem %s2271_s7, 1  ;;  %p2277_p3 = scmp.lt.s32.totalorder %s2271_s7, [#allocation2] }
 0x17b   : > { %p3197_p13 = scmp.ne.s32.totalorder %s2271_s7, %s2272_s25  ;;  %p2278_p12 = scmp.lt.s32.totalorder %s3078_s19, %s2272_s25 }
 0x17d   : > { %p2274_p10 = pnand %p3197_p13, %p1619_p1  ;;  %p3206_p7 = por %p2278_p12, %p2277_p3 }
 0x17f   : > { %p2275_p11 = pneg %p2274_p10 }
 0x181   : > { %p2280_p2 = pnand %p3206_p7, %p2275_p11 }
 0x183   : > { %2283 = shalt.err (!%p2280_p2)  }
 0x184   : > { %1560 = dma.hbm_to_vmem [thread:$0]  (%p1619_p1), %s682_s2, 16, %s3179_s27, %s3582_s23 }
 0x185   : > { %s691_s9 = scalar_lea.hbm %s3579_s4, %s3157_s1  ;;  %s1248_s8 = scalar_lea.vmem %s3034_s20, 3 [#allocation2] }
 0x186   : > { %s703_s11 = sshll.u32 %s691_s9, 4  ;;  %s716_s28 = scalar_lea.hbm %s3578_s3, %s3181_s29  ;;  %s704_s11 = int_to_ptr.hbm [resolvable:$true] %s703_s11 }
 0x187   : > { %p1621_p0 = scmp.lt.s32.totalorder %s3186_s17, 0  ;;  %s2284_s7 = sshra.s32 %s704_s11, 4  ;;  %s2285_s7 = int_to_ptr.hbm [resolvable:$true] %s2284_s7 }
 0x188   : > { %s2286_s25 = scalar_lea.hbm %s2285_s7, 1  ;;  %p2291_p1 = scmp.lt.s32.totalorder %s2285_s7, %s3579_s4 }
 0x189   : > { %p2287_p6 = scmp.ne.s32.totalorder %s2285_s7, %s2286_s25  ;;  %p2292_p9 = scmp.lt.s32.totalorder %s3107_s12, %s2286_s25 }
 0x18b   : > { %p2288_p5 = pnand %p2287_p6, %p1442_p4  ;;  %p2293_p10 = por %p2292_p9, %p2291_p1 }
 0x18d   : > { %p2289_p8 = pneg %p2288_p5 }
 0x18f   : > { %p2294_p11 = pnand %p2293_p10, %p2289_p8 }
 0x191   : > { %2297 = shalt.err (!%p2294_p11)  }
 0x192   : > { %p2302_p3 = pnand %p3197_p13, %p1442_p4 }
 0x194   : > { %p2303_p12 = pneg %p2302_p3 }
 0x196   : > { %p2308_p2 = pnand %p2303_p12, %p3206_p7 }
 0x198   : > { %2311 = shalt.err (!%p2308_p2)  }
 0x199   : > { %s3601_s29 = scalar_lea.sflag %s3045_s13, 2 [#allocation3]  ;;  %s1251_s23 = scalar_lea.sflag %s3045_s13, 3 [#allocation3] }
 0x19a   : > { %1562 = dma.hbm_to_vmem [thread:$0]  (%p1442_p4), %s704_s11, 16, %s3179_s27, %s3601_s29 }
 0x19b   : > { %s3245_s30 = sshll.u32 %s716_s28, 4  ;;  %s730_s0 = sshll.u32 %s1248_s8, 4  ;;  %s729_s30 = int_to_ptr.hbm [resolvable:$true] %s3245_s30  ;;  %s3248_s0 = int_to_ptr.vmem [resolvable:$true] %s730_s0 }
 0x19c   : > { %p1448_p13 = scmp.ge.s32.totalorder %s3186_s17, 0  ;;  %s2312_s14 = sshra.s32 %s729_s30, 4  ;;  %s2313_s14 = int_to_ptr.hbm [resolvable:$true] %s2312_s14 }
 0x19d   : > { %s2314_s1 = scalar_lea.hbm %s2313_s14, 1  ;;  %p2319_p4 = scmp.lt.s32.totalorder %s2313_s14, %s3578_s3 }
 0x19e   : > { %p2315_p7 = scmp.ne.s32.totalorder %s2313_s14, %s2314_s1  ;;  %p2320_p8 = scmp.lt.s32.totalorder %s3063_s18, %s2314_s1 }
 0x1a0   : > { %p2316_p6 = pnand %p2315_p7, %p1621_p0  ;;  %p2321_p1 = por %p2320_p8, %p2319_p4 }
 0x1a2   : > { %p2317_p5 = pneg %p2316_p6 }
 0x1a4   : > { %p2322_p9 = pnand %p2321_p1, %p2317_p5 }
 0x1a6   : > { %2325 = shalt.err (!%p2322_p9)  }
 0x1a7   : > { %s2326_s27 = sshra.s32 %s3248_s0, 4  ;;  %s2327_s27 = int_to_ptr.vmem [resolvable:$true] %s2326_s27 }
 0x1a8   : > { %s2328_s8 = scalar_lea.vmem %s2327_s27, 1  ;;  %p2333_p12 = scmp.lt.s32.totalorder %s2327_s27, [#allocation2] }
 0x1a9   : > { %p3258_p10 = scmp.ne.s32.totalorder %s2327_s27, %s2328_s8  ;;  %p2334_p2 = scmp.lt.s32.totalorder %s3078_s19, %s2328_s8 }
 0x1ab   : > { %p2330_p11 = pnand %p3258_p10, %p1621_p0  ;;  %p3267_p7 = por %p2334_p2, %p2333_p12 }
 0x1ad   : > { %p2331_p3 = pneg %p2330_p11 }
 0x1af   : > { %p2336_p6 = pnand %p3267_p7, %p2331_p3 }
 0x1b1   : > { %2339 = shalt.err (!%p2336_p6)  }
 0x1b2   : > { %1564 = dma.hbm_to_vmem [thread:$0]  (%p1621_p0), %s729_s30, 16, %s3248_s0, %s1251_s23 }
 0x1b3   : > { %s738_s7 = scalar_lea.hbm %s3579_s4, %s3186_s17  ;;  %s756_s25 = sadd.s32 4, %s3028_s24 }
 0x1b4   : > { %s750_s2 = sshll.u32 %s738_s7, 4  ;;  %s757_s29 = sld [smem:[#allocation4 + %s756_s25]]  ;;  %s751_s2 = int_to_ptr.hbm [resolvable:$true] %s750_s2 }
 0x1b5   : > { %s3283_s14 = sld [smem:[#allocation6 + %s756_s25]]  ;;  %s2340_s1 = sshra.s32 %s751_s2, 4  ;;  %s2341_s1 = int_to_ptr.hbm [resolvable:$true] %s2340_s1 }
 0x1b6   : > { %s2342_s26 = scalar_lea.hbm %s2341_s1, 1  ;;  %p2347_p0 = scmp.lt.s32.totalorder %s2341_s1, %s3579_s4 }
 0x1b7   : > { %p2343_p5 = scmp.ne.s32.totalorder %s2341_s1, %s2342_s26  ;;  %p2348_p1 = scmp.lt.s32.totalorder %s3107_s12, %s2342_s26 }
 0x1b9   : > { %p2344_p4 = pnand %p2343_p5, %p1448_p13  ;;  %p2349_p9 = por %p2348_p1, %p2347_p0 }
 0x1bb   : > { %p2345_p8 = pneg %p2344_p4 }
 0x1bd   : > { %p2350_p11 = pnand %p2349_p9, %p2345_p8 }
 0x1bf   : > { %2353 = shalt.err (!%p2350_p11)  }
 0x1c0   : > { %p2358_p3 = pnand %p3258_p10, %p1448_p13 }
 0x1c2   : > { %p2359_p12 = pneg %p2358_p3 }
 0x1c4   : > { %p2364_p2 = pnand %p2359_p12, %p3267_p7 }
 0x1c6   : > { %2367 = shalt.err (!%p2364_p2)  }
 0x1c7   : > { %1566 = dma.hbm_to_vmem [thread:$0]  (%p1448_p13), %s751_s2, 16, %s3248_s0, %s1251_s23 }
 0x1c8   : > { %s1262_s30 = scalar_lea.vmem %s3034_s20, 4 [#allocation2]  ;;  %s3583_s8 = scalar_lea.sflag %s3045_s13, 4 [#allocation3] }
 0x1c9   : > { %s777_s11 = sshll.u32 %s1262_s30, 4  ;;  %s803_s5 = sadd.s32 5, %s3028_s24  ;;  %s3305_s11 = int_to_ptr.vmem [resolvable:$true] %s777_s11 }
 0x1ca   : > { %s3307_s10 = sld [smem:[#allocation4 + %s803_s5]]  ;;  %s763_s7 = scalar_lea.hbm %s3578_s3, %s757_s29 }
 0x1cb   : > { %s3312_s25 = sld [smem:[#allocation6 + %s803_s5]]  ;;  %p1623_p10 = scmp.lt.s32.totalorder %s3283_s14, 0 }
 0x1cc   : > { %s775_s1 = sshll.u32 %s763_s7, 4  ;;  %p1454_p13 = scmp.ge.s32.totalorder %s3283_s14, 0  ;;  %s776_s1 = int_to_ptr.hbm [resolvable:$true] %s775_s1 }
 0x1cd   : > { %s2368_s23 = sshra.s32 %s776_s1, 4  ;;  %s2369_s23 = int_to_ptr.hbm [resolvable:$true] %s2368_s23 }
 0x1ce   : > { %s2370_s0 = scalar_lea.hbm %s2369_s23, 1  ;;  %p2375_p4 = scmp.lt.s32.totalorder %s2369_s23, %s3578_s3 }
 0x1cf   : > { %p2371_p7 = scmp.ne.s32.totalorder %s2369_s23, %s2370_s0  ;;  %p2376_p8 = scmp.lt.s32.totalorder %s3063_s18, %s2370_s0 }
 0x1d1   : > { %p2372_p6 = pnand %p2371_p7, %p1623_p10  ;;  %p2377_p0 = por %p2376_p8, %p2375_p4 }
 0x1d3   : > { %p2373_p5 = pneg %p2372_p6 }
 0x1d5   : > { %p2378_p1 = pnand %p2377_p0, %p2373_p5 }
 0x1d7   : > { %2381 = shalt.err (!%p2378_p1)  }
 0x1d8   : > { %s2382_s29 = sshra.s32 %s3305_s11, 4  ;;  %s2383_s29 = int_to_ptr.vmem [resolvable:$true] %s2382_s29 }
 0x1d9   : > { %s2384_s9 = scalar_lea.vmem %s2383_s29, 1  ;;  %p2389_p12 = scmp.lt.s32.totalorder %s2383_s29, [#allocation2] }
 0x1da   : > { %p3323_p9 = scmp.ne.s32.totalorder %s2383_s29, %s2384_s9  ;;  %p2390_p2 = scmp.lt.s32.totalorder %s3078_s19, %s2384_s9 }
 0x1dc   : > { %p2386_p11 = pnand %p3323_p9, %p1623_p10  ;;  %p3332_p7 = por %p2390_p2, %p2389_p12 }
 0x1de   : > { %p2387_p3 = pneg %p2386_p11 }
 0x1e0   : > { %p2392_p6 = pnand %p3332_p7, %p2387_p3 }
 0x1e2   : > { %2395 = shalt.err (!%p2392_p6)  }
 0x1e3   : > { %1568 = dma.hbm_to_vmem [thread:$0]  (%p1623_p10), %s776_s1, 16, %s3305_s11, %s3583_s8 }
 0x1e4   : > { %s785_s28 = scalar_lea.hbm %s3579_s4, %s3283_s14  ;;  %s1276_s7 = scalar_lea.vmem %s3034_s20, 5 [#allocation2] }
 0x1e5   : > { %s797_s23 = sshll.u32 %s785_s28, 4  ;;  %s810_s26 = scalar_lea.hbm %s3578_s3, %s3307_s10  ;;  %s798_s23 = int_to_ptr.hbm [resolvable:$true] %s797_s23 }
 0x1e6   : > { %p1625_p5 = scmp.lt.s32.totalorder %s3312_s25, 0  ;;  %s2396_s29 = sshra.s32 %s798_s23, 4  ;;  %s2397_s29 = int_to_ptr.hbm [resolvable:$true] %s2396_s29 }
 0x1e7   : > { %s2398_s9 = scalar_lea.hbm %s2397_s29, 1  ;;  %p2403_p10 = scmp.lt.s32.totalorder %s2397_s29, %s3579_s4 }
 0x1e8   : > { %p2399_p4 = scmp.ne.s32.totalorder %s2397_s29, %s2398_s9  ;;  %p2404_p1 = scmp.lt.s32.totalorder %s3107_s12, %s2398_s9 }
 0x1ea   : > { %p2400_p8 = pnand %p2399_p4, %p1454_p13  ;;  %p2405_p11 = por %p2404_p1, %p2403_p10 }
 0x1ec   : > { %p2401_p0 = pneg %p2400_p8 }
 0x1ee   : > { %p2406_p3 = pnand %p2405_p11, %p2401_p0 }
 0x1f0   : > { %2409 = shalt.err (!%p2406_p3)  }
 0x1f1   : > { %p2414_p12 = pnand %p3323_p9, %p1454_p13 }
 0x1f3   : > { %p2415_p2 = pneg %p2414_p12 }
 0x1f5   : > { %p2420_p6 = pnand %p2415_p2, %p3332_p7 }
 0x1f7   : > { %2423 = shalt.err (!%p2420_p6)  }
 0x1f8   : > { %s3606_s10 = scalar_lea.sflag %s3045_s13, 4 [#allocation3]  ;;  %s1279_s8 = scalar_lea.sflag %s3045_s13, 5 [#allocation3] }
 0x1f9   : > { %1570 = dma.hbm_to_vmem [thread:$0]  (%p1454_p13), %s798_s23, 16, %s3305_s11, %s3606_s10 }
 0x1fa   : > { %s3371_s5 = sshll.u32 %s810_s26, 4  ;;  %s824_s27 = sshll.u32 %s1276_s7, 4  ;;  %s823_s5 = int_to_ptr.hbm [resolvable:$true] %s3371_s5  ;;  %s3374_s27 = int_to_ptr.vmem [resolvable:$true] %s824_s27 }
 0x1fb   : > { %p1460_p9 = scmp.ge.s32.totalorder %s3312_s25, 0  ;;  %s2424_s30 = sshra.s32 %s823_s5, 4  ;;  %s2425_s30 = int_to_ptr.hbm [resolvable:$true] %s2424_s30 }
 0x1fc   : > { %s2426_s14 = scalar_lea.hbm %s2425_s30, 1  ;;  %p2431_p13 = scmp.lt.s32.totalorder %s2425_s30, %s3578_s3 }
 0x1fd   : > { %p2427_p7 = scmp.ne.s32.totalorder %s2425_s30, %s2426_s14  ;;  %p2432_p0 = scmp.lt.s32.totalorder %s3063_s18, %s2426_s14 }
 0x1ff   : > { %p2428_p4 = pnand %p2427_p7, %p1625_p5  ;;  %p2433_p10 = por %p2432_p0, %p2431_p13 }
 0x201   : > { %p2429_p8 = pneg %p2428_p4 }
 0x203   : > { %p2434_p1 = pnand %p2433_p10, %p2429_p8 }
 0x205   : > { %2437 = shalt.err (!%p2434_p1)  }
 0x206   : > { %s2438_s11 = sshra.s32 %s3374_s27, 4  ;;  %s2439_s11 = int_to_ptr.vmem [resolvable:$true] %s2438_s11 }
 0x207   : > { %s2440_s7 = scalar_lea.vmem %s2439_s11, 1  ;;  %p2445_p2 = scmp.lt.s32.totalorder %s2439_s11, [#allocation2] }
 0x208   : > { %p3384_p11 = scmp.ne.s32.totalorder %s2439_s11, %s2440_s7  ;;  %p2446_p6 = scmp.lt.s32.totalorder %s3078_s19, %s2440_s7 }
 0x20a   : > { %p2442_p3 = pnand %p3384_p11, %p1625_p5  ;;  %p3393_p7 = por %p2446_p6, %p2445_p2 }
 0x20c   : > { %p2443_p12 = pneg %p2442_p3 }
 0x20e   : > { %p2448_p4 = pnand %p3393_p7, %p2443_p12 }
 0x210   : > { %2451 = shalt.err (!%p2448_p4)  }
 0x211   : > { %1572 = dma.hbm_to_vmem [thread:$0]  (%p1625_p5), %s823_s5, 16, %s3374_s27, %s1279_s8 }
 0x212   : > { %s832_s29 = scalar_lea.hbm %s3579_s4, %s3312_s25  ;;  %s850_s9 = sadd.s32 6, %s3028_s24 }
 0x213   : > { %s844_s1 = sshll.u32 %s832_s29, 4  ;;  %s851_s10 = sld [smem:[#allocation4 + %s850_s9]]  ;;  %s845_s1 = int_to_ptr.hbm [resolvable:$true] %s844_s1 }
 0x214   : > { %s3409_s30 = sld [smem:[#allocation6 + %s850_s9]]  ;;  %s2452_s14 = sshra.s32 %s845_s1, 4  ;;  %s2453_s14 = int_to_ptr.hbm [resolvable:$true] %s2452_s14 }
 0x215   : > { %s2454_s17 = scalar_lea.hbm %s2453_s14, 1  ;;  %p2459_p5 = scmp.lt.s32.totalorder %s2453_s14, %s3579_s4 }
 0x216   : > { %p2455_p8 = scmp.ne.s32.totalorder %s2453_s14, %s2454_s17  ;;  %p2460_p10 = scmp.lt.s32.totalorder %s3107_s12, %s2454_s17 }
 0x218   : > { %p2456_p13 = pnand %p2455_p8, %p1460_p9  ;;  %p2461_p1 = por %p2460_p10, %p2459_p5 }
 0x21a   : > { %p2457_p0 = pneg %p2456_p13 }
 0x21c   : > { %p2462_p3 = pnand %p2461_p1, %p2457_p0 }
 0x21e   : > { %2465 = shalt.err (!%p2462_p3)  }
 0x21f   : > { %p2470_p12 = pnand %p3384_p11, %p1460_p9 }
 0x221   : > { %p2471_p2 = pneg %p2470_p12 }
 0x223   : > { %p2476_p6 = pnand %p2471_p2, %p3393_p7 }
 0x225   : > { %2479 = shalt.err (!%p2476_p6)  }
 0x226   : > { %1574 = dma.hbm_to_vmem [thread:$0]  (%p1460_p9), %s845_s1, 16, %s3374_s27, %s1279_s8 }
 0x227   : > { %s1290_s5 = scalar_lea.vmem %s3034_s20, 6 [#allocation2]  ;;  %s1293_s7 = scalar_lea.sflag %s3045_s13, 6 [#allocation3] }
 0x228   : > { %s871_s23 = sshll.u32 %s1290_s5, 4  ;;  %s897_s2 = sadd.s32 7, %s3028_s24  ;;  %s3431_s23 = int_to_ptr.vmem [resolvable:$true] %s871_s23 }
 0x229   : > { %s3433_s0 = sld [smem:[#allocation4 + %s897_s2]]  ;;  %s857_s29 = scalar_lea.hbm %s3578_s3, %s851_s10 }
 0x22a   : > { %s3438_s9 = sld [smem:[#allocation6 + %s897_s2]]  ;;  %p1627_p11 = scmp.lt.s32.totalorder %s3409_s30, 0 }
 0x22b   : > { %s869_s14 = sshll.u32 %s857_s29, 4  ;;  %p1466_p9 = scmp.ge.s32.totalorder %s3409_s30, 0  ;;  %s870_s14 = int_to_ptr.hbm [resolvable:$true] %s869_s14 }
 0x22c   : > { %s2480_s8 = sshra.s32 %s870_s14, 4  ;;  %s2481_s8 = int_to_ptr.hbm [resolvable:$true] %s2480_s8 }
 0x22d   : > { %s2482_s27 = scalar_lea.hbm %s2481_s8, 1  ;;  %p2487_p13 = scmp.lt.s32.totalorder %s2481_s8, %s3578_s3 }
 0x22e   : > { %p2483_p7 = scmp.ne.s32.totalorder %s2481_s8, %s2482_s27  ;;  %p2488_p0 = scmp.lt.s32.totalorder %s3063_s18, %s2482_s27 }
 0x230   : > { %p2484_p4 = pnand %p2483_p7, %p1627_p11  ;;  %p2489_p5 = por %p2488_p0, %p2487_p13 }
 0x232   : > { %p2485_p8 = pneg %p2484_p4 }
 0x234   : > { %p2490_p10 = pnand %p2489_p5, %p2485_p8 }
 0x236   : > { %2493 = shalt.err (!%p2490_p10)  }
 0x237   : > { %s2494_s10 = sshra.s32 %s3431_s23, 4  ;;  %s2495_s10 = int_to_ptr.vmem [resolvable:$true] %s2494_s10 }
 0x238   : > { %s2496_s17 = scalar_lea.vmem %s2495_s10, 1  ;;  %p2501_p2 = scmp.lt.s32.totalorder %s2495_s10, [#allocation2] }
 0x239   : > { %p3449_p1 = scmp.ne.s32.totalorder %s2495_s10, %s2496_s17  ;;  %p2502_p6 = scmp.lt.s32.totalorder %s3078_s19, %s2496_s17 }
 0x23b   : > { %p2498_p3 = pnand %p3449_p1, %p1627_p11  ;;  %p3458_p7 = por %p2502_p6, %p2501_p2 }
 0x23d   : > { %p2499_p12 = pneg %p2498_p3 }
 0x23f   : > { %p2504_p4 = pnand %p3458_p7, %p2499_p12 }
 0x241   : > { %2507 = shalt.err (!%p2504_p4)  }
 0x242   : > { %1576 = dma.hbm_to_vmem [thread:$0]  (%p1627_p11), %s870_s14, 16, %s3431_s23, %s1293_s7 }
 0x243   : > { %s879_s25 = scalar_lea.hbm %s3579_s4, %s3409_s30  ;;  %s1304_s26 = scalar_lea.vmem %s3034_s20, 7 [#allocation2] }
 0x244   : > { %s891_s29 = sshll.u32 %s879_s25, 4  ;;  %s904_s24 = scalar_lea.hbm %s3578_s3, %s3433_s0  ;;  %s892_s29 = int_to_ptr.hbm [resolvable:$true] %s891_s29 }
 0x245   : > { %p1629_p8 = scmp.lt.s32.totalorder %s3438_s9, 0  ;;  %s2508_s1 = sshra.s32 %s892_s29, 4  ;;  %s2509_s1 = int_to_ptr.hbm [resolvable:$true] %s2508_s1 }
 0x246   : > { %s2510_s10 = scalar_lea.hbm %s2509_s1, 1  ;;  %p2515_p11 = scmp.lt.s32.totalorder %s2509_s1, %s3579_s4 }
 0x247   : > { %p2511_p13 = scmp.ne.s32.totalorder %s2509_s1, %s2510_s10  ;;  %p2516_p10 = scmp.lt.s32.totalorder %s3107_s12, %s2510_s10 }
 0x249   : > { %p2512_p0 = pnand %p2511_p13, %p1466_p9  ;;  %p2517_p3 = por %p2516_p10, %p2515_p11 }
 0x24b   : > { %p2513_p5 = pneg %p2512_p0 }
 0x24d   : > { %p2518_p12 = pnand %p2517_p3, %p2513_p5 }
 0x24f   : > { %2521 = shalt.err (!%p2518_p12)  }
 0x250   : > { %p2526_p2 = pnand %p3449_p1, %p1466_p9 }
 0x252   : > { %p2527_p6 = pneg %p2526_p2 }
 0x254   : > { %p2532_p4 = pnand %p2527_p6, %p3458_p7 }
 0x256   : > { %2535 = shalt.err (!%p2532_p4)  }
 0x257   : > { %1578 = dma.hbm_to_vmem [thread:$0]  (%p1466_p9), %s892_s29, 16, %s3431_s23, %s1293_s7 }
 0x258   : > { %s1307_s20 = scalar_lea.sflag %s3045_s13, 7 [#allocation3]  ;;  %s3497_s0 = sshll.u32 %s904_s24, 4  ;;  %s917_s0 = int_to_ptr.hbm [resolvable:$true] %s3497_s0 }
 0x259   : > { %s918_s28 = sshll.u32 %s1304_s26, 4  ;;  %p1472_p1 = scmp.ge.s32.totalorder %s3438_s9, 0  ;;  %s3500_s28 = int_to_ptr.vmem [resolvable:$true] %s918_s28 }
 0x25a   : > { %s2536_s11 = sshra.s32 %s917_s0, 4  ;;  %s2537_s11 = int_to_ptr.hbm [resolvable:$true] %s2536_s11 }
 0x25b   : > { %s2538_s30 = scalar_lea.hbm %s2537_s11, 1  ;;  %p2543_p9 = scmp.lt.s32.totalorder %s2537_s11, %s3578_s3 }
 0x25c   : > { %p2539_p7 = scmp.ne.s32.totalorder %s2537_s11, %s2538_s30  ;;  %p2544_p5 = scmp.lt.s32.totalorder %s3063_s18, %s2538_s30 }
 0x25e   : > { %p2540_p13 = pnand %p2539_p7, %p1629_p8  ;;  %p2545_p11 = por %p2544_p5, %p2543_p9 }
 0x260   : > { %p2541_p0 = pneg %p2540_p13 }
 0x262   : > { %p2546_p10 = pnand %p2545_p11, %p2541_p0 }
 0x264   : > { %2549 = shalt.err (!%p2546_p10)  }
 0x265   : > { %s2550_s7 = sshra.s32 %s3500_s28, 4  ;;  %s2551_s7 = int_to_ptr.vmem [resolvable:$true] %s2550_s7 }
 0x266   : > { %s2552_s23 = scalar_lea.vmem %s2551_s7, 1  ;;  %p2557_p6 = scmp.lt.s32.totalorder %s2551_s7, [#allocation2] }
 0x267   : > { %p3510_p3 = scmp.ne.s32.totalorder %s2551_s7, %s2552_s23  ;;  %p2558_p4 = scmp.lt.s32.totalorder %s3078_s19, %s2552_s23 }
 0x269   : > { %p2554_p12 = pnand %p3510_p3, %p1629_p8  ;;  %p3519_p7 = por %p2558_p4, %p2557_p6 }
 0x26b   : > { %p2555_p2 = pneg %p2554_p12 }
 0x26d   : > { %p2560_p13 = pnand %p3519_p7, %p2555_p2 }
 0x26f   : > { %2563 = shalt.err (!%p2560_p13)  }
 0x270   : > { %1580 = dma.hbm_to_vmem [thread:$0]  (%p1629_p8), %s917_s0, 16, %s3500_s28, %s1307_s20 }
 0x271   : > { %s926_s19 = scalar_lea.hbm %s3579_s4, %s3438_s9 }
 0x272   : > { %s938_s8 = sshll.u32 %s926_s19, 4  ;;  %s939_s8 = int_to_ptr.hbm [resolvable:$true] %s938_s8 }
 0x273   : > { %s2564_s27 = sshra.s32 %s939_s8, 4  ;;  %s2565_s27 = int_to_ptr.hbm [resolvable:$true] %s2564_s27 }
 0x274   : > { %s2566_s24 = scalar_lea.hbm %s2565_s27, 1  ;;  %p2571_p11 = scmp.lt.s32.totalorder %s2565_s27, %s3579_s4 }
 0x275   : > { %p2567_p0 = scmp.ne.s32.totalorder %s2565_s27, %s2566_s24  ;;  %p2572_p10 = scmp.lt.s32.totalorder %s3107_s12, %s2566_s24 }
 0x277   : > { %p2568_p9 = pnand %p2567_p0, %p1472_p1  ;;  %p2573_p12 = por %p2572_p10, %p2571_p11 }
 0x279   : > { %p2569_p5 = pneg %p2568_p9 }
 0x27b   : > { %p2574_p8 = pnand %p2573_p12, %p2569_p5 }
 0x27d   : > { %2577 = shalt.err (!%p2574_p8)  }
 0x27e   : > { %p2582_p2 = pnand %p3510_p3, %p1472_p1 }
 0x280   : > { %p2583_p6 = pneg %p2582_p2 }
 0x282   : > { %p2588_p4 = pnand %p2583_p6, %p3519_p7 }
 0x284   : > { %2591 = shalt.err (!%p2588_p4)  }
 0x285   : > { %1582 = dma.hbm_to_vmem [thread:$0]  (%p1472_p1), %s939_s8, 16, %s3500_s28, %s1307_s20 }
 0x286 PF: > { %s1478_s12 = sshll.u32 %s3616_s15, 3 }
 0x287   : > { %s945_s14 = scalar_lea.sflag [#allocation3], %s1478_s12 }
 0x288   : > { %2604 = dma.done.wait %s945_s14, 16 }
 0x289   : > { %2605 = vsyncadd %s945_s14, 4294967280  ;;  %s1319_s17 = scalar_lea.sflag %s945_s14, 1 [#allocation3] }
 0x28a   : > { %2606 = dma.done.wait %s1319_s17, 16 }
 0x28b   : > { %2607 = vsyncadd %s1319_s17, 4294967280  ;;  %s1322_s0 = scalar_lea.sflag %s945_s14, 2 [#allocation3] }
 0x28c   : > { %2608 = dma.done.wait %s1322_s0, 16 }
 0x28d   : > { %2609 = vsyncadd %s1322_s0, 4294967280  ;;  %s1325_s11 = scalar_lea.sflag %s945_s14, 3 [#allocation3] }
 0x28e   : > { %2610 = dma.done.wait %s1325_s11, 16 }
 0x28f   : > { %2611 = vsyncadd %s1325_s11, 4294967280  ;;  %s1328_s13 = scalar_lea.sflag %s945_s14, 4 [#allocation3] }
 0x290   : > { %2612 = dma.done.wait %s1328_s13, 16 }
 0x291   : > { %2613 = vsyncadd %s1328_s13, 4294967280  ;;  %s1331_s9 = scalar_lea.sflag %s945_s14, 5 [#allocation3] }
 0x292   : > { %2614 = dma.done.wait %s1331_s9, 16 }
 0x293   : > { %2615 = vsyncadd %s1331_s9, 4294967280  ;;  %s1334_s20 = scalar_lea.sflag %s945_s14, 6 [#allocation3] }
 0x294   : > { %2616 = dma.done.wait %s1334_s20, 16 }
 0x295   : > { %2617 = vsyncadd %s1334_s20, 4294967280  ;;  %s1337_s28 = scalar_lea.sflag %s945_s14, 7 [#allocation3] }
 0x296   : > { %2618 = dma.done.wait %s1337_s28, 16 }
 0x297   : > { %2619 = vsyncadd %s1337_s28, 4294967280  ;;  %s1486_s30 = sshll.u32 %s2678_s22, 3  ;;  %v979_v1 = vlaneseq  ;;  %s976_s10 = scalar_lea.vmem [#allocation2], %s1478_s12  ;;  %v1041_v31 = vld [vmem:[%s3581_s6] sm:$0x1] }
 0x298   : > { %s982_s5 = sld [smem:[#allocation8 + %s1486_s30]]  ;;  %s986_s2 = sadd.s32 1, %s1486_s30  ;;  %v1022_v3 = vstv %s1486_s30  ;;  %v977_v6 = vld [vmem:[%s976_s10] sm:$0xff] }
 0x299   : > { %v980_v2 = vshrl.u32 %v979_v1, 7  ;;  %s987_s7 = sld [smem:[#allocation8 + %s986_s2]]  ;;  %s991_s23 = sadd.s32 2, %s1486_s30  ;;  %v1044_v38 = vld [vmem:[%s3581_s6 + $0x1] sm:$0x1] }
 0x29a   : > { %s992_s25 = sld [smem:[#allocation8 + %s991_s23]]  ;;  %s996_s18 = sadd.s32 3, %s1486_s30 }
 0x29b   : > { %s997_s26 = sld [smem:[#allocation8 + %s996_s18]]  ;;  %s1001_s29 = sadd.s32 4, %s1486_s30  ;;  %vm981_vm0 = vcmp.eq.s32.totalorder %v980_v2, 0  ;;  %vm985_vm1 = vcmp.eq.s32.totalorder %v980_v2, 1  ;;  %v1023_v4 = vadd.s32 %v1022_v3, %v980_v2  ;;  %vm990_vm2 = vcmp.eq.s32.totalorder %v980_v2, 2 }
 0x29c   : > { %s1002_s19 = sld [smem:[#allocation8 + %s1001_s29]]  ;;  %s1006_s8 = sadd.s32 5, %s1486_s30  ;;  %vm995_vm3 = vcmp.eq.s32.totalorder %v980_v2, 3  ;;  %vm1000_vm5 = vcmp.eq.s32.totalorder %v980_v2, 4  ;;  %vm1005_vm6 = vcmp.eq.s32.totalorder %v980_v2, 5  ;;  %vm1010_vm7 = vcmp.eq.s32.totalorder %v980_v2, 6 }
 0x29d   : > { %s1007_s27 = sld [smem:[#allocation8 + %s1006_s8]]  ;;  %s1011_s24 = sadd.s32 6, %s1486_s30  ;;  %vm1024_vm4 = vcmp.lt.s32.totalorder %v1023_v4, 16  ;;  %vm1015_vm8 = vcmp.eq.s32.totalorder %v980_v2, 7 }
 0x29e   : > { %v983_v5 = vstv %s982_s5  ;;  %s1012_s22 = sld [smem:[#allocation8 + %s1011_s24]]  ;;  %s1016_s1 = sadd.s32 7, %s1486_s30  ;;  %v1027_v11 = vsel %vm1024_vm4, %v977_v6, 0.0 }
 0x29f   : > { %v984_v7 = vsel %vm981_vm0, %v983_v5, 0.0  ;;  %v988_v8 = vstv %s987_s7  ;;  %s1017_s14 = sld [smem:[#allocation8 + %s1016_s1]]  ;;  %v1028_v14 = vrot.slane %v1027_v11, 4 }
 0x2a0   : > { %v989_v9 = vsel %vm985_vm1, %v988_v8, %v984_v7  ;;  %v993_v10 = vstv %s992_s25 }
 0x2a1   : > { %v994_v12 = vsel %vm990_vm2, %v993_v10, %v989_v9  ;;  %v998_v13 = vstv %s997_s26  ;;  %v1029_v19 = vadd.f32 %v1028_v14, %v1027_v11 }
 0x2a2   : > { %v999_v15 = vsel %vm995_vm3, %v998_v13, %v994_v12  ;;  %v1003_v16 = vstv %s1002_s19 }
 0x2a3   : > { %v1004_v17 = vsel %vm1000_vm5, %v1003_v16, %v999_v15  ;;  %v1008_v18 = vstv %s1007_s27  ;;  %v1030_v24 = vrot.slane %v1029_v19, 2 }
 0x2a4   : > { %v1009_v20 = vsel %vm1005_vm6, %v1008_v18, %v1004_v17  ;;  %v1013_v21 = vstv %s1012_s22 }
 0x2a5   : > { %v1014_v22 = vsel %vm1010_vm7, %v1013_v21, %v1009_v20  ;;  %v1018_v23 = vstv %s1017_s14  ;;  %v1031_v27 = vadd.f32 %v1030_v24, %v1029_v19 }
 0x2a6   : > { %v1019_v25 = vsel %vm1015_vm8, %v1018_v23, %v1014_v22 }
 0x2a7   : > { %v1020_v26 = vmul.f32 %v1019_v25, %v977_v6  ;;  %v1032_v29 = vrot.slane %v1031_v27, 1 }
 0x2a9   : > { %1021 = vst [vmem:[%s2716_s16] sm:$0xff] %v1020_v26  ;;  %v1034_v28 = vsel %vm1024_vm4, %v1020_v26, 0.0  ;;  %v1033_v32 = vadd.f32 %v1032_v29, %v1031_v27 }
 0x2aa   : > { %v1035_v30 = vrot.slane %v1034_v28, 4 }
 0x2ab   : > { %v1042_v34 = vadd.f32 %v1041_v31, %v1033_v32 }
 0x2ac   : > { %v1036_v33 = vadd.f32 %v1035_v30, %v1034_v28 }
 0x2ad   : > { %1043 = vst [vmem:[%s3581_s6] sm:$0x1] %v1042_v34 }
 0x2ae   : > { %v1037_v35 = vrot.slane %v1036_v33, 2 }
 0x2b0   : > { %v1038_v36 = vadd.f32 %v1037_v35, %v1036_v33 }
 0x2b2   : > { %v1039_v37 = vrot.slane %v1038_v36, 1 }
 0x2b4   : > { %v1040_v39 = vadd.f32 %v1039_v37, %v1038_v36 }
 0x2b6   : > { %v1045_v40 = vadd.f32 %v1044_v38, %v1040_v39 }
 0x2b8   : > { %1046 = vst [vmem:[%s3581_s6 + $0x1] sm:$0x1] %v1045_v40 }
 0x2b9 PF: > { %s19_s21 = sadd.s32 1, %s2622_s21  }
 0x2ba   : > { %p16_p1 = scmp.ge.s32.totalorder %s19_s21, 4  }
 0x2bc   :  { %18 = sbr.rel (!%p16_p1) target bundleno = 7 (0x7), region = 460 }
 0x2c1   :  { %1072 = vsyncpa [#allocation5], 1 }
 0x2c2   :  { %1074 = vsyncpa [#allocation5 + $0x1], 1 }
 0x2c3   :  { %1075 = vsyncpa [#allocation7], 1 }
 0x2c4   :  { %1076 = vsyncmov [#allocation3] }
 0x2c7   :  { %s1077_s20 = vpop.sfrf %1076 }
 0x2c8   :  { %p1489_p3 = scmp.ne.s32.totalorder %s1077_s20, 0 }
 0x2ca   :  { %1081 = shalt.err (%p1489_p3)  }
 0x2cb   :  { %1083 = vsyncmov [#allocation3 + $0x1] }
 0x2ce   :  { %s1084_s28 = vpop.sfrf %1083 }
 0x2cf   :  { %p1490_p7 = scmp.ne.s32.totalorder %s1084_s28, 0 }
 0x2d1   :  { %1088 = shalt.err (%p1490_p7)  }
 0x2d2   :  { %1090 = vsyncmov [#allocation3 + $0x2] }
 0x2d5   :  { %s1091_s30 = vpop.sfrf %1090 }
 0x2d6   :  { %p1491_p13 = scmp.ne.s32.totalorder %s1091_s30, 0 }
 0x2d8   :  { %1095 = shalt.err (%p1491_p13)  }
 0x2d9   :  { %1097 = vsyncmov [#allocation3 + $0x3] }
 0x2dc   :  { %s1098_s5 = vpop.sfrf %1097 }
 0x2dd   :  { %p1492_p0 = scmp.ne.s32.totalorder %s1098_s5, 0 }
 0x2df   :  { %1102 = shalt.err (%p1492_p0)  }
 0x2e0   :  { %1104 = vsyncmov [#allocation3 + $0x4] }
 0x2e3   :  { %s1105_s3 = vpop.sfrf %1104 }
 0x2e4   :  { %p1493_p9 = scmp.ne.s32.totalorder %s1105_s3, 0 }
 0x2e6   :  { %1109 = shalt.err (%p1493_p9)  }
 0x2e7   :  { %1111 = vsyncmov [#allocation3 + $0x5] }
 0x2ea   :  { %s1112_s4 = vpop.sfrf %1111 }
 0x2eb   :  { %p1494_p5 = scmp.ne.s32.totalorder %s1112_s4, 0 }
 0x2ed   :  { %1116 = shalt.err (%p1494_p5)  }
 0x2ee   :  { %1118 = vsyncmov [#allocation3 + $0x6] }
 0x2f1   :  { %s1119_s6 = vpop.sfrf %1118 }
 0x2f2   :  { %p1495_p11 = scmp.ne.s32.totalorder %s1119_s6, 0 }
 0x2f4   :  { %1123 = shalt.err (%p1495_p11)  }
 0x2f5   :  { %1125 = vsyncmov [#allocation3 + $0x7] }
 0x2f8   :  { %s1126_s21 = vpop.sfrf %1125 }
 0x2f9   :  { %p1496_p10 = scmp.ne.s32.totalorder %s1126_s21, 0 }
 0x2fb   :  { %1130 = shalt.err (%p1496_p10)  }
 0x2fc   :  { %1132 = vsyncmov [#allocation3 + $0x8] }
 0x2ff   :  { %s1133_s2 = vpop.sfrf %1132 }
 0x300   :  { %p1497_p12 = scmp.ne.s32.totalorder %s1133_s2, 0 }
 0x302   :  { %1137 = shalt.err (%p1497_p12)  }
 0x303   :  { %1139 = vsyncmov [#allocation3 + $0x9] }
 0x306   :  { %s1140_s7 = vpop.sfrf %1139 }
 0x307   :  { %p1498_p8 = scmp.ne.s32.totalorder %s1140_s7, 0 }
 0x309   :  { %1144 = shalt.err (%p1498_p8)  }
 0x30a   :  { %1146 = vsyncmov [#allocation3 + $0xa] }
 0x30d   :  { %s1147_s23 = vpop.sfrf %1146 }
 0x30e   :  { %p1499_p2 = scmp.ne.s32.totalorder %s1147_s23, 0 }
 0x310   :  { %1151 = shalt.err (%p1499_p2)  }
 0x311   :  { %1153 = vsyncmov [#allocation3 + $0xb] }
 0x314   :  { %s1154_s25 = vpop.sfrf %1153 }
 0x315   :  { %p1500_p6 = scmp.ne.s32.totalorder %s1154_s25, 0 }
 0x317   :  { %1158 = shalt.err (%p1500_p6)  }
 0x318   :  { %1160 = vsyncmov [#allocation3 + $0xc] }
 0x31b   :  { %s1161_s18 = vpop.sfrf %1160 }
 0x31c   :  { %p1501_p4 = scmp.ne.s32.totalorder %s1161_s18, 0 }
 0x31e   :  { %1165 = shalt.err (%p1501_p4)  }
 0x31f   :  { %1167 = vsyncmov [#allocation3 + $0xd] }
 0x322   :  { %s1168_s26 = vpop.sfrf %1167 }
 0x323   :  { %p1502_p1 = scmp.ne.s32.totalorder %s1168_s26, 0 }
 0x325   :  { %1172 = shalt.err (%p1502_p1)  }
 0x326   :  { %1174 = vsyncmov [#allocation3 + $0xe] }
 0x329   :  { %s1175_s29 = vpop.sfrf %1174 }
 0x32a   :  { %p1503_p3 = scmp.ne.s32.totalorder %s1175_s29, 0 }
 0x32c   :  { %1179 = shalt.err (%p1503_p3)  }
 0x32d   :  { %1181 = vsyncmov [#allocation3 + $0xf] }
 0x330   :  { %s1182_s19 = vpop.sfrf %1181 }
 0x331   :  { %p1504_p7 = scmp.ne.s32.totalorder %s1182_s19, 0 }
 0x333   :  { %1186 = shalt.err (%p1504_p7)  }

</bundles_post_ra>
